<compile_context>
chip_gen: v6e
topology: v6e:2x2x1
jax: 0.10.0
libtpu: 0.0.40
codegen_flags: <defaults>
</compile_context>

<pallas_src>
import numpy as np
import jax
import jax.numpy as jnp
from jax.experimental import pallas as pl
from jax.experimental.pallas import tpu as pltpu


def _blur_filter():
    f1 = np.array([1.0, 3.0, 3.0, 1.0], dtype=np.float64)
    f = np.outer(f1, f1)
    return (f / f.sum()).astype(np.float32)          # 4x4 low-pass, sums to 1


def _selection_matrices(H, W):
    """Constant 0/1 matrices for padding / re-rasterisation / stride-2 subsampling."""
    Wp, Wq = W + 2, W + 4
    Ho, Wo = H // 2, W // 2
    P0, P1 = (H + 2) * Wp, (H + 4) * Wq
    L1 = (H - 1) * Wp + W            # conv1 output slab length (Wp raster)
    Lc = (H - 2) * Wq + (W - 1)      # conv2 stride-1 output slab length (Wq raster)
    Ls = (H - 2) * Wp + (W - 1)      # skip-blur output slab length (Wp raster)

    h = np.arange(H)[:, None]
    w = np.arange(W)[None, :]
    # embed H x W into the zero-padded (H+2) x (W+2) raster
    pin = np.zeros((H * W, P0), np.float32)
    pin[(h * W + w).ravel(), ((h + 1) * Wp + (w + 1)).ravel()] = 1.0
    # take the valid conv1 outputs (Wp raster) into the zero-padded (H+4) x (W+4) raster
    e1 = np.zeros((L1, P1), np.float32)
    e1[(h * Wp + w).ravel(), ((h + 2) * Wq + (w + 2)).ravel()] = 1.0

    ho = np.arange(Ho)[:, None]
    wo = np.arange(Wo)[None, :]
    # stride-2 subsample of the conv2 stride-1 slab (Wq raster)
    d2 = np.zeros((Lc, Ho * Wo), np.float32)
    d2[((2 * ho) * Wq + 2 * wo).ravel(), (ho * Wo + wo).ravel()] = 1.0
    # stride-2 subsample of the skip-blur slab (Wp raster)
    ds = np.zeros((Ls, Ho * Wo), np.float32)
    ds[((2 * ho) * Wp + 2 * wo).ravel(), (ho * Wo + wo).ravel()] = 1.0
    return pin, e1, d2, ds


def _make_kernel(Cin, Cout, H, W, f):
    Wp, Wq = W + 2, W + 4
    L1 = (H - 1) * Wp + W            # conv1 output slab (Wp raster)
    Lb = H * Wq + (W + 1)            # blur-of-conv1 output slab (Wq raster)
    Lc = (H - 2) * Wq + (W - 1)      # conv2 stride-1 output slab (Wq raster)
    Ls = (H - 2) * Wp + (W - 1)      # skip-blur output slab (Wp raster)
    sqrt2 = float(np.sqrt(2.0))
    inv_sqrt2 = float(1.0 / np.sqrt(2.0))
    fvals = [[float(f[p, q]) for q in range(4)] for p in range(4)]

    def lrelu(v):
        return jnp.where(v >= 0.0, v, 0.2 * v) * sqrt2

    def kernel(x_ref, w1_ref, b1_ref, w2_ref, b2_ref, ws_ref,
               pin_ref, e1_ref, d2_ref, ds_ref, o_ref):
        # x_ref: [1, Cin, H*W]   o_ref: [1, Cout, (H//2)*(W//2)]
        x = x_ref[0]                                                       # [Cin, H*W]

        # zero-pad (pad=1) into the (H+2)x(W+2) raster via a selection matmul
        xp = jnp.dot(x, pin_ref[...], preferred_element_type=jnp.float32)  # [Cin, P0]

        # ---- conv1: 3x3, pad 1 -> 9 tap matmuls on the flattened raster ----
        y1 = jnp.zeros((Cin, L1), dtype=jnp.float32)
        for dy in range(3):
            for dx in range(3):
                off = dy * Wp + dx
                y1 = y1 + jnp.dot(w1_ref[dy * 3 + dx], xp[:, off:off + L1],
                                  preferred_element_type=jnp.float32)
        a1 = lrelu(y1 + b1_ref[...])                                       # bias + lrelu*sqrt(2)

        # re-rasterise + zero-pad by 2 into the (H+4)x(W+4) raster
        a1p = jnp.dot(a1, e1_ref[...], preferred_element_type=jnp.float32)  # [Cin, P1]

        # ---- blur: depthwise 4x4 (16 constant-weighted shifted adds, VPU) ----
        tb = jnp.zeros((Cin, Lb), dtype=jnp.float32)
        for p in range(4):
            for q in range(4):
                off = p * Wq + q
                tb = tb + fvals[p][q] * a1p[:, off:off + Lb]

        # ---- conv2: 3x3 computed at stride 1, then subsampled by the D2 matmul ----
        z = jnp.zeros((Cout, Lc), dtype=jnp.float32)
        for dy in range(3):
            for dx in range(3):
                off = dy * Wq + dx
                z = z + jnp.dot(w2_ref[dy * 3 + dx], tb[:, off:off + Lc],
                                preferred_element_type=jnp.float32)
        y2 = jnp.dot(z, d2_ref[...], preferred_element_type=jnp.float32)   # [Cout, Ho*Wo]
        a2 = lrelu(y2 + b2_ref[...])

        # ---- skip: blur(x, pad 1), subsample via Ds, then 1x1 conv ----
        sb = jnp.zeros((Cin, Ls), dtype=jnp.float32)
        for p in range(4):
            for q in range(4):
                off = p * Wp + q
                sb = sb + fvals[p][q] * xp[:, off:off + Ls]
        ssub = jnp.dot(sb, ds_ref[...], preferred_element_type=jnp.float32)    # [Cin, Ho*Wo]
        skip = jnp.dot(ws_ref[...], ssub, preferred_element_type=jnp.float32)  # [Cout, Ho*Wo]

        o_ref[0] = ((a2 + skip) * inv_sqrt2).astype(o_ref.dtype)

    return kernel


def encoder_resblock_forward(x, weight1, bias1, weight2, bias2, weight_skip):
    """x: [B, Cin, H, W] float32 (NCHW). Returns [B, Cout, H//2, W//2]."""
    B, Cin, H, W = x.shape
    Cout = weight2.shape[0]
    assert H % 2 == 0 and W % 2 == 0
    Ho, Wo = H // 2, W // 2
    Wp, Wq = W + 2, W + 4
    P0, P1 = (H + 2) * Wp, (H + 4) * Wq
    L1 = (H - 1) * Wp + W
    Lc = (H - 2) * Wq + (W - 1)
    Ls = (H - 2) * Wp + (W - 1)

    f = _blur_filter()
    pin, e1, d2, ds = _selection_matrices(H, W)

    # fold the Conv2dLayer weight gains into the (tiny) weights on the host
    g1 = float(1.0 / np.sqrt(Cin * 9))      # kernel_size = 3
    gs = float(1.0 / np.sqrt(Cin))          # kernel_size = 1
    w1_taps = (jnp.transpose(weight1, (2, 3, 0, 1)).reshape(9, Cin, Cin) * g1).astype(jnp.float32)
    w2_taps = (jnp.transpose(weight2, (2, 3, 0, 1)).reshape(9, Cout, Cin) * g1).astype(jnp.float32)
    w_skip = (weight_skip[:, :, 0, 0] * gs).astype(jnp.float32)
    b1c = bias1.reshape(Cin, 1).astype(jnp.float32)
    b2c = bias2.reshape(Cout, 1).astype(jnp.float32)

    x_flat = x.reshape(B, Cin, H * W).astype(jnp.float32)   # channel-first, NO transpose

    kernel = _make_kernel(Cin, Cout, H, W, f)

    out = pl.pallas_call(
        kernel,
        out_shape=jax.ShapeDtypeStruct((B, Cout, Ho * Wo), jnp.float32),
        grid_spec=pltpu.PrefetchScalarGridSpec(
            num_scalar_prefetch=0,
            grid=(B,),
            in_specs=[
                pl.BlockSpec((1, Cin, H * W), lambda b: (b, 0, 0)),   # x (per batch)
                pl.BlockSpec((9, Cin, Cin), lambda b: (0, 0, 0)),     # conv1 taps (gain folded)
                pl.BlockSpec((Cin, 1), lambda b: (0, 0)),             # conv1 bias
                pl.BlockSpec((9, Cout, Cin), lambda b: (0, 0, 0)),    # conv2 taps (gain folded)
                pl.BlockSpec((Cout, 1), lambda b: (0, 0)),            # conv2 bias
                pl.BlockSpec((Cout, Cin), lambda b: (0, 0)),          # skip 1x1 weight
                pl.BlockSpec((H * W, P0), lambda b: (0, 0)),          # pad-1 embed matrix
                pl.BlockSpec((L1, P1), lambda b: (0, 0)),             # re-raster/pad-2 embed
                pl.BlockSpec((Lc, Ho * Wo), lambda b: (0, 0)),        # conv2 stride-2 select
                pl.BlockSpec((Ls, Ho * Wo), lambda b: (0, 0)),        # skip stride-2 select
            ],
            out_specs=pl.BlockSpec((1, Cout, Ho * Wo), lambda b: (b, 0, 0)),
        ),
        compiler_params=pltpu.CompilerParams(
            dimension_semantics=("parallel",)),
    )(x_flat, w1_taps, b1c, w2_taps, b2c, w_skip,
      jnp.asarray(pin), jnp.asarray(e1), jnp.asarray(d2), jnp.asarray(ds))

    return out.reshape(B, Cout, Ho, Wo)


# ----------------------------- pure-JAX reference ------------------------------------------
def _conv_nchw(x, w, stride, padding, groups=1):
    return jax.lax.conv_general_dilated(
        x, w, window_strides=(stride, stride),
        padding=((padding, padding), (padding, padding)),
        dimension_numbers=("NCHW", "OIHW", "NCHW"),
        feature_group_count=groups,
        precision=jax.lax.Precision.HIGHEST)


def encoder_resblock_reference(x, weight1, bias1, weight2, bias2, weight_skip):
    B, Cin, H, W = x.shape
    f = jnp.asarray(_blur_filter())
    fk = jnp.tile(f[None, None], (Cin, 1, 1, 1))          # depthwise blur kernel
    g1 = float(1.0 / np.sqrt(Cin * 9))
    gs = float(1.0 / np.sqrt(Cin))
    sqrt2 = float(np.sqrt(2.0))
    lrelu = lambda v: jnp.where(v >= 0.0, v, 0.2 * v) * sqrt2

    y = _conv_nchw(x, weight1 * g1, 1, 1)                 # conv1 (3x3, pad 1)
    y = lrelu(y + bias1[None, :, None, None])
    yb = _conv_nchw(y, fk, 1, 2, groups=Cin)              # blur (pad 2)
    y2 = _conv_nchw(yb, weight2 * g1, 2, 0)               # 3x3, stride 2
    y2 = lrelu(y2 + bias2[None, :, None, None])
    xb = _conv_nchw(x, fk, 2, 1, groups=Cin)              # skip blur (pad 1, stride 2)
    sk = _conv_nchw(xb, weight_skip * gs, 1, 0)           # 1x1, no bias, linear
    return (y2 + sk) / sqrt2


if __name__ == "__main__":
    B, Cin, Cout, H, W = 2, 4, 8, 16, 16

    key = jax.random.PRNGKey(0)
    kx, k1, kb1, k2, kb2, ks = jax.random.split(key, 6)

    x = jax.random.normal(kx, (B, Cin, H, W), dtype=jnp.float32)
    # parameters (randn weights as in the module init; nonzero biases to exercise the bias path)
    weight1 = jax.random.normal(k1, (Cin, Cin, 3, 3), dtype=jnp.float32)
    bias1 = 0.1 * jax.random.normal(kb1, (Cin,), dtype=jnp.float32)
    weight2 = jax.random.normal(k2, (Cout, Cin, 3, 3), dtype=jnp.float32)
    bias2 = 0.1 * jax.random.normal(kb2, (Cout,), dtype=jnp.float32)
    weight_skip = jax.random.normal(ks, (Cout, Cin, 1, 1), dtype=jnp.float32)

    out = encoder_resblock_forward(x, weight1, bias1, weight2, bias2, weight_skip)
    out = jax.block_until_ready(out)
    assert out.shape == (B, Cout, H // 2, W // 2)

    ref = encoder_resblock_reference(x, weight1, bias1, weight2, bias2, weight_skip)
    # tolerance covers possible reduced-precision MXU passes for f32 matmuls
    np.testing.assert_allclose(np.asarray(out), np.asarray(ref), rtol=1e-2, atol=1e-2)

    print("KERNEL_OK")
</pallas_src>

<mosaic_0001>
module attributes {stable_mosaic.version = 11 : i64} {
  func.func @kernel(%arg0: i32, %arg1: memref<1x4x256xf32, #tpu.memory_space<vmem>>, %arg2: memref<9x4x4xf32, #tpu.memory_space<vmem>>, %arg3: memref<4x1xf32, #tpu.memory_space<vmem>>, %arg4: memref<9x8x4xf32, #tpu.memory_space<vmem>>, %arg5: memref<8x1xf32, #tpu.memory_space<vmem>>, %arg6: memref<8x4xf32, #tpu.memory_space<vmem>>, %arg7: memref<256x324xf32, #tpu.memory_space<vmem>>, %arg8: memref<286x400xf32, #tpu.memory_space<vmem>>, %arg9: memref<295x64xf32, #tpu.memory_space<vmem>>, %arg10: memref<267x64xf32, #tpu.memory_space<vmem>>, %arg11: memref<1x8x64xf32, #tpu.memory_space<vmem>>) attributes {dimension_semantics = [#tpu.dimension_semantics<parallel>], iteration_bounds = array<i64: 2>, scalar_prefetch = 0 : i64, scratch_operands = 0 : i64, tpu.core_type = #tpu.core_type<tc>, window_params = [{transform_indices = @transform_0, window_bounds = array<i64: 1, 4, 256>}, {pipeline_mode = #tpu.pipeline_mode<synchronous>, transform_indices = @transform_1, window_bounds = array<i64: 9, 4, 4>}, {pipeline_mode = #tpu.pipeline_mode<synchronous>, transform_indices = @transform_2, window_bounds = array<i64: 4, 1>}, {pipeline_mode = #tpu.pipeline_mode<synchronous>, transform_indices = @transform_3, window_bounds = array<i64: 9, 8, 4>}, {pipeline_mode = #tpu.pipeline_mode<synchronous>, transform_indices = @transform_4, window_bounds = array<i64: 8, 1>}, {pipeline_mode = #tpu.pipeline_mode<synchronous>, transform_indices = @transform_5, window_bounds = array<i64: 8, 4>}, {pipeline_mode = #tpu.pipeline_mode<synchronous>, transform_indices = @transform_6, window_bounds = array<i64: 256, 324>}, {pipeline_mode = #tpu.pipeline_mode<synchronous>, transform_indices = @transform_7, window_bounds = array<i64: 286, 400>}, {pipeline_mode = #tpu.pipeline_mode<synchronous>, transform_indices = @transform_8, window_bounds = array<i64: 295, 64>}, {pipeline_mode = #tpu.pipeline_mode<synchronous>, transform_indices = @transform_9, window_bounds = array<i64: 267, 64>}, {transform_indices = @transform_10, window_bounds = array<i64: 1, 8, 64>}]} {
    %c0 = arith.constant 0 : index
    %c0_0 = arith.constant 0 : index
    %c0_1 = arith.constant 0 : index
    %0 = vector.load %arg1[%c0, %c0_0, %c0_1] : memref<1x4x256xf32, #tpu.memory_space<vmem>>, vector<1x4x256xf32>
    %1 = vector.shape_cast %0 : vector<1x4x256xf32> to vector<4x256xf32>
    %c0_2 = arith.constant 0 : index
    %c0_3 = arith.constant 0 : index
    %2 = vector.load %arg7[%c0_2, %c0_3] : memref<256x324xf32, #tpu.memory_space<vmem>>, vector<256x324xf32>
    %cst = arith.constant dense<0.000000e+00> : vector<4x324xf32>
    %3 = tpu.matmul %1, %2, %cst {dimension_numbers = #tpu.dot_dimension_numbers<[1], [0], [0], [1], [0, 0, 1, 1], [], []>} : vector<4x256xf32>, vector<256x324xf32>, vector<4x324xf32> -> vector<4x324xf32>
    %cst_4 = arith.constant 0.000000e+00 : f32
    %4 = vector.broadcast %cst_4 : f32 to vector<4x286xf32>
    %c0_5 = arith.constant 0 : index
    %c0_6 = arith.constant 0 : index
    %c0_7 = arith.constant 0 : index
    %5 = vector.load %arg2[%c0_5, %c0_6, %c0_7] : memref<9x4x4xf32, #tpu.memory_space<vmem>>, vector<1x4x4xf32>
    %6 = vector.shape_cast %5 : vector<1x4x4xf32> to vector<4x4xf32>
    %7 = vector.extract_strided_slice %3 {offsets = [0, 0], sizes = [4, 286], strides = [1, 1]} : vector<4x324xf32> to vector<4x286xf32>
    %cst_8 = arith.constant dense<0.000000e+00> : vector<4x286xf32>
    %8 = tpu.matmul %6, %7, %cst_8 {dimension_numbers = #tpu.dot_dimension_numbers<[1], [0], [0], [1], [0, 0, 1, 1], [], []>} : vector<4x4xf32>, vector<4x286xf32>, vector<4x286xf32> -> vector<4x286xf32>
    %9 = arith.addf %4, %8 : vector<4x286xf32>
    %c1 = arith.constant 1 : index
    %c0_9 = arith.constant 0 : index
    %c0_10 = arith.constant 0 : index
    %10 = vector.load %arg2[%c1, %c0_9, %c0_10] : memref<9x4x4xf32, #tpu.memory_space<vmem>>, vector<1x4x4xf32>
    %11 = vector.shape_cast %10 : vector<1x4x4xf32> to vector<4x4xf32>
    %12 = vector.extract_strided_slice %3 {offsets = [0, 1], sizes = [4, 286], strides = [1, 1]} : vector<4x324xf32> to vector<4x286xf32>
    %cst_11 = arith.constant dense<0.000000e+00> : vector<4x286xf32>
    %13 = tpu.matmul %11, %12, %cst_11 {dimension_numbers = #tpu.dot_dimension_numbers<[1], [0], [0], [1], [0, 0, 1, 1], [], []>} : vector<4x4xf32>, vector<4x286xf32>, vector<4x286xf32> -> vector<4x286xf32>
    %14 = arith.addf %9, %13 : vector<4x286xf32>
    %c2 = arith.constant 2 : index
    %c0_12 = arith.constant 0 : index
    %c0_13 = arith.constant 0 : index
    %15 = vector.load %arg2[%c2, %c0_12, %c0_13] : memref<9x4x4xf32, #tpu.memory_space<vmem>>, vector<1x4x4xf32>
    %16 = vector.shape_cast %15 : vector<1x4x4xf32> to vector<4x4xf32>
    %17 = vector.extract_strided_slice %3 {offsets = [0, 2], sizes = [4, 286], strides = [1, 1]} : vector<4x324xf32> to vector<4x286xf32>
    %cst_14 = arith.constant dense<0.000000e+00> : vector<4x286xf32>
    %18 = tpu.matmul %16, %17, %cst_14 {dimension_numbers = #tpu.dot_dimension_numbers<[1], [0], [0], [1], [0, 0, 1, 1], [], []>} : vector<4x4xf32>, vector<4x286xf32>, vector<4x286xf32> -> vector<4x286xf32>
    %19 = arith.addf %14, %18 : vector<4x286xf32>
    %c3 = arith.constant 3 : index
    %c0_15 = arith.constant 0 : index
    %c0_16 = arith.constant 0 : index
    %20 = vector.load %arg2[%c3, %c0_15, %c0_16] : memref<9x4x4xf32, #tpu.memory_space<vmem>>, vector<1x4x4xf32>
    %21 = vector.shape_cast %20 : vector<1x4x4xf32> to vector<4x4xf32>
    %22 = vector.extract_strided_slice %3 {offsets = [0, 18], sizes = [4, 286], strides = [1, 1]} : vector<4x324xf32> to vector<4x286xf32>
    %cst_17 = arith.constant dense<0.000000e+00> : vector<4x286xf32>
    %23 = tpu.matmul %21, %22, %cst_17 {dimension_numbers = #tpu.dot_dimension_numbers<[1], [0], [0], [1], [0, 0, 1, 1], [], []>} : vector<4x4xf32>, vector<4x286xf32>, vector<4x286xf32> -> vector<4x286xf32>
    %24 = arith.addf %19, %23 : vector<4x286xf32>
    %c4 = arith.constant 4 : index
    %c0_18 = arith.constant 0 : index
    %c0_19 = arith.constant 0 : index
    %25 = vector.load %arg2[%c4, %c0_18, %c0_19] : memref<9x4x4xf32, #tpu.memory_space<vmem>>, vector<1x4x4xf32>
    %26 = vector.shape_cast %25 : vector<1x4x4xf32> to vector<4x4xf32>
    %27 = vector.extract_strided_slice %3 {offsets = [0, 19], sizes = [4, 286], strides = [1, 1]} : vector<4x324xf32> to vector<4x286xf32>
    %cst_20 = arith.constant dense<0.000000e+00> : vector<4x286xf32>
    %28 = tpu.matmul %26, %27, %cst_20 {dimension_numbers = #tpu.dot_dimension_numbers<[1], [0], [0], [1], [0, 0, 1, 1], [], []>} : vector<4x4xf32>, vector<4x286xf32>, vector<4x286xf32> -> vector<4x286xf32>
    %29 = arith.addf %24, %28 : vector<4x286xf32>
    %c5 = arith.constant 5 : index
    %c0_21 = arith.constant 0 : index
    %c0_22 = arith.constant 0 : index
    %30 = vector.load %arg2[%c5, %c0_21, %c0_22] : memref<9x4x4xf32, #tpu.memory_space<vmem>>, vector<1x4x4xf32>
    %31 = vector.shape_cast %30 : vector<1x4x4xf32> to vector<4x4xf32>
    %32 = vector.extract_strided_slice %3 {offsets = [0, 20], sizes = [4, 286], strides = [1, 1]} : vector<4x324xf32> to vector<4x286xf32>
    %cst_23 = arith.constant dense<0.000000e+00> : vector<4x286xf32>
    %33 = tpu.matmul %31, %32, %cst_23 {dimension_numbers = #tpu.dot_dimension_numbers<[1], [0], [0], [1], [0, 0, 1, 1], [], []>} : vector<4x4xf32>, vector<4x286xf32>, vector<4x286xf32> -> vector<4x286xf32>
    %34 = arith.addf %29, %33 : vector<4x286xf32>
    %c6 = arith.constant 6 : index
    %c0_24 = arith.constant 0 : index
    %c0_25 = arith.constant 0 : index
    %35 = vector.load %arg2[%c6, %c0_24, %c0_25] : memref<9x4x4xf32, #tpu.memory_space<vmem>>, vector<1x4x4xf32>
    %36 = vector.shape_cast %35 : vector<1x4x4xf32> to vector<4x4xf32>
    %37 = vector.extract_strided_slice %3 {offsets = [0, 36], sizes = [4, 286], strides = [1, 1]} : vector<4x324xf32> to vector<4x286xf32>
    %cst_26 = arith.constant dense<0.000000e+00> : vector<4x286xf32>
    %38 = tpu.matmul %36, %37, %cst_26 {dimension_numbers = #tpu.dot_dimension_numbers<[1], [0], [0], [1], [0, 0, 1, 1], [], []>} : vector<4x4xf32>, vector<4x286xf32>, vector<4x286xf32> -> vector<4x286xf32>
    %39 = arith.addf %34, %38 : vector<4x286xf32>
    %c7 = arith.constant 7 : index
    %c0_27 = arith.constant 0 : index
    %c0_28 = arith.constant 0 : index
    %40 = vector.load %arg2[%c7, %c0_27, %c0_28] : memref<9x4x4xf32, #tpu.memory_space<vmem>>, vector<1x4x4xf32>
    %41 = vector.shape_cast %40 : vector<1x4x4xf32> to vector<4x4xf32>
    %42 = vector.extract_strided_slice %3 {offsets = [0, 37], sizes = [4, 286], strides = [1, 1]} : vector<4x324xf32> to vector<4x286xf32>
    %cst_29 = arith.constant dense<0.000000e+00> : vector<4x286xf32>
    %43 = tpu.matmul %41, %42, %cst_29 {dimension_numbers = #tpu.dot_dimension_numbers<[1], [0], [0], [1], [0, 0, 1, 1], [], []>} : vector<4x4xf32>, vector<4x286xf32>, vector<4x286xf32> -> vector<4x286xf32>
    %44 = arith.addf %39, %43 : vector<4x286xf32>
    %c8 = arith.constant 8 : index
    %c0_30 = arith.constant 0 : index
    %c0_31 = arith.constant 0 : index
    %45 = vector.load %arg2[%c8, %c0_30, %c0_31] : memref<9x4x4xf32, #tpu.memory_space<vmem>>, vector<1x4x4xf32>
    %46 = vector.shape_cast %45 : vector<1x4x4xf32> to vector<4x4xf32>
    %47 = vector.extract_strided_slice %3 {offsets = [0, 38], sizes = [4, 286], strides = [1, 1]} : vector<4x324xf32> to vector<4x286xf32>
    %cst_32 = arith.constant dense<0.000000e+00> : vector<4x286xf32>
    %48 = tpu.matmul %46, %47, %cst_32 {dimension_numbers = #tpu.dot_dimension_numbers<[1], [0], [0], [1], [0, 0, 1, 1], [], []>} : vector<4x4xf32>, vector<4x286xf32>, vector<4x286xf32> -> vector<4x286xf32>
    %49 = arith.addf %44, %48 : vector<4x286xf32>
    %c0_33 = arith.constant 0 : index
    %c0_34 = arith.constant 0 : index
    %50 = vector.load %arg3[%c0_33, %c0_34] : memref<4x1xf32, #tpu.memory_space<vmem>>, vector<4x1xf32>
    %51 = vector.broadcast %50 : vector<4x1xf32> to vector<4x286xf32>
    %52 = arith.addf %49, %51 : vector<4x286xf32>
    %cst_35 = arith.constant 0.000000e+00 : f32
    %53 = vector.broadcast %cst_35 : f32 to vector<4x286xf32>
    %54 = arith.cmpf oge, %52, %53 : vector<4x286xf32>
    %cst_36 = arith.constant 2.000000e-01 : f32
    %55 = vector.broadcast %cst_36 : f32 to vector<4x286xf32>
    %56 = arith.mulf %55, %52 : vector<4x286xf32>
    %57 = arith.select %54, %52, %56 : vector<4x286xi1>, vector<4x286xf32>
    %cst_37 = arith.constant 1.41421354 : f32
    %58 = vector.broadcast %cst_37 : f32 to vector<4x286xf32>
    %59 = arith.mulf %57, %58 : vector<4x286xf32>
    %c0_38 = arith.constant 0 : index
    %c0_39 = arith.constant 0 : index
    %60 = vector.load %arg8[%c0_38, %c0_39] : memref<286x400xf32, #tpu.memory_space<vmem>>, vector<286x400xf32>
    %cst_40 = arith.constant dense<0.000000e+00> : vector<4x400xf32>
    %61 = tpu.matmul %59, %60, %cst_40 {dimension_numbers = #tpu.dot_dimension_numbers<[1], [0], [0], [1], [0, 0, 1, 1], [], []>} : vector<4x286xf32>, vector<286x400xf32>, vector<4x400xf32> -> vector<4x400xf32>
    %cst_41 = arith.constant 0.000000e+00 : f32
    %62 = vector.broadcast %cst_41 : f32 to vector<4x337xf32>
    %63 = vector.extract_strided_slice %61 {offsets = [0, 0], sizes = [4, 337], strides = [1, 1]} : vector<4x400xf32> to vector<4x337xf32>
    %cst_42 = arith.constant 1.562500e-02 : f32
    %64 = vector.broadcast %cst_42 : f32 to vector<4x337xf32>
    %65 = arith.mulf %64, %63 : vector<4x337xf32>
    %66 = arith.addf %62, %65 : vector<4x337xf32>
    %67 = vector.extract_strided_slice %61 {offsets = [0, 1], sizes = [4, 337], strides = [1, 1]} : vector<4x400xf32> to vector<4x337xf32>
    %cst_43 = arith.constant 4.687500e-02 : f32
    %68 = vector.broadcast %cst_43 : f32 to vector<4x337xf32>
    %69 = arith.mulf %68, %67 : vector<4x337xf32>
    %70 = arith.addf %66, %69 : vector<4x337xf32>
    %71 = vector.extract_strided_slice %61 {offsets = [0, 2], sizes = [4, 337], strides = [1, 1]} : vector<4x400xf32> to vector<4x337xf32>
    %cst_44 = arith.constant 4.687500e-02 : f32
    %72 = vector.broadcast %cst_44 : f32 to vector<4x337xf32>
    %73 = arith.mulf %72, %71 : vector<4x337xf32>
    %74 = arith.addf %70, %73 : vector<4x337xf32>
    %75 = vector.extract_strided_slice %61 {offsets = [0, 3], sizes = [4, 337], strides = [1, 1]} : vector<4x400xf32> to vector<4x337xf32>
    %cst_45 = arith.constant 1.562500e-02 : f32
    %76 = vector.broadcast %cst_45 : f32 to vector<4x337xf32>
    %77 = arith.mulf %76, %75 : vector<4x337xf32>
    %78 = arith.addf %74, %77 : vector<4x337xf32>
    %79 = vector.extract_strided_slice %61 {offsets = [0, 20], sizes = [4, 337], strides = [1, 1]} : vector<4x400xf32> to vector<4x337xf32>
    %cst_46 = arith.constant 4.687500e-02 : f32
    %80 = vector.broadcast %cst_46 : f32 to vector<4x337xf32>
    %81 = arith.mulf %80, %79 : vector<4x337xf32>
    %82 = arith.addf %78, %81 : vector<4x337xf32>
    %83 = vector.extract_strided_slice %61 {offsets = [0, 21], sizes = [4, 337], strides = [1, 1]} : vector<4x400xf32> to vector<4x337xf32>
    %cst_47 = arith.constant 1.406250e-01 : f32
    %84 = vector.broadcast %cst_47 : f32 to vector<4x337xf32>
    %85 = arith.mulf %84, %83 : vector<4x337xf32>
    %86 = arith.addf %82, %85 : vector<4x337xf32>
    %87 = vector.extract_strided_slice %61 {offsets = [0, 22], sizes = [4, 337], strides = [1, 1]} : vector<4x400xf32> to vector<4x337xf32>
    %cst_48 = arith.constant 1.406250e-01 : f32
    %88 = vector.broadcast %cst_48 : f32 to vector<4x337xf32>
    %89 = arith.mulf %88, %87 : vector<4x337xf32>
    %90 = arith.addf %86, %89 : vector<4x337xf32>
    %91 = vector.extract_strided_slice %61 {offsets = [0, 23], sizes = [4, 337], strides = [1, 1]} : vector<4x400xf32> to vector<4x337xf32>
    %cst_49 = arith.constant 4.687500e-02 : f32
    %92 = vector.broadcast %cst_49 : f32 to vector<4x337xf32>
    %93 = arith.mulf %92, %91 : vector<4x337xf32>
    %94 = arith.addf %90, %93 : vector<4x337xf32>
    %95 = vector.extract_strided_slice %61 {offsets = [0, 40], sizes = [4, 337], strides = [1, 1]} : vector<4x400xf32> to vector<4x337xf32>
    %cst_50 = arith.constant 4.687500e-02 : f32
    %96 = vector.broadcast %cst_50 : f32 to vector<4x337xf32>
    %97 = arith.mulf %96, %95 : vector<4x337xf32>
    %98 = arith.addf %94, %97 : vector<4x337xf32>
    %99 = vector.extract_strided_slice %61 {offsets = [0, 41], sizes = [4, 337], strides = [1, 1]} : vector<4x400xf32> to vector<4x337xf32>
    %cst_51 = arith.constant 1.406250e-01 : f32
    %100 = vector.broadcast %cst_51 : f32 to vector<4x337xf32>
    %101 = arith.mulf %100, %99 : vector<4x337xf32>
    %102 = arith.addf %98, %101 : vector<4x337xf32>
    %103 = vector.extract_strided_slice %61 {offsets = [0, 42], sizes = [4, 337], strides = [1, 1]} : vector<4x400xf32> to vector<4x337xf32>
    %cst_52 = arith.constant 1.406250e-01 : f32
    %104 = vector.broadcast %cst_52 : f32 to vector<4x337xf32>
    %105 = arith.mulf %104, %103 : vector<4x337xf32>
    %106 = arith.addf %102, %105 : vector<4x337xf32>
    %107 = vector.extract_strided_slice %61 {offsets = [0, 43], sizes = [4, 337], strides = [1, 1]} : vector<4x400xf32> to vector<4x337xf32>
    %cst_53 = arith.constant 4.687500e-02 : f32
    %108 = vector.broadcast %cst_53 : f32 to vector<4x337xf32>
    %109 = arith.mulf %108, %107 : vector<4x337xf32>
    %110 = arith.addf %106, %109 : vector<4x337xf32>
    %111 = vector.extract_strided_slice %61 {offsets = [0, 60], sizes = [4, 337], strides = [1, 1]} : vector<4x400xf32> to vector<4x337xf32>
    %cst_54 = arith.constant 1.562500e-02 : f32
    %112 = vector.broadcast %cst_54 : f32 to vector<4x337xf32>
    %113 = arith.mulf %112, %111 : vector<4x337xf32>
    %114 = arith.addf %110, %113 : vector<4x337xf32>
    %115 = vector.extract_strided_slice %61 {offsets = [0, 61], sizes = [4, 337], strides = [1, 1]} : vector<4x400xf32> to vector<4x337xf32>
    %cst_55 = arith.constant 4.687500e-02 : f32
    %116 = vector.broadcast %cst_55 : f32 to vector<4x337xf32>
    %117 = arith.mulf %116, %115 : vector<4x337xf32>
    %118 = arith.addf %114, %117 : vector<4x337xf32>
    %119 = vector.extract_strided_slice %61 {offsets = [0, 62], sizes = [4, 337], strides = [1, 1]} : vector<4x400xf32> to vector<4x337xf32>
    %cst_56 = arith.constant 4.687500e-02 : f32
    %120 = vector.broadcast %cst_56 : f32 to vector<4x337xf32>
    %121 = arith.mulf %120, %119 : vector<4x337xf32>
    %122 = arith.addf %118, %121 : vector<4x337xf32>
    %123 = vector.extract_strided_slice %61 {offsets = [0, 63], sizes = [4, 337], strides = [1, 1]} : vector<4x400xf32> to vector<4x337xf32>
    %cst_57 = arith.constant 1.562500e-02 : f32
    %124 = vector.broadcast %cst_57 : f32 to vector<4x337xf32>
    %125 = arith.mulf %124, %123 : vector<4x337xf32>
    %126 = arith.addf %122, %125 : vector<4x337xf32>
    %cst_58 = arith.constant 0.000000e+00 : f32
    %127 = vector.broadcast %cst_58 : f32 to vector<8x295xf32>
    %c0_59 = arith.constant 0 : index
    %c0_60 = arith.constant 0 : index
    %c0_61 = arith.constant 0 : index
    %128 = vector.load %arg4[%c0_59, %c0_60, %c0_61] : memref<9x8x4xf32, #tpu.memory_space<vmem>>, vector<1x8x4xf32>
    %129 = vector.shape_cast %128 : vector<1x8x4xf32> to vector<8x4xf32>
    %130 = vector.extract_strided_slice %126 {offsets = [0, 0], sizes = [4, 295], strides = [1, 1]} : vector<4x337xf32> to vector<4x295xf32>
    %cst_62 = arith.constant dense<0.000000e+00> : vector<8x295xf32>
    %131 = tpu.matmul %129, %130, %cst_62 {dimension_numbers = #tpu.dot_dimension_numbers<[1], [0], [0], [1], [0, 0, 1, 1], [], []>} : vector<8x4xf32>, vector<4x295xf32>, vector<8x295xf32> -> vector<8x295xf32>
    %132 = arith.addf %127, %131 : vector<8x295xf32>
    %c1_63 = arith.constant 1 : index
    %c0_64 = arith.constant 0 : index
    %c0_65 = arith.constant 0 : index
    %133 = vector.load %arg4[%c1_63, %c0_64, %c0_65] : memref<9x8x4xf32, #tpu.memory_space<vmem>>, vector<1x8x4xf32>
    %134 = vector.shape_cast %133 : vector<1x8x4xf32> to vector<8x4xf32>
    %135 = vector.extract_strided_slice %126 {offsets = [0, 1], sizes = [4, 295], strides = [1, 1]} : vector<4x337xf32> to vector<4x295xf32>
    %cst_66 = arith.constant dense<0.000000e+00> : vector<8x295xf32>
    %136 = tpu.matmul %134, %135, %cst_66 {dimension_numbers = #tpu.dot_dimension_numbers<[1], [0], [0], [1], [0, 0, 1, 1], [], []>} : vector<8x4xf32>, vector<4x295xf32>, vector<8x295xf32> -> vector<8x295xf32>
    %137 = arith.addf %132, %136 : vector<8x295xf32>
    %c2_67 = arith.constant 2 : index
    %c0_68 = arith.constant 0 : index
    %c0_69 = arith.constant 0 : index
    %138 = vector.load %arg4[%c2_67, %c0_68, %c0_69] : memref<9x8x4xf32, #tpu.memory_space<vmem>>, vector<1x8x4xf32>
    %139 = vector.shape_cast %138 : vector<1x8x4xf32> to vector<8x4xf32>
    %140 = vector.extract_strided_slice %126 {offsets = [0, 2], sizes = [4, 295], strides = [1, 1]} : vector<4x337xf32> to vector<4x295xf32>
    %cst_70 = arith.constant dense<0.000000e+00> : vector<8x295xf32>
    %141 = tpu.matmul %139, %140, %cst_70 {dimension_numbers = #tpu.dot_dimension_numbers<[1], [0], [0], [1], [0, 0, 1, 1], [], []>} : vector<8x4xf32>, vector<4x295xf32>, vector<8x295xf32> -> vector<8x295xf32>
    %142 = arith.addf %137, %141 : vector<8x295xf32>
    %c3_71 = arith.constant 3 : index
    %c0_72 = arith.constant 0 : index
    %c0_73 = arith.constant 0 : index
    %143 = vector.load %arg4[%c3_71, %c0_72, %c0_73] : memref<9x8x4xf32, #tpu.memory_space<vmem>>, vector<1x8x4xf32>
    %144 = vector.shape_cast %143 : vector<1x8x4xf32> to vector<8x4xf32>
    %145 = vector.extract_strided_slice %126 {offsets = [0, 20], sizes = [4, 295], strides = [1, 1]} : vector<4x337xf32> to vector<4x295xf32>
    %cst_74 = arith.constant dense<0.000000e+00> : vector<8x295xf32>
    %146 = tpu.matmul %144, %145, %cst_74 {dimension_numbers = #tpu.dot_dimension_numbers<[1], [0], [0], [1], [0, 0, 1, 1], [], []>} : vector<8x4xf32>, vector<4x295xf32>, vector<8x295xf32> -> vector<8x295xf32>
    %147 = arith.addf %142, %146 : vector<8x295xf32>
    %c4_75 = arith.constant 4 : index
    %c0_76 = arith.constant 0 : index
    %c0_77 = arith.constant 0 : index
    %148 = vector.load %arg4[%c4_75, %c0_76, %c0_77] : memref<9x8x4xf32, #tpu.memory_space<vmem>>, vector<1x8x4xf32>
    %149 = vector.shape_cast %148 : vector<1x8x4xf32> to vector<8x4xf32>
    %150 = vector.extract_strided_slice %126 {offsets = [0, 21], sizes = [4, 295], strides = [1, 1]} : vector<4x337xf32> to vector<4x295xf32>
    %cst_78 = arith.constant dense<0.000000e+00> : vector<8x295xf32>
    %151 = tpu.matmul %149, %150, %cst_78 {dimension_numbers = #tpu.dot_dimension_numbers<[1], [0], [0], [1], [0, 0, 1, 1], [], []>} : vector<8x4xf32>, vector<4x295xf32>, vector<8x295xf32> -> vector<8x295xf32>
    %152 = arith.addf %147, %151 : vector<8x295xf32>
    %c5_79 = arith.constant 5 : index
    %c0_80 = arith.constant 0 : index
    %c0_81 = arith.constant 0 : index
    %153 = vector.load %arg4[%c5_79, %c0_80, %c0_81] : memref<9x8x4xf32, #tpu.memory_space<vmem>>, vector<1x8x4xf32>
    %154 = vector.shape_cast %153 : vector<1x8x4xf32> to vector<8x4xf32>
    %155 = vector.extract_strided_slice %126 {offsets = [0, 22], sizes = [4, 295], strides = [1, 1]} : vector<4x337xf32> to vector<4x295xf32>
    %cst_82 = arith.constant dense<0.000000e+00> : vector<8x295xf32>
    %156 = tpu.matmul %154, %155, %cst_82 {dimension_numbers = #tpu.dot_dimension_numbers<[1], [0], [0], [1], [0, 0, 1, 1], [], []>} : vector<8x4xf32>, vector<4x295xf32>, vector<8x295xf32> -> vector<8x295xf32>
    %157 = arith.addf %152, %156 : vector<8x295xf32>
    %c6_83 = arith.constant 6 : index
    %c0_84 = arith.constant 0 : index
    %c0_85 = arith.constant 0 : index
    %158 = vector.load %arg4[%c6_83, %c0_84, %c0_85] : memref<9x8x4xf32, #tpu.memory_space<vmem>>, vector<1x8x4xf32>
    %159 = vector.shape_cast %158 : vector<1x8x4xf32> to vector<8x4xf32>
    %160 = vector.extract_strided_slice %126 {offsets = [0, 40], sizes = [4, 295], strides = [1, 1]} : vector<4x337xf32> to vector<4x295xf32>
    %cst_86 = arith.constant dense<0.000000e+00> : vector<8x295xf32>
    %161 = tpu.matmul %159, %160, %cst_86 {dimension_numbers = #tpu.dot_dimension_numbers<[1], [0], [0], [1], [0, 0, 1, 1], [], []>} : vector<8x4xf32>, vector<4x295xf32>, vector<8x295xf32> -> vector<8x295xf32>
    %162 = arith.addf %157, %161 : vector<8x295xf32>
    %c7_87 = arith.constant 7 : index
    %c0_88 = arith.constant 0 : index
    %c0_89 = arith.constant 0 : index
    %163 = vector.load %arg4[%c7_87, %c0_88, %c0_89] : memref<9x8x4xf32, #tpu.memory_space<vmem>>, vector<1x8x4xf32>
    %164 = vector.shape_cast %163 : vector<1x8x4xf32> to vector<8x4xf32>
    %165 = vector.extract_strided_slice %126 {offsets = [0, 41], sizes = [4, 295], strides = [1, 1]} : vector<4x337xf32> to vector<4x295xf32>
    %cst_90 = arith.constant dense<0.000000e+00> : vector<8x295xf32>
    %166 = tpu.matmul %164, %165, %cst_90 {dimension_numbers = #tpu.dot_dimension_numbers<[1], [0], [0], [1], [0, 0, 1, 1], [], []>} : vector<8x4xf32>, vector<4x295xf32>, vector<8x295xf32> -> vector<8x295xf32>
    %167 = arith.addf %162, %166 : vector<8x295xf32>
    %c8_91 = arith.constant 8 : index
    %c0_92 = arith.constant 0 : index
    %c0_93 = arith.constant 0 : index
    %168 = vector.load %arg4[%c8_91, %c0_92, %c0_93] : memref<9x8x4xf32, #tpu.memory_space<vmem>>, vector<1x8x4xf32>
    %169 = vector.shape_cast %168 : vector<1x8x4xf32> to vector<8x4xf32>
    %170 = vector.extract_strided_slice %126 {offsets = [0, 42], sizes = [4, 295], strides = [1, 1]} : vector<4x337xf32> to vector<4x295xf32>
    %cst_94 = arith.constant dense<0.000000e+00> : vector<8x295xf32>
    %171 = tpu.matmul %169, %170, %cst_94 {dimension_numbers = #tpu.dot_dimension_numbers<[1], [0], [0], [1], [0, 0, 1, 1], [], []>} : vector<8x4xf32>, vector<4x295xf32>, vector<8x295xf32> -> vector<8x295xf32>
    %172 = arith.addf %167, %171 : vector<8x295xf32>
    %c0_95 = arith.constant 0 : index
    %c0_96 = arith.constant 0 : index
    %173 = vector.load %arg9[%c0_95, %c0_96] : memref<295x64xf32, #tpu.memory_space<vmem>>, vector<295x64xf32>
    %cst_97 = arith.constant dense<0.000000e+00> : vector<8x64xf32>
    %174 = tpu.matmul %172, %173, %cst_97 {dimension_numbers = #tpu.dot_dimension_numbers<[1], [0], [0], [1], [0, 0, 1, 1], [], []>} : vector<8x295xf32>, vector<295x64xf32>, vector<8x64xf32> -> vector<8x64xf32>
    %c0_98 = arith.constant 0 : index
    %c0_99 = arith.constant 0 : index
    %175 = vector.load %arg5[%c0_98, %c0_99] : memref<8x1xf32, #tpu.memory_space<vmem>>, vector<8x1xf32>
    %176 = vector.broadcast %175 : vector<8x1xf32> to vector<8x64xf32>
    %177 = arith.addf %174, %176 : vector<8x64xf32>
    %cst_100 = arith.constant 0.000000e+00 : f32
    %178 = vector.broadcast %cst_100 : f32 to vector<8x64xf32>
    %179 = arith.cmpf oge, %177, %178 : vector<8x64xf32>
    %cst_101 = arith.constant 2.000000e-01 : f32
    %180 = vector.broadcast %cst_101 : f32 to vector<8x64xf32>
    %181 = arith.mulf %180, %177 : vector<8x64xf32>
    %182 = arith.select %179, %177, %181 : vector<8x64xi1>, vector<8x64xf32>
    %cst_102 = arith.constant 1.41421354 : f32
    %183 = vector.broadcast %cst_102 : f32 to vector<8x64xf32>
    %184 = arith.mulf %182, %183 : vector<8x64xf32>
    %cst_103 = arith.constant 0.000000e+00 : f32
    %185 = vector.broadcast %cst_103 : f32 to vector<4x267xf32>
    %186 = vector.extract_strided_slice %3 {offsets = [0, 0], sizes = [4, 267], strides = [1, 1]} : vector<4x324xf32> to vector<4x267xf32>
    %cst_104 = arith.constant 1.562500e-02 : f32
    %187 = vector.broadcast %cst_104 : f32 to vector<4x267xf32>
    %188 = arith.mulf %187, %186 : vector<4x267xf32>
    %189 = arith.addf %185, %188 : vector<4x267xf32>
    %190 = vector.extract_strided_slice %3 {offsets = [0, 1], sizes = [4, 267], strides = [1, 1]} : vector<4x324xf32> to vector<4x267xf32>
    %cst_105 = arith.constant 4.687500e-02 : f32
    %191 = vector.broadcast %cst_105 : f32 to vector<4x267xf32>
    %192 = arith.mulf %191, %190 : vector<4x267xf32>
    %193 = arith.addf %189, %192 : vector<4x267xf32>
    %194 = vector.extract_strided_slice %3 {offsets = [0, 2], sizes = [4, 267], strides = [1, 1]} : vector<4x324xf32> to vector<4x267xf32>
    %cst_106 = arith.constant 4.687500e-02 : f32
    %195 = vector.broadcast %cst_106 : f32 to vector<4x267xf32>
    %196 = arith.mulf %195, %194 : vector<4x267xf32>
    %197 = arith.addf %193, %196 : vector<4x267xf32>
    %198 = vector.extract_strided_slice %3 {offsets = [0, 3], sizes = [4, 267], strides = [1, 1]} : vector<4x324xf32> to vector<4x267xf32>
    %cst_107 = arith.constant 1.562500e-02 : f32
    %199 = vector.broadcast %cst_107 : f32 to vector<4x267xf32>
    %200 = arith.mulf %199, %198 : vector<4x267xf32>
    %201 = arith.addf %197, %200 : vector<4x267xf32>
    %202 = vector.extract_strided_slice %3 {offsets = [0, 18], sizes = [4, 267], strides = [1, 1]} : vector<4x324xf32> to vector<4x267xf32>
    %cst_108 = arith.constant 4.687500e-02 : f32
    %203 = vector.broadcast %cst_108 : f32 to vector<4x267xf32>
    %204 = arith.mulf %203, %202 : vector<4x267xf32>
    %205 = arith.addf %201, %204 : vector<4x267xf32>
    %206 = vector.extract_strided_slice %3 {offsets = [0, 19], sizes = [4, 267], strides = [1, 1]} : vector<4x324xf32> to vector<4x267xf32>
    %cst_109 = arith.constant 1.406250e-01 : f32
    %207 = vector.broadcast %cst_109 : f32 to vector<4x267xf32>
    %208 = arith.mulf %207, %206 : vector<4x267xf32>
    %209 = arith.addf %205, %208 : vector<4x267xf32>
    %210 = vector.extract_strided_slice %3 {offsets = [0, 20], sizes = [4, 267], strides = [1, 1]} : vector<4x324xf32> to vector<4x267xf32>
    %cst_110 = arith.constant 1.406250e-01 : f32
    %211 = vector.broadcast %cst_110 : f32 to vector<4x267xf32>
    %212 = arith.mulf %211, %210 : vector<4x267xf32>
    %213 = arith.addf %209, %212 : vector<4x267xf32>
    %214 = vector.extract_strided_slice %3 {offsets = [0, 21], sizes = [4, 267], strides = [1, 1]} : vector<4x324xf32> to vector<4x267xf32>
    %cst_111 = arith.constant 4.687500e-02 : f32
    %215 = vector.broadcast %cst_111 : f32 to vector<4x267xf32>
    %216 = arith.mulf %215, %214 : vector<4x267xf32>
    %217 = arith.addf %213, %216 : vector<4x267xf32>
    %218 = vector.extract_strided_slice %3 {offsets = [0, 36], sizes = [4, 267], strides = [1, 1]} : vector<4x324xf32> to vector<4x267xf32>
    %cst_112 = arith.constant 4.687500e-02 : f32
    %219 = vector.broadcast %cst_112 : f32 to vector<4x267xf32>
    %220 = arith.mulf %219, %218 : vector<4x267xf32>
    %221 = arith.addf %217, %220 : vector<4x267xf32>
    %222 = vector.extract_strided_slice %3 {offsets = [0, 37], sizes = [4, 267], strides = [1, 1]} : vector<4x324xf32> to vector<4x267xf32>
    %cst_113 = arith.constant 1.406250e-01 : f32
    %223 = vector.broadcast %cst_113 : f32 to vector<4x267xf32>
    %224 = arith.mulf %223, %222 : vector<4x267xf32>
    %225 = arith.addf %221, %224 : vector<4x267xf32>
    %226 = vector.extract_strided_slice %3 {offsets = [0, 38], sizes = [4, 267], strides = [1, 1]} : vector<4x324xf32> to vector<4x267xf32>
    %cst_114 = arith.constant 1.406250e-01 : f32
    %227 = vector.broadcast %cst_114 : f32 to vector<4x267xf32>
    %228 = arith.mulf %227, %226 : vector<4x267xf32>
    %229 = arith.addf %225, %228 : vector<4x267xf32>
    %230 = vector.extract_strided_slice %3 {offsets = [0, 39], sizes = [4, 267], strides = [1, 1]} : vector<4x324xf32> to vector<4x267xf32>
    %cst_115 = arith.constant 4.687500e-02 : f32
    %231 = vector.broadcast %cst_115 : f32 to vector<4x267xf32>
    %232 = arith.mulf %231, %230 : vector<4x267xf32>
    %233 = arith.addf %229, %232 : vector<4x267xf32>
    %234 = vector.extract_strided_slice %3 {offsets = [0, 54], sizes = [4, 267], strides = [1, 1]} : vector<4x324xf32> to vector<4x267xf32>
    %cst_116 = arith.constant 1.562500e-02 : f32
    %235 = vector.broadcast %cst_116 : f32 to vector<4x267xf32>
    %236 = arith.mulf %235, %234 : vector<4x267xf32>
    %237 = arith.addf %233, %236 : vector<4x267xf32>
    %238 = vector.extract_strided_slice %3 {offsets = [0, 55], sizes = [4, 267], strides = [1, 1]} : vector<4x324xf32> to vector<4x267xf32>
    %cst_117 = arith.constant 4.687500e-02 : f32
    %239 = vector.broadcast %cst_117 : f32 to vector<4x267xf32>
    %240 = arith.mulf %239, %238 : vector<4x267xf32>
    %241 = arith.addf %237, %240 : vector<4x267xf32>
    %242 = vector.extract_strided_slice %3 {offsets = [0, 56], sizes = [4, 267], strides = [1, 1]} : vector<4x324xf32> to vector<4x267xf32>
    %cst_118 = arith.constant 4.687500e-02 : f32
    %243 = vector.broadcast %cst_118 : f32 to vector<4x267xf32>
    %244 = arith.mulf %243, %242 : vector<4x267xf32>
    %245 = arith.addf %241, %244 : vector<4x267xf32>
    %246 = vector.extract_strided_slice %3 {offsets = [0, 57], sizes = [4, 267], strides = [1, 1]} : vector<4x324xf32> to vector<4x267xf32>
    %cst_119 = arith.constant 1.562500e-02 : f32
    %247 = vector.broadcast %cst_119 : f32 to vector<4x267xf32>
    %248 = arith.mulf %247, %246 : vector<4x267xf32>
    %249 = arith.addf %245, %248 : vector<4x267xf32>
    %c0_120 = arith.constant 0 : index
    %c0_121 = arith.constant 0 : index
    %250 = vector.load %arg10[%c0_120, %c0_121] : memref<267x64xf32, #tpu.memory_space<vmem>>, vector<267x64xf32>
    %cst_122 = arith.constant dense<0.000000e+00> : vector<4x64xf32>
    %251 = tpu.matmul %249, %250, %cst_122 {dimension_numbers = #tpu.dot_dimension_numbers<[1], [0], [0], [1], [0, 0, 1, 1], [], []>} : vector<4x267xf32>, vector<267x64xf32>, vector<4x64xf32> -> vector<4x64xf32>
    %c0_123 = arith.constant 0 : index
    %c0_124 = arith.constant 0 : index
    %252 = vector.load %arg6[%c0_123, %c0_124] : memref<8x4xf32, #tpu.memory_space<vmem>>, vector<8x4xf32>
    %cst_125 = arith.constant dense<0.000000e+00> : vector<8x64xf32>
    %253 = tpu.matmul %252, %251, %cst_125 {dimension_numbers = #tpu.dot_dimension_numbers<[1], [0], [0], [1], [0, 0, 1, 1], [], []>} : vector<8x4xf32>, vector<4x64xf32>, vector<8x64xf32> -> vector<8x64xf32>
    %254 = arith.addf %184, %253 : vector<8x64xf32>
    %cst_126 = arith.constant 0.707106769 : f32
    %255 = vector.broadcast %cst_126 : f32 to vector<8x64xf32>
    %256 = arith.mulf %254, %255 : vector<8x64xf32>
    %c0_127 = arith.constant 0 : index
    %c0_128 = arith.constant 0 : index
    %c0_129 = arith.constant 0 : index
    %257 = vector.load %arg11[%c0_127, %c0_128, %c0_129] : memref<1x8x64xf32, #tpu.memory_space<vmem>>, vector<1x8x64xf32>
    %258 = vector.shape_cast %257 : vector<1x8x64xf32> to vector<8x64xf32>
    %259 = vector.shape_cast %256 : vector<8x64xf32> to vector<1x8x64xf32>
    tpu.vector_store %arg11[%c0_127, %c0_128, %c0_129], %259 {strides = array<i32>} : memref<1x8x64xf32, #tpu.memory_space<vmem>>, vector<1x8x64xf32>,
    return
  }
  func.func @transform_0(%arg0: i32) -> (i32, i32, i32) {
    %c0_i32 = arith.constant 0 : i32
    %c0_i32_0 = arith.constant 0 : i32
    %c0_i32_1 = arith.constant 0 : i32
    return %arg0, %c0_i32, %c0_i32_0 : i32, i32, i32
  }
  func.func @transform_1(%arg0: i32) -> (i32, i32, i32) {
    %c0_i32 = arith.constant 0 : i32
    %c0_i32_0 = arith.constant 0 : i32
    %c0_i32_1 = arith.constant 0 : i32
    %c0_i32_2 = arith.constant 0 : i32
    return %c0_i32, %c0_i32_0, %c0_i32_1 : i32, i32, i32
  }
  func.func @transform_2(%arg0: i32) -> (i32, i32) {
    %c0_i32 = arith.constant 0 : i32
    %c0_i32_0 = arith.constant 0 : i32
    %c0_i32_1 = arith.constant 0 : i32
    return %c0_i32, %c0_i32_0 : i32, i32
  }
  func.func @transform_3(%arg0: i32) -> (i32, i32, i32) {
    %c0_i32 = arith.constant 0 : i32
    %c0_i32_0 = arith.constant 0 : i32
    %c0_i32_1 = arith.constant 0 : i32
    %c0_i32_2 = arith.constant 0 : i32
    return %c0_i32, %c0_i32_0, %c0_i32_1 : i32, i32, i32
  }
  func.func @transform_4(%arg0: i32) -> (i32, i32) {
    %c0_i32 = arith.constant 0 : i32
    %c0_i32_0 = arith.constant 0 : i32
    %c0_i32_1 = arith.constant 0 : i32
    return %c0_i32, %c0_i32_0 : i32, i32
  }
  func.func @transform_5(%arg0: i32) -> (i32, i32) {
    %c0_i32 = arith.constant 0 : i32
    %c0_i32_0 = arith.constant 0 : i32
    %c0_i32_1 = arith.constant 0 : i32
    return %c0_i32, %c0_i32_0 : i32, i32
  }
  func.func @transform_6(%arg0: i32) -> (i32, i32) {
    %c0_i32 = arith.constant 0 : i32
    %c0_i32_0 = arith.constant 0 : i32
    %c0_i32_1 = arith.constant 0 : i32
    return %c0_i32, %c0_i32_0 : i32, i32
  }
  func.func @transform_7(%arg0: i32) -> (i32, i32) {
    %c0_i32 = arith.constant 0 : i32
    %c0_i32_0 = arith.constant 0 : i32
    %c0_i32_1 = arith.constant 0 : i32
    return %c0_i32, %c0_i32_0 : i32, i32
  }
  func.func @transform_8(%arg0: i32) -> (i32, i32) {
    %c0_i32 = arith.constant 0 : i32
    %c0_i32_0 = arith.constant 0 : i32
    %c0_i32_1 = arith.constant 0 : i32
    return %c0_i32, %c0_i32_0 : i32, i32
  }
  func.func @transform_9(%arg0: i32) -> (i32, i32) {
    %c0_i32 = arith.constant 0 : i32
    %c0_i32_0 = arith.constant 0 : i32
    %c0_i32_1 = arith.constant 0 : i32
    return %c0_i32, %c0_i32_0 : i32, i32
  }
  func.func @transform_10(%arg0: i32) -> (i32, i32, i32) {
    %c0_i32 = arith.constant 0 : i32
    %c0_i32_0 = arith.constant 0 : i32
    %c0_i32_1 = arith.constant 0 : i32
    return %arg0, %c0_i32, %c0_i32_0 : i32, i32, i32
  }
}

</mosaic_0001>

<bundles_post_ra>
// kernel: tpu_custom_call.1
= control target key start
LH: loop header
LB: loop body
LE: loop exit
PB: predicated region body
PF: predicated region fallthrough
CT: control target
= control target key end

     0   :  { %15 = vsyncpa [#allocation3], 0  ;;  %s7576_s0 = inlined_call_operand.vmem [shape: f32[2,4,256], index: 0, kind: input, shape index: {}]   ;;  %s7577_s1 = inlined_call_operand.vmem [shape: f32[9,4,4], index: 1, kind: input, shape index: {}]   ;;  %s7578_s2 = inlined_call_operand.vmem [shape: f32[4,1], index: 2, kind: input, shape index: {}]   ;;  %s7579_s3 = inlined_call_operand.vmem [shape: f32[9,8,4], index: 3, kind: input, shape index: {}]   ;;  %s7580_s4 = inlined_call_operand.vmem [shape: f32[8,1], index: 4, kind: input, shape index: {}]   ;;  %s7581_s5 = inlined_call_operand.vmem [shape: f32[8,4], index: 5, kind: input, shape index: {}]   ;;  %s7582_s6 = inlined_call_operand.vmem [shape: f32[256,324], index: 6, kind: input, shape index: {}]   ;;  %s7583_s7 = inlined_call_operand.vmem [shape: f32[286,400], index: 7, kind: input, shape index: {}]   ;;  %s7584_s8 = inlined_call_operand.vmem [shape: f32[295,64], index: 8, kind: input, shape index: {}]   ;;  %s7585_s9 = inlined_call_operand.vmem [shape: f32[267,64], index: 9, kind: input, shape index: {}]   ;;  %s7586_s10 = inlined_call_operand.hbm [shape: f32[2,8,64], index: 10, kind: output, shape index: {}]  }
   0x1   :  { %17 = vsyncpa [#allocation3 + $0x1], 0  ;;  %s5623_s13 = smov 0   ;;  %s5625_s14 = smov 0  }
   0x2   :  { %s5627_s15 = smov 0   ;;  %s5629_s16 = smov 0  }
   0x3 LB: > { %s5644_s17 = sadd.s32 4294967295, %s5537_s16   ;;  %s5011_s18 = sadd.s32 4294967294, %s5537_s16   ;;  %s5537_s16 = sphi %s5629_s16, %s7636_s16   ;;  %s5533_s15 = sphi %s5627_s15, %s7635_s15   ;;  %s5529_s14 = sphi %s5625_s14, %s7634_s14   ;;  %s5525_s13 = sphi %s5623_s13, %s7633_s13  }
   0x4   : > { %s5648_s19 = sadd.s32 1, %s5537_s16   ;;  %s245_s20 = sadd.s32 1, %s5533_s15 }
   0x5   : > { %s242_s21 = ssub.s32 %s5537_s16, %s5648_s19  ;;  %p255_p0 = scmp.ne.s32.totalorder %s5533_s15, %s5529_s14 }
   0x6   : > { %p243_p1 = scmp.eq.s32.totalorder %s242_s21, 0  ;;  %p256_p2 = scmp.eq.s32.totalorder %s5644_s17, 1 }
   0x7   : > { %p261_p3 = scmp.ne.s32.totalorder %s5529_s14, %s5525_s13  ;;  %p262_p4 = scmp.eq.s32.totalorder %s5011_s18, 1 }
   0x8   : > { %s5659_s22 = scalar_select %p243_p1, %s5533_s15, %s245_s20  }
   0x9   : > { %p5661_p5 = por %p256_p2, %p255_p0  ;;  %p5665_p6 = por %p262_p4, %p261_p3 }
   0xa   : > { %7609 = sst [smem:[#allocation5_spill]] %s5659_s22  ;;  %p5014_p7 = scmp.ge.s32.totalorder %s5537_s16, 1 }
   0xb   : > { %p315_p8 = scmp.lt.s32.totalorder %s5537_s16, 3 }
   0xd   : > { %p316_p9 = pnand %p5014_p7, %p315_p8 }
   0xe   : > { %p353_p10 = scmp.lt.s32.totalorder (!%p316_p9), %s5644_s17, 1  ;;  %s5540_s22 = smov (!%p316_p9), 127  }
   0xf   : > { %319 = sbr.rel (%p316_p9) target bundleno = 1857 (0x741), region = 60  ;;  %s5541_s12 = smov (!%p316_p9), 126  }
  0x10   : > { %s7595_s20 = smov (!%p316_p9), 110   ;;  %s7593_s21 = smov (!%p316_p9), 109  }
  0x11   : > { %s7591_s25 = smov (!%p316_p9), 92   ;;  %s7587_s26 = smov (!%p316_p9), 90  }
  0x12   : > { %s7589_s28 = smov (!%p316_p9), 91   ;;  %s7599_s29 = smov (!%p316_p9), 125  }
  0x13   : > { %s5558_s30 = smov (!%p316_p9), 86  }
  0x14   : > { %v405_v0 = vld [vmem:[%s7582_s6 + $0x170] sm:$0xff]  ;;  %v404_v1 = vld [vmem:[%s7582_s6 + $0x168] sm:$0xff]  ;;  %v402_v2 = vld [vmem:[%s7582_s6 + $0x158] sm:$0xff]  ;;  %s5816_s11 = scalar_select %p353_p10, %s5644_s17, 1  ;;  %vm611_vm0 = vcmask 1039360   ;;  %vm618_vm1 = vcmask 1043456  }
  0x15   : > { %458 = vmatprep.subr.mxu0 %v405_v0  ;;  %v401_v3 = vld [vmem:[%s7582_s6 + $0x150] sm:$0xff]  ;;  %v399_v4 = vld [vmem:[%s7582_s6 + $0x140] sm:$0xff]  ;;  %v398_v5 = vld [vmem:[%s7582_s6 + $0x138] sm:$0xff]  ;;  %vm614_vm2 = vcmask 31744   ;;  %vm5549_vm3 = vmmov 0   ;;  %vm924_vm4 = vcmask 1031168  }
  0x16   : > { %459 = vmatpush1.msra.mxu0 %v404_v1  ;;  %v396_v6 = vld [vmem:[%s7582_s6 + $0x128] sm:$0xff]  ;;  %v395_v7 = vld [vmem:[%s7582_s6 + $0x120] sm:$0xff]  ;;  %v393_v8 = vld [vmem:[%s7582_s6 + $0x110] sm:$0xff]  ;;  %s5140_s27 = sshll.u32 %s5816_s11, 3  ;;  %s7597_s11 = smov 108   ;;  %vm7607_vm5 = vcmask 900096  }
  0x17   : > { %460 = vmatprep.subr.mxu0 %v402_v2  ;;  %v392_v9 = vld [vmem:[%s7582_s6 + $0x108] sm:$0xff]  ;;  %v390_v10 = vld [vmem:[%s7582_s6 + $0xf8] sm:$0xff]  ;;  %v389_v11 = vld [vmem:[%s7582_s6 + $0xf0] sm:$0xff]  ;;  %s357_s18 = scalar_lea.vmem %s7576_s0, %s5140_s27  ;;  %vm7606_vm6 = vcmask 891904   ;;  %vm1416_vm7 = vcmask 883712   ;;  %vm7605_vm8 = vcmask 752640  }
  0x18   : > { %461 = vmatpush1.msra.mxu0 %v401_v3  ;;  %v387_v12 = vld [vmem:[%s7582_s6 + $0xe0] sm:$0xff]  ;;  %v386_v13 = vld [vmem:[%s7582_s6 + $0xd8] sm:$0xff]  ;;  %v384_v16 = vld [vmem:[%s7582_s6 + $0xc8] sm:$0xff]  ;;  %vm7604_vm9 = vcmask 744448   ;;  %vm7603_vm10 = vcmask 736256   ;;  %vm2233_vm11 = vcmask 1045504  }
  0x19   : > { %462 = vmatprep.subr.mxu0 %v399_v4  ;;  %v454_v14 = vld [vmem:[%s7582_s6 + $0x2f8] sm:$0xff]  ;;  %v451_v17 = vld [vmem:[%s7582_s6 + $0x2e0] sm:$0xff]  ;;  %v448_v20 = vld [vmem:[%s7582_s6 + $0x2c8] sm:$0xff]  ;;  %vm2229_vm15 = vcmask 244736   ;;  %s7612_s27 = smov 108  }
  0x1a   : > { %463 = vmatpush1.msra.mxu0 %v398_v5  ;;  %v406_v15 = vld [vmem:[%s7582_s6 + $0x178] sm:$0xff]  ;;  %5141 = vmatprep.subr.mxu1 %v454_v14  ;;  %v383_v18 = vld [vmem:[%s7582_s6 + $0xc0] sm:$0xff]  ;;  %v381_v21 = vld [vmem:[%s7582_s6 + $0xb0] sm:$0xff] }
  0x1b   : > { %464 = vmatprep.subr.mxu0 %v396_v6  ;;  %5142 = vmatpush3.msra.mxu1 %v406_v15  ;;  %v403_v19 = vld [vmem:[%s7582_s6 + $0x160] sm:$0xff]  ;;  %v400_v22 = vld [vmem:[%s7582_s6 + $0x148] sm:$0xff]  ;;  %v445_v24 = vld [vmem:[%s7582_s6 + $0x2b0] sm:$0xff] }
  0x1c   : > { %465 = vmatpush1.msra.mxu0 %v395_v7  ;;  %5143 = vmatprep.subr.mxu1 %v451_v17  ;;  %v380_v23 = vld [vmem:[%s7582_s6 + $0xa8] sm:$0xff]  ;;  %v378_v25 = vld [vmem:[%s7582_s6 + $0x98] sm:$0xff]  ;;  %v397_v26 = vld [vmem:[%s7582_s6 + $0x130] sm:$0xff] }
  0x1d   : > { %466 = vmatprep.subr.mxu0 %v393_v8  ;;  %5144 = vmatpush3.msra.mxu1 %v403_v19  ;;  %v377_v27 = vld [vmem:[%s7582_s6 + $0x90] sm:$0xff]  ;;  %v442_v28 = vld [vmem:[%s7582_s6 + $0x298] sm:$0xff]  ;;  %v375_v29 = vld [vmem:[%s7582_s6 + $0x80] sm:$0xff] }
  0x1e   : > { %467 = vmatpush1.msra.mxu0 %v392_v9  ;;  %5145 = vmatprep.subr.mxu1 %v448_v20  ;;  %v394_v30 = vld [vmem:[%s7582_s6 + $0x118] sm:$0xff]  ;;  %v439_v32 = vld [vmem:[%s7582_s6 + $0x280] sm:$0xff]  ;;  %v372_v33 = vld [vmem:[%s7582_s6 + $0x68] sm:$0xff] }
  0x1f   : > { %468 = vmatprep.subr.mxu0 %v390_v10  ;;  %5146 = vmatpush3.msra.mxu1 %v400_v22  ;;  %v374_v31 = vld [vmem:[%s7582_s6 + $0x78] sm:$0xff]  ;;  %v391_v34 = vld [vmem:[%s7582_s6 + $0x100] sm:$0xff]  ;;  %v436_v36 = vld [vmem:[%s7582_s6 + $0x268] sm:$0xff] }
  0x20   : > { %469 = vmatpush1.msra.mxu0 %v389_v11  ;;  %5147 = vmatprep.subr.mxu1 %v445_v24  ;;  %v371_v35 = vld [vmem:[%s7582_s6 + $0x60] sm:$0xff]  ;;  %v369_v37 = vld [vmem:[%s7582_s6 + $0x50] sm:$0xff]  ;;  %v388_v38 = vld [vmem:[%s7582_s6 + $0xe8] sm:$0xff] }
  0x21   : > { %470 = vmatprep.subr.mxu0 %v387_v12  ;;  %5148 = vmatpush3.msra.mxu1 %v397_v26  ;;  %v368_v39 = vld [vmem:[%s7582_s6 + $0x48] sm:$0xff]  ;;  %v433_v40 = vld [vmem:[%s7582_s6 + $0x250] sm:$0xff]  ;;  %v366_v41 = vld [vmem:[%s7582_s6 + $0x38] sm:$0xff] }
  0x22   : > { %471 = vmatpush1.msra.mxu0 %v386_v13  ;;  %5149 = vmatprep.subr.mxu1 %v442_v28  ;;  %v385_v42 = vld [vmem:[%s7582_s6 + $0xd0] sm:$0xff]  ;;  %v430_v44 = vld [vmem:[%s7582_s6 + $0x238] sm:$0xff]  ;;  %v363_v45 = vld [vmem:[%s7582_s6 + $0x20] sm:$0xff] }
  0x23   : > { %472 = vmatprep.subr.mxu0 %v384_v16  ;;  %5150 = vmatpush3.msra.mxu1 %v394_v30  ;;  %v365_v43 = vld [vmem:[%s7582_s6 + $0x30] sm:$0xff]  ;;  %v382_v46 = vld [vmem:[%s7582_s6 + $0xb8] sm:$0xff]  ;;  %v427_v48 = vld [vmem:[%s7582_s6 + $0x220] sm:$0xff] }
  0x24   : > { %473 = vmatpush1.msra.mxu0 %v383_v18  ;;  %5151 = vmatprep.subr.mxu1 %v439_v32  ;;  %v362_v47 = vld [vmem:[%s7582_s6 + $0x18] sm:$0xff]  ;;  %v360_v49 = vld [vmem:[%s7582_s6 + $0x8] sm:$0xff]  ;;  %v379_v50 = vld [vmem:[%s7582_s6 + $0xa0] sm:$0xff] }
  0x25   : > { %474 = vmatprep.subr.mxu0 %v381_v21  ;;  %5152 = vmatpush3.msra.mxu1 %v391_v34  ;;  %v359_v51 = vld [vmem:[%s7582_s6] sm:$0xff]  ;;  %v424_v52 = vld [vmem:[%s7582_s6 + $0x208] sm:$0xff]  ;;  %v453_v53 = vld [vmem:[%s7582_s6 + $0x2f0] sm:$0xff]  ;;  %v5539_v34 = vmov 0.0  }
  0x26   : > { %475 = vmatpush1.msra.mxu0 %v380_v23  ;;  %5153 = vmatprep.subr.mxu1 %v436_v36  ;;  %v376_v54 = vld [vmem:[%s7582_s6 + $0x88] sm:$0xff]  ;;  %v421_v56 = vld [vmem:[%s7582_s6 + $0x1f0] sm:$0xff]  ;;  %v450_v57 = vld [vmem:[%s7582_s6 + $0x2d8] sm:$0xff] }
  0x27   : > { %476 = vmatprep.subr.mxu0 %v378_v25  ;;  %5154 = vmatpush3.msra.mxu1 %v388_v38  ;;  %v452_v55 = vld [vmem:[%s7582_s6 + $0x2e8] sm:$0xff]  ;;  %v373_v58 = vld [vmem:[%s7582_s6 + $0x70] sm:$0xff]  ;;  %v418_v60 = vld [vmem:[%s7582_s6 + $0x1d8] sm:$0xff] }
  0x28   : > { %477 = vmatpush1.msra.mxu0 %v377_v27  ;;  %5155 = vmatprep.subr.mxu1 %v433_v40  ;;  %v449_v59 = vld [vmem:[%s7582_s6 + $0x2d0] sm:$0xff]  ;;  %v447_v61 = vld [vmem:[%s7582_s6 + $0x2c0] sm:$0xff]  ;;  %v370_v62 = vld [vmem:[%s7582_s6 + $0x58] sm:$0xff]  ;;  %v5548_v40 = vmov 0  }
  0x29   : > { %478 = vmatprep.subr.mxu0 %v375_v29  ;;  %5156 = vmatpush3.msra.mxu1 %v385_v42  ;;  %v446_v63 = vld [vmem:[%s7582_s6 + $0x2b8] sm:$0xff]  ;;  %v415_v0 = vld [vmem:[%s7582_s6 + $0x1c0] sm:$0xff]  ;;  %v444_v1 = vld [vmem:[%s7582_s6 + $0x2a8] sm:$0xff] }
  0x2a   : > { %479 = vmatpush1.msra.mxu0 %v374_v31  ;;  %5157 = vmatprep.subr.mxu1 %v430_v44  ;;  %v367_v2 = vld [vmem:[%s7582_s6 + $0x40] sm:$0xff]  ;;  %v412_v5 = vld [vmem:[%s7582_s6 + $0x1a8] sm:$0xff]  ;;  %v441_v6 = vld [vmem:[%s7582_s6 + $0x290] sm:$0xff] }
  0x2b   : > { %480 = vmatprep.subr.mxu0 %v372_v33  ;;  %5158 = vmatpush3.msra.mxu1 %v382_v46  ;;  %v5882_v3 = vld [vmem:[%s357_s18] sm:$0xff]  ;;  %v364_v7 = vld [vmem:[%s7582_s6 + $0x28] sm:$0xff]  ;;  %v409_v9 = vld [vmem:[%s7582_s6 + $0x190] sm:$0xff]  ;;  %s5557_s18 = smov 66  }
  0x2c   : > { %481 = vmatpush1.msra.mxu0 %v371_v35  ;;  %5159 = vmatprep.subr.mxu1 %v427_v48  ;;  %v443_v4 = vld [vmem:[%s7582_s6 + $0x2a0] sm:$0xff]  ;;  %v440_v8 = vld [vmem:[%s7582_s6 + $0x288] sm:$0xff]  ;;  %v456_v10 = vcombine.high %v5882_v3, %v5882_v3  ;;  %v438_v11 = vld [vmem:[%s7582_s6 + $0x278] sm:$0xff] }
  0x2d   : > { %482 = vmatprep.subr.mxu0 %v369_v37  ;;  %5160 = vmatpush3.msra.mxu1 %v379_v50  ;;  %v437_v12 = vld [vmem:[%s7582_s6 + $0x270] sm:$0xff]  ;;  %v435_v14 = vld [vmem:[%s7582_s6 + $0x260] sm:$0xff]  ;;  %v434_v15 = vld [vmem:[%s7582_s6 + $0x258] sm:$0xff] }
  0x2e   : > { %483 = vmatpush1.msra.mxu0 %v368_v39  ;;  %5161 = vmatprep.subr.mxu1 %v424_v52  ;;  %v361_v13 = vld [vmem:[%s7582_s6 + $0x10] sm:$0xff]  ;;  %v432_v16 = vld [vmem:[%s7582_s6 + $0x248] sm:$0xff]  ;;  %v431_v17 = vld [vmem:[%s7582_s6 + $0x240] sm:$0xff] }
  0x2f   : > { %484 = vmatprep.subr.mxu0 %v366_v41  ;;  %5162 = vmatpush3.msra.mxu1 %v376_v54  ;;  %v429_v18 = vld [vmem:[%s7582_s6 + $0x230] sm:$0xff]  ;;  %v428_v19 = vld [vmem:[%s7582_s6 + $0x228] sm:$0xff]  ;;  %v426_v20 = vld [vmem:[%s7582_s6 + $0x218] sm:$0xff] }
  0x30   : > { %485 = vmatpush1.msra.mxu0 %v365_v43  ;;  %5163 = vmatprep.subr.mxu1 %v421_v56  ;;  %v425_v21 = vld [vmem:[%s7582_s6 + $0x210] sm:$0xff]  ;;  %v423_v22 = vld [vmem:[%s7582_s6 + $0x200] sm:$0xff]  ;;  %v422_v23 = vld [vmem:[%s7582_s6 + $0x1f8] sm:$0xff] }
  0x31   : > { %486 = vmatprep.subr.mxu0 %v363_v45  ;;  %5164 = vmatpush3.msra.mxu1 %v373_v58  ;;  %v420_v24 = vld [vmem:[%s7582_s6 + $0x1e8] sm:$0xff]  ;;  %v419_v25 = vld [vmem:[%s7582_s6 + $0x1e0] sm:$0xff]  ;;  %v417_v26 = vld [vmem:[%s7582_s6 + $0x1d0] sm:$0xff] }
  0x32   : > { %487 = vmatpush1.msra.mxu0 %v362_v47  ;;  %5165 = vmatprep.subr.mxu1 %v418_v60  ;;  %v416_v27 = vld [vmem:[%s7582_s6 + $0x1c8] sm:$0xff]  ;;  %v414_v28 = vld [vmem:[%s7582_s6 + $0x1b8] sm:$0xff]  ;;  %v413_v29 = vld [vmem:[%s7582_s6 + $0x1b0] sm:$0xff] }
  0x33   : > { %488 = vmatprep.subr.mxu0 %v360_v49  ;;  %5166 = vmatpush3.msra.mxu1 %v370_v62  ;;  %v411_v30 = vld [vmem:[%s7582_s6 + $0x1a0] sm:$0xff]  ;;  %v410_v31 = vld [vmem:[%s7582_s6 + $0x198] sm:$0xff]  ;;  %v408_v32 = vld [vmem:[%s7582_s6 + $0x188] sm:$0xff] }
  0x34   : > { %489 = vmatpush1.msra.mxu0 %v359_v51  ;;  %5167 = vmatprep.subr.mxu1 %v415_v0  ;;  %v407_v33 = vld [vmem:[%s7582_s6 + $0x180] sm:$0xff]  ;;  %v5029_v60 = vld [vmem:[%s7577_s1 + $0x8] sm:$0xf] }
  0x35   : > { %490 = vmatprep.subr.mxu0 %v453_v53  ;;  %5168 = vmatpush3.msra.mxu1 %v367_v2  ;;  %v2064_v41 = vld [vmem:[%s7578_s2] sm:$0xf]  ;;  %v5018_v47 = vld [vmem:[%s7577_s1 + $0x4] sm:$0xf] }
  0x36   : > { %491 = vmatpush2.msra.mxu0 %v452_v55  ;;  %5169 = vmatprep.subr.mxu1 %v412_v5  ;;  %v599_v53 = vld [vmem:[%s7577_s1] sm:$0xf]  ;;  %v5035_v5 = vld [vmem:[%s7577_s1 + $0xc] sm:$0xf] }
  0x37   : > { %492 = vmatprep.subr.mxu0 %v450_v57  ;;  %5170 = vmatpush3.msra.mxu1 %v364_v7 }
  0x38   : > { %493 = vmatpush2.msra.mxu0 %v449_v59  ;;  %5171 = vmatprep.subr.mxu1 %v409_v9 }
  0x39   : > { %494 = vmatprep.subr.mxu0 %v447_v61  ;;  %522 = vmatprep.mubr.f32.mxu0 %v456_v10 }
  0x3a   : > { %495 = vmatpush2.msra.mxu0 %v446_v63  ;;  %5172 = vmatpush3.msra.mxu1 %v361_v13 }
  0x3b   : > { %496 = vmatprep.subr.mxu0 %v444_v1  ;;  %593 = vmatprep.mubr.f32.mxu1 %v456_v10 }
  0x3c   : > { %497 = vmatpush2.msra.mxu0 %v443_v4  ;;  %594 = vmatmul.mubr.f32.vlgmr.msra.gmra.mxu1 %v5882_v3 }
  0x3d   : > { %498 = vmatprep.subr.mxu0 %v441_v6  ;;  %689 = vmatprep.mubr.f32.mxu1 %v5539_v34  ;;  %v5041_v6 = vld [vmem:[%s7577_s1 + $0x10] sm:$0xf] }
  0x3e   : > { %499 = vmatpush2.msra.mxu0 %v440_v8  ;;  %5475 = vset.pattern.permute.xlu0 %v5548_v40  ;;  %v2129_v40 = vld [vmem:[%s7583_s7 + $0x160] sm:$0xff] }
  0x3f   : > { %500 = vmatprep.subr.mxu0 %v438_v11  ;;  %v5047_v11 = vld [vmem:[%s7577_s1 + $0x14] sm:$0xf] }
  0x40   : > { %501 = vmatpush2.msra.mxu0 %v437_v12 }
  0x41   : > { %502 = vmatprep.subr.mxu0 %v435_v14 }
  0x42   : > { %503 = vmatpush2.msra.mxu0 %v434_v15 }
  0x43   : > { %504 = vmatprep.subr.mxu0 %v432_v16  ;;  %v5053_v16 = vld [vmem:[%s7577_s1 + $0x18] sm:$0xf] }
  0x44   : > { %505 = vmatpush2.msra.mxu0 %v431_v17 }
  0x45   : > { %506 = vmatprep.subr.mxu0 %v429_v18 }
  0x46   : > { %507 = vmatpush2.msra.mxu0 %v428_v19 }
  0x47   : > { %508 = vmatprep.subr.mxu0 %v426_v20 }
  0x48   : > { %509 = vmatpush2.msra.mxu0 %v425_v21  ;;  %v5059_v21 = vld [vmem:[%s7577_s1 + $0x1c] sm:$0xf] }
  0x49   : > { %510 = vmatprep.subr.mxu0 %v423_v22 }
  0x4a   : > { %511 = vmatpush2.msra.mxu0 %v422_v23 }
  0x4b   : > { %512 = vmatprep.subr.mxu0 %v420_v24 }
  0x4c   : > { %513 = vmatpush2.msra.mxu0 %v419_v25 }
  0x4d   : > { %514 = vmatprep.subr.mxu0 %v417_v26  ;;  %v5065_v26 = vld [vmem:[%s7577_s1 + $0x20] sm:$0xf] }
  0x4e   : > { %515 = vmatpush2.msra.mxu0 %v416_v27  ;;  %v2146_v27 = vld [vmem:[%s7583_s7 + $0x1e8] sm:$0xff] }
  0x4f   : > { %516 = vmatprep.subr.mxu0 %v414_v28  ;;  %v2145_v28 = vld [vmem:[%s7583_s7 + $0x1e0] sm:$0xff] }
  0x50   : > { %517 = vmatpush2.msra.mxu0 %v413_v29  ;;  %v2142_v29 = vld [vmem:[%s7583_s7 + $0x1c8] sm:$0xff] }
  0x51   : > { %518 = vmatprep.subr.mxu0 %v411_v30  ;;  %v2141_v30 = vld [vmem:[%s7583_s7 + $0x1c0] sm:$0xff] }
  0x52   : > { %519 = vmatpush2.msra.mxu0 %v410_v31  ;;  %v2138_v31 = vld [vmem:[%s7583_s7 + $0x1a8] sm:$0xff] }
  0x53   : > { %520 = vmatprep.subr.mxu0 %v408_v32  ;;  %v2137_v32 = vld [vmem:[%s7583_s7 + $0x1a0] sm:$0xff] }
  0x54   : > { %521 = vmatpush2.msra.mxu0 %v407_v33  ;;  %v2134_v33 = vld [vmem:[%s7583_s7 + $0x188] sm:$0xff] }
  0x55   : > { %523 = vmatmul.mubr.f32.vlgmr.msra.gmra.mxu0 %v5882_v3 }
  0x56   : > { %1328 = vmatprep.mubr.f32.mxu0 %v5539_v34 }
  0xfc   : > { %v5173_v35 = vpop.f32.mrf.mxu1 }
  0xfe   : > { %v5174_v38 = vpop.f32.mrf.mxu1 }
  0xff   : > { %v5985_v39 = vadd.f32 %v5174_v38, %v5173_v35  ;;  %v2133_v35 = vld [vmem:[%s7583_s7 + $0x180] sm:$0xff]  ;;  %v2130_v38 = vld [vmem:[%s7583_s7 + $0x168] sm:$0xff] }
 0x115   : > { %v5977_v36 = vpop.f32.mrf.mxu0 }
 0x116   : > { %605 = vrot.lane.b32.xlu1 %v5977_v36, %s5540_s22 }
 0x117   : > { %v5981_v37 = vpop.f32.mrf.mxu0 }
 0x118   : > { %607 = vrot.lane.b32.xlu0 %v5981_v37, %s5540_s22 }
 0x11a   : > { %920 = vrot.lane.b32.xlu1 %v5981_v37, %s5541_s12 }
 0x11c   : > { %609 = vrot.lane.b32.xlu0 %v5985_v39, %s5540_s22 }
 0x11e   : > { %918 = vrot.lane.b32.xlu1 %v5977_v36, %s5541_s12 }
 0x120   : > { %922 = vrot.lane.b32.xlu0 %v5985_v39, %s5541_s12 }
 0x122   : > { %1086 = vrot.lane.b32.xlu1 %v5985_v39, %s7595_s20 }
 0x124   : > { %1084 = vrot.lane.b32.xlu0 %v5981_v37, %s7595_s20 }
 0x126   : > { %1250 = vrot.lane.b32.xlu1 %v5985_v39, %s7593_s21 }
 0x128   : > { %1082 = vrot.lane.b32.xlu0 %v5977_v36, %s7595_s20  ;;  %s5551_s20 = smov 107  }
 0x12a   : > { %1578 = vrot.lane.b32.xlu1 %v5985_v39, %s7591_s25 }
 0x12c   : > { %1414 = vrot.lane.b32.xlu0 %v5985_v39, %s7597_s11 }
 0x12e   : > { %1906 = vrot.lane.b32.xlu1 %v5985_v39, %s7587_s26 }
 0x130   : > { %1742 = vrot.lane.b32.xlu0 %v5985_v39, %s7589_s28 }
 0x132   : > { %1246 = vrot.lane.b32.xlu1 %v5977_v36, %s7593_s21 }
 0x134   : > { %1248 = vrot.lane.b32.xlu0 %v5981_v37, %s7593_s21  ;;  %s7601_s21 = smov 106  }
 0x136   : > { %1410 = vrot.lane.b32.xlu1 %v5977_v36, %s7597_s11 }
 0x138   : > { %1412 = vrot.lane.b32.xlu0 %v5981_v37, %s7597_s11  ;;  %s5553_s11 = smov 105  }
 0x13a   : > { %1574 = vrot.lane.b32.xlu1 %v5977_v36, %s7591_s25 }
 0x13c   : > { %1576 = vrot.lane.b32.xlu0 %v5981_v37, %s7591_s25  ;;  %s5554_s25 = smov 88  }
 0x13e   : > { %1738 = vrot.lane.b32.xlu1 %v5977_v36, %s7589_s28 }
 0x140   : > { %1740 = vrot.lane.b32.xlu0 %v5981_v37, %s7589_s28  ;;  %s5556_s28 = smov 85  }
 0x142   : > { %1902 = vrot.lane.b32.xlu1 %v5977_v36, %s7587_s26 }
 0x144   : > { %1904 = vrot.lane.b32.xlu0 %v5981_v37, %s7587_s26  ;;  %s5555_s26 = smov 87  }
 0x148   : > { %2067 = vperm.xlu0 %5475, %v2064_v41   ;;  %v2126_v41 = vld [vmem:[%s7583_s7 + $0x148] sm:$0xff] }
 0x188   : > { %v606_v42 = vpop.permute.xlu1 %605 }
 0x18a   : > { %v608_v43 = vpop.permute.xlu0 %607 }
 0x18b   : > { %v612_v48 = vsel %vm611_vm0, %v606_v42, %v608_v43  ;;  %v2125_v42 = vld [vmem:[%s7583_s7 + $0x140] sm:$0xff] }
 0x18c   : > { %v921_v44 = vpop.permute.xlu1 %920 }
 0x18e   : > { %v610_v45 = vpop.permute.xlu0 %609 }
 0x18f   : > { %v613_v46 = vsel %vm611_vm0, %v608_v43, %v610_v45  ;;  %v2122_v43 = vld [vmem:[%s7583_s7 + $0x128] sm:$0xff] }
 0x190   : > { %v919_v49 = vpop.permute.xlu1 %918  ;;  %5019 = vmatprep.subr.msk.mxu1 %vm618_vm1, %v613_v46  ;;  %v2117_v46 = vld [vmem:[%s7583_s7 + $0x100] sm:$0xff] }
 0x191   : > { %5020 = vmatpush1.msk.msra.mxu1 %vm618_vm1, %v612_v48  ;;  %v925_v58 = vsel %vm924_vm4, %v919_v49, %v921_v44  ;;  %v2113_v48 = vld [vmem:[%s7583_s7 + $0xe0] sm:$0xff]  ;;  %v2110_v49 = vld [vmem:[%s7583_s7 + $0xc8] sm:$0xff] }
 0x192   : > { %5021 = vmatmul.mubr.msk.f32.vlgmr.msra.gmra.mxu1 %vm614_vm2, %v5018_v47  ;;  %5293 = vmatprep.subr.mxu1 %v5539_v34  ;;  %v923_v50 = vpop.permute.xlu0 %922 }
 0x193   : > { %5294 = vmatpush3.msk.msra.mxu1 %vm618_vm1, %v610_v45  ;;  %5295 = vmatprep.mubr.msk.f32.mxu1 %vm5549_vm3, %v5539_v34  ;;  %v926_v56 = vsel %vm924_vm4, %v921_v44, %v923_v50  ;;  %v2121_v44 = vld [vmem:[%s7583_s7 + $0x120] sm:$0xff]  ;;  %v2118_v45 = vld [vmem:[%s7583_s7 + $0x108] sm:$0xff] }
 0x194   : > { %v1087_v51 = vpop.permute.xlu1 %1086  ;;  %5024 = vmatprep.subr.msk.mxu1 %vm618_vm1, %v5981_v37 }
 0x196   : > { %5296 = vmatmul.mubr.msk.f32.vlgmr.msra.gmra.mxu1 %vm614_vm2, %v5018_v47  ;;  %v1085_v52 = vpop.permute.xlu0 %1084  ;;  %v2114_v47 = vld [vmem:[%s7583_s7 + $0xe8] sm:$0xff] }
 0x197   : > { %5025 = vmatpush1.msk.msra.mxu1 %vm618_vm1, %v5977_v36  ;;  %839 = vmatprep.mubr.f32.mxu1 %v5539_v34  ;;  %v1090_v63 = vsel %vm7607_vm5, %v1085_v52, %v1087_v51 }
 0x198   : > { %v1251_v54 = vpop.permute.xlu1 %1250  ;;  %5298 = vmatprep.subr.mxu1 %v5539_v34 }
 0x19a   : > { %5026 = vmatmul.mubr.msk.f32.vlgmr.msra.gmra.mxu1 %vm614_vm2, %v599_v53  ;;  %v1083_v55 = vpop.permute.xlu0 %1082 }
 0x19b   : > { %5299 = vmatpush3.msk.msra.mxu1 %vm618_vm1, %v5985_v39  ;;  %5300 = vmatprep.mubr.msk.f32.mxu1 %vm5549_vm3, %v5539_v34  ;;  %v1089_v1 = vsel %vm7607_vm5, %v1083_v55, %v1085_v52  ;;  %v2105_v52 = vld [vmem:[%s7583_s7 + $0xa0] sm:$0xff]  ;;  %v2098_v55 = vld [vmem:[%s7583_s7 + $0x68] sm:$0xff]  ;;  %vm2674_vm5 = vcmask 711680  }
 0x19c   : > { %5030 = vmatprep.subr.msk.mxu1 %vm618_vm1, %v926_v56  ;;  %v6063_v57 = vpop.permute.xlu1 %1578  ;;  %v2097_v56 = vld [vmem:[%s7583_s7 + $0x60] sm:$0xff] }
 0x19e   : > { %5301 = vmatmul.mubr.msk.f32.vlgmr.msra.gmra.mxu1 %vm614_vm2, %v599_v53  ;;  %v1415_v59 = vpop.permute.xlu0 %1414  ;;  %v2102_v53 = vld [vmem:[%s7583_s7 + $0x88] sm:$0xff] }
 0x19f   : > { %5031 = vmatpush1.msk.msra.mxu1 %vm618_vm1, %v925_v58  ;;  %1000 = vmatprep.mubr.f32.mxu1 %v5539_v34  ;;  %v2093_v58 = vld [vmem:[%s7583_s7 + $0x40] sm:$0xff] }
 0x1a0   : > { %v6072_v61 = vpop.permute.xlu1 %1906  ;;  %5303 = vmatprep.subr.mxu1 %v5539_v34 }
 0x1a2   : > { %5032 = vmatmul.mubr.msk.f32.vlgmr.msra.gmra.mxu1 %vm614_vm2, %v5029_v60  ;;  %v6076_v62 = vpop.permute.xlu0 %1742 }
 0x1a3   : > { %5304 = vmatpush3.msk.msra.mxu1 %vm618_vm1, %v923_v50  ;;  %5305 = vmatprep.mubr.msk.f32.mxu1 %vm5549_vm3, %v5539_v34  ;;  %v2109_v50 = vld [vmem:[%s7583_s7 + $0xc0] sm:$0xff] }
 0x1a4   : > { %5036 = vmatprep.subr.msk.mxu1 %vm618_vm1, %v1090_v63  ;;  %v1247_v0 = vpop.permute.xlu1 %1246  ;;  %v2210_v63 = vld [vmem:[%s7583_s7 + $0x3e8] sm:$0xff] }
 0x1a6   : > { %5306 = vmatmul.mubr.msk.f32.vlgmr.msra.gmra.mxu1 %vm614_vm2, %v5029_v60  ;;  %v1249_v2 = vpop.permute.xlu0 %1248  ;;  %v2089_v60 = vld [vmem:[%s7583_s7 + $0x20] sm:$0xff] }
 0x1a7   : > { %5037 = vmatpush1.msk.msra.mxu1 %vm618_vm1, %v1089_v1  ;;  %v1253_v3 = vsel %vm7606_vm6, %v1247_v0, %v1249_v2  ;;  %v1254_v4 = vsel %vm7606_vm6, %v1249_v2, %v1251_v54  ;;  %1164 = vmatprep.mubr.f32.mxu1 %v5539_v34  ;;  %v2209_v0 = vld [vmem:[%s7583_s7 + $0x3e0] sm:$0xff]  ;;  %v2206_v1 = vld [vmem:[%s7583_s7 + $0x3c8] sm:$0xff]  ;;  %vm2659_vm6 = vcmask 719872  }
 0x1a8   : > { %v1411_v7 = vpop.permute.xlu1 %1410  ;;  %5042 = vmatprep.subr.msk.mxu0 %vm618_vm1, %v1254_v4  ;;  %5308 = vmatprep.subr.mxu1 %v5539_v34  ;;  %v2205_v2 = vld [vmem:[%s7583_s7 + $0x3c0] sm:$0xff] }
 0x1a9   : > { %5043 = vmatpush1.msk.msra.mxu0 %vm618_vm1, %v1253_v3  ;;  %v2202_v3 = vld [vmem:[%s7583_s7 + $0x3a8] sm:$0xff]  ;;  %v2201_v4 = vld [vmem:[%s7583_s7 + $0x3a0] sm:$0xff] }
 0x1aa   : > { %5038 = vmatmul.mubr.msk.f32.vlgmr.msra.gmra.mxu1 %vm614_vm2, %v5035_v5  ;;  %5044 = vmatmul.mubr.msk.f32.vlgmr.msra.gmra.mxu0 %vm614_vm2, %v5041_v6  ;;  %v1413_v8 = vpop.permute.xlu0 %1412 }
 0x1ab   : > { %5309 = vmatpush3.msk.msra.mxu1 %vm618_vm1, %v1087_v51  ;;  %v1417_v9 = vsel %vm1416_vm7, %v1411_v7, %v1413_v8  ;;  %v1418_v10 = vsel %vm1416_vm7, %v1413_v8, %v1415_v59  ;;  %5310 = vmatprep.mubr.msk.f32.mxu1 %vm5549_vm3, %v5539_v34  ;;  %v2106_v51 = vld [vmem:[%s7583_s7 + $0xa8] sm:$0xff]  ;;  %v2193_v8 = vld [vmem:[%s7583_s7 + $0x360] sm:$0xff] }
 0x1ac   : > { %v1575_v12 = vpop.permute.xlu1 %1574  ;;  %5048 = vmatprep.subr.msk.mxu0 %vm618_vm1, %v1418_v10  ;;  %5313 = vmatprep.subr.mxu1 %v5539_v34  ;;  %v2194_v7 = vld [vmem:[%s7583_s7 + $0x368] sm:$0xff]  ;;  %v2189_v10 = vld [vmem:[%s7583_s7 + $0x340] sm:$0xff] }
 0x1ad   : > { %5049 = vmatpush1.msk.msra.mxu0 %vm618_vm1, %v1417_v9  ;;  %1492 = vmatprep.mubr.f32.mxu0 %v5539_v34  ;;  %v2190_v9 = vld [vmem:[%s7583_s7 + $0x348] sm:$0xff] }
 0x1ae   : > { %5311 = vmatmul.mubr.msk.f32.vlgmr.msra.gmra.mxu1 %vm614_vm2, %v5035_v5  ;;  %5050 = vmatmul.mubr.msk.f32.vlgmr.msra.gmra.mxu0 %vm614_vm2, %v5047_v11  ;;  %v1577_v13 = vpop.permute.xlu0 %1576  ;;  %v2198_v5 = vld [vmem:[%s7583_s7 + $0x388] sm:$0xff] }
 0x1af   : > { %5314 = vmatpush3.msk.msra.mxu1 %vm618_vm1, %v1251_v54  ;;  %v1581_v14 = vsel %vm7605_vm8, %v1575_v12, %v1577_v13  ;;  %v1582_v15 = vsel %vm7605_vm8, %v1577_v13, %v6063_v57  ;;  %5315 = vmatprep.mubr.msk.f32.mxu1 %vm5549_vm3, %v5539_v34  ;;  %v2101_v54 = vld [vmem:[%s7583_s7 + $0x80] sm:$0xff]  ;;  %v2182_v13 = vld [vmem:[%s7583_s7 + $0x308] sm:$0xff]  ;;  %vm2644_vm8 = vcmask 859136  }
 0x1b0   : > { %v1739_v17 = vpop.permute.xlu1 %1738  ;;  %5054 = vmatprep.subr.msk.mxu0 %vm618_vm1, %v1582_v15  ;;  %5318 = vmatprep.subr.mxu1 %v5539_v34  ;;  %v2185_v12 = vld [vmem:[%s7583_s7 + $0x320] sm:$0xff]  ;;  %v2178_v15 = vld [vmem:[%s7583_s7 + $0x2e8] sm:$0xff] }
 0x1b1   : > { %5055 = vmatpush1.msk.msra.mxu0 %vm618_vm1, %v1581_v14  ;;  %1656 = vmatprep.mubr.f32.mxu0 %v5539_v34  ;;  %v2181_v14 = vld [vmem:[%s7583_s7 + $0x300] sm:$0xff] }
 0x1b2   : > { %5316 = vmatmul.mubr.msk.f32.vlgmr.msra.gmra.mxu1 %vm614_vm2, %v5041_v6  ;;  %5056 = vmatmul.mubr.msk.f32.vlgmr.msra.gmra.mxu0 %vm614_vm2, %v5053_v16  ;;  %v1741_v18 = vpop.permute.xlu0 %1740  ;;  %v2197_v6 = vld [vmem:[%s7583_s7 + $0x380] sm:$0xff] }
 0x1b3   : > { %5319 = vmatpush3.msk.msra.mxu1 %vm618_vm1, %v1415_v59  ;;  %v1745_v19 = vsel %vm7604_vm9, %v1739_v17, %v1741_v18  ;;  %v1746_v20 = vsel %vm7604_vm9, %v1741_v18, %v6076_v62  ;;  %5320 = vmatprep.mubr.msk.f32.mxu1 %vm5549_vm3, %v5539_v34  ;;  %v2090_v59 = vld [vmem:[%s7583_s7 + $0x28] sm:$0xff]  ;;  %v2173_v18 = vld [vmem:[%s7583_s7 + $0x2c0] sm:$0xff]  ;;  %vm2629_vm9 = vcmask 867328  }
 0x1b4   : > { %5060 = vmatprep.subr.msk.mxu0 %vm618_vm1, %v1746_v20  ;;  %5323 = vmatprep.subr.mxu1 %v5539_v34  ;;  %v1903_v22 = vpop.permute.xlu1 %1902  ;;  %v2174_v17 = vld [vmem:[%s7583_s7 + $0x2c8] sm:$0xff]  ;;  %v2169_v20 = vld [vmem:[%s7583_s7 + $0x2a0] sm:$0xff] }
 0x1b5   : > { %5061 = vmatpush1.msk.msra.mxu0 %vm618_vm1, %v1745_v19  ;;  %1820 = vmatprep.mubr.f32.mxu0 %v5539_v34  ;;  %v2170_v19 = vld [vmem:[%s7583_s7 + $0x2a8] sm:$0xff] }
 0x1b6   : > { %5321 = vmatmul.mubr.msk.f32.vlgmr.msra.gmra.mxu1 %vm614_vm2, %v5047_v11  ;;  %5062 = vmatmul.mubr.msk.f32.vlgmr.msra.gmra.mxu0 %vm614_vm2, %v5059_v21  ;;  %v1905_v23 = vpop.permute.xlu0 %1904  ;;  %v2186_v11 = vld [vmem:[%s7583_s7 + $0x328] sm:$0xff] }
 0x1b7   : > { %5324 = vmatpush3.msk.msra.mxu1 %vm618_vm1, %v6063_v57  ;;  %v1909_v24 = vsel %vm7603_vm10, %v1903_v22, %v1905_v23  ;;  %v1910_v25 = vsel %vm7603_vm10, %v1905_v23, %v6072_v61  ;;  %5325 = vmatprep.mubr.msk.f32.mxu1 %vm5549_vm3, %v5539_v34  ;;  %v2094_v57 = vld [vmem:[%s7583_s7 + $0x48] sm:$0xff]  ;;  %v2165_v22 = vld [vmem:[%s7583_s7 + $0x280] sm:$0xff]  ;;  %vm2614_vm10 = vcmask 875520  }
 0x1b8   : > { %5066 = vmatprep.subr.msk.mxu0 %vm618_vm1, %v1910_v25  ;;  %5328 = vmatprep.subr.mxu1 %v5539_v34  ;;  %v2162_v23 = vld [vmem:[%s7583_s7 + $0x268] sm:$0xff] }
 0x1b9   : > { %5067 = vmatpush1.msk.msra.mxu0 %vm618_vm1, %v1909_v24  ;;  %1984 = vmatprep.mubr.f32.mxu0 %v5539_v34  ;;  %v2161_v24 = vld [vmem:[%s7583_s7 + $0x260] sm:$0xff]  ;;  %v2158_v25 = vld [vmem:[%s7583_s7 + $0x248] sm:$0xff] }
 0x1ba   : > { %5326 = vmatmul.mubr.msk.f32.vlgmr.msra.gmra.mxu1 %vm614_vm2, %v5053_v16  ;;  %5068 = vmatmul.mubr.msk.f32.vlgmr.msra.gmra.mxu0 %vm614_vm2, %v5065_v26  ;;  %v2177_v16 = vld [vmem:[%s7583_s7 + $0x2e0] sm:$0xff] }
 0x1bb   : > { %5329 = vmatpush3.msk.msra.mxu1 %vm618_vm1, %v6076_v62  ;;  %5330 = vmatprep.mubr.msk.f32.mxu1 %vm5549_vm3, %v5539_v34  ;;  %v2085_v62 = vld [vmem:[%s7583_s7] sm:$0xff] }
 0x1bc   : > { %5333 = vmatprep.subr.mxu1 %v5539_v34  ;;  %2246 = vmatprep.subr.mxu0 %v2146_v27  ;;  %v2154_v27 = vld [vmem:[%s7583_s7 + $0x228] sm:$0xff] }
 0x1bd   : > { %2247 = vmatpush1.msra.mxu0 %v2145_v28  ;;  %v2153_v28 = vld [vmem:[%s7583_s7 + $0x220] sm:$0xff] }
 0x1be   : > { %5331 = vmatmul.mubr.msk.f32.vlgmr.msra.gmra.mxu1 %vm614_vm2, %v5059_v21  ;;  %2248 = vmatprep.subr.mxu0 %v2142_v29  ;;  %v2166_v21 = vld [vmem:[%s7583_s7 + $0x288] sm:$0xff] }
 0x1bf   : > { %5334 = vmatpush3.msk.msra.mxu1 %vm618_vm1, %v6072_v61  ;;  %5335 = vmatprep.mubr.msk.f32.mxu1 %vm5549_vm3, %v5539_v34  ;;  %v2086_v61 = vld [vmem:[%s7583_s7 + $0x8] sm:$0xff] }
 0x1c0   : > { %2249 = vmatpush1.msra.mxu0 %v2141_v30  ;;  %v2226_v29 = vld [vmem:[%s7583_s7 + $0x468] sm:$0x3f] }
 0x1c1   : > { %2250 = vmatprep.subr.mxu0 %v2138_v31  ;;  %5071 = vmatprep.subr.msk.mxu1 %vm2233_vm11, %v2226_v29  ;;  %v2150_v30 = vld [vmem:[%s7583_s7 + $0x208] sm:$0xff]  ;;  %v2225_v31 = vld [vmem:[%s7583_s7 + $0x460] sm:$0x3f] }
 0x1c2   : > { %5336 = vmatmul.mubr.msk.f32.vlgmr.msra.gmra.mxu1 %vm614_vm2, %v5065_v26  ;;  %2251 = vmatpush1.msra.mxu0 %v2137_v32  ;;  %v2157_v26 = vld [vmem:[%s7583_s7 + $0x240] sm:$0xff] }
 0x1c3   : > { %2252 = vmatprep.subr.mxu0 %v2134_v33  ;;  %2381 = vmatprep.mubr.f32.mxu1 %v5539_v34  ;;  %v2149_v32 = vld [vmem:[%s7583_s7 + $0x200] sm:$0xff]  ;;  %v2222_v33 = vld [vmem:[%s7583_s7 + $0x448] sm:$0xff] }
 0x1c4   : > { %2253 = vmatpush1.msra.mxu0 %v2133_v35  ;;  %5072 = vmatpush1.msk.msra.mxu1 %vm2233_vm11, %v2225_v31  ;;  %v2221_v35 = vld [vmem:[%s7583_s7 + $0x440] sm:$0xff] }
 0x1c5   : > { %2254 = vmatprep.subr.mxu0 %v2130_v38  ;;  %2343 = vmatprep.subr.mxu1 %v2222_v33  ;;  %v2228_v38 = vld [vmem:[%s7583_s7 + $0x478] sm:$0x3f] }
 0x1c6   : > { %2255 = vmatpush1.msra.mxu0 %v2129_v40  ;;  %2344 = vmatpush1.msra.mxu1 %v2221_v35  ;;  %v2218_v40 = vld [vmem:[%s7583_s7 + $0x428] sm:$0xff] }
 0x1c7   : > { %2256 = vmatprep.subr.mxu0 %v2126_v41  ;;  %2345 = vmatprep.subr.mxu1 %v2218_v40  ;;  %v2217_v41 = vld [vmem:[%s7583_s7 + $0x420] sm:$0xff] }
 0x1c8   : > { %2257 = vmatpush1.msra.mxu0 %v2125_v42  ;;  %2346 = vmatpush1.msra.mxu1 %v2217_v41  ;;  %v2214_v42 = vld [vmem:[%s7583_s7 + $0x408] sm:$0xff] }
 0x1c9   : > { %2258 = vmatprep.subr.mxu0 %v2122_v43  ;;  %2347 = vmatprep.subr.mxu1 %v2214_v42  ;;  %v2213_v43 = vld [vmem:[%s7583_s7 + $0x400] sm:$0xff] }
 0x1ca   : > { %2259 = vmatpush1.msra.mxu0 %v2121_v44  ;;  %2348 = vmatpush1.msra.mxu1 %v2213_v43  ;;  %v2148_v44 = vld [vmem:[%s7583_s7 + $0x1f8] sm:$0xff] }
 0x1cb   : > { %2260 = vmatprep.subr.mxu0 %v2118_v45  ;;  %2388 = vmatprep.subr.mxu1 %v2148_v44 }
 0x1cc   : > { %2261 = vmatpush1.msra.mxu0 %v2117_v46 }
 0x1cd   : > { %2262 = vmatprep.subr.mxu0 %v2114_v47 }
 0x1ce   : > { %2263 = vmatpush1.msra.mxu0 %v2113_v48 }
 0x1cf   : > { %2264 = vmatprep.subr.mxu0 %v2110_v49 }
 0x1d0   : > { %2265 = vmatpush1.msra.mxu0 %v2109_v50 }
 0x1d1   : > { %2266 = vmatprep.subr.mxu0 %v2106_v51 }
 0x1d2   : > { %2267 = vmatpush1.msra.mxu0 %v2105_v52 }
 0x1d3   : > { %2268 = vmatprep.subr.mxu0 %v2102_v53 }
 0x1d4   : > { %2269 = vmatpush1.msra.mxu0 %v2101_v54 }
 0x1d5   : > { %2270 = vmatprep.subr.mxu0 %v2098_v55 }
 0x1d6   : > { %2271 = vmatpush1.msra.mxu0 %v2097_v56 }
 0x1d7   : > { %2272 = vmatprep.subr.mxu0 %v2094_v57 }
 0x1d8   : > { %2273 = vmatpush1.msra.mxu0 %v2093_v58 }
 0x1d9   : > { %2274 = vmatprep.subr.mxu0 %v2090_v59 }
 0x1da   : > { %2275 = vmatpush1.msra.mxu0 %v2089_v60 }
 0x1db   : > { %2276 = vmatprep.subr.mxu0 %v2086_v61 }
 0x1dc   : > { %2277 = vmatpush1.msra.mxu0 %v2085_v62 }
 0x1dd   : > { %2278 = vmatprep.subr.mxu0 %v2210_v63 }
 0x1de   : > { %2279 = vmatpush2.msra.mxu0 %v2209_v0 }
 0x1df   : > { %2280 = vmatprep.subr.mxu0 %v2206_v1 }
 0x1e0   : > { %2281 = vmatpush2.msra.mxu0 %v2205_v2 }
 0x1e1   : > { %2282 = vmatprep.subr.mxu0 %v2202_v3 }
 0x1e2   : > { %2283 = vmatpush2.msra.mxu0 %v2201_v4 }
 0x1e3   : > { %2284 = vmatprep.subr.mxu0 %v2198_v5 }
 0x1e4   : > { %2285 = vmatpush2.msra.mxu0 %v2197_v6 }
 0x1e5   : > { %2286 = vmatprep.subr.mxu0 %v2194_v7 }
 0x1e6   : > { %2287 = vmatpush2.msra.mxu0 %v2193_v8 }
 0x1e7   : > { %2288 = vmatprep.subr.mxu0 %v2190_v9 }
 0x1e8   : > { %2289 = vmatpush2.msra.mxu0 %v2189_v10 }
 0x1e9   : > { %2290 = vmatprep.subr.mxu0 %v2186_v11 }
 0x1ea   : > { %2291 = vmatpush2.msra.mxu0 %v2185_v12 }
 0x1eb   : > { %2292 = vmatprep.subr.mxu0 %v2182_v13 }
 0x1ec   : > { %2293 = vmatpush2.msra.mxu0 %v2181_v14 }
 0x1ed   : > { %2294 = vmatprep.subr.mxu0 %v2178_v15 }
 0x1ee   : > { %2295 = vmatpush2.msra.mxu0 %v2177_v16 }
 0x1ef   : > { %2296 = vmatprep.subr.mxu0 %v2174_v17 }
 0x1f0   : > { %2297 = vmatpush2.msra.mxu0 %v2173_v18 }
 0x1f1   : > { %2298 = vmatprep.subr.mxu0 %v2170_v19 }
 0x1f2   : > { %2299 = vmatpush2.msra.mxu0 %v2169_v20 }
 0x1f3   : > { %2300 = vmatprep.subr.mxu0 %v2166_v21 }
 0x1f4   : > { %2301 = vmatpush2.msra.mxu0 %v2165_v22 }
 0x1f5   : > { %2302 = vmatprep.subr.mxu0 %v2162_v23 }
 0x1f6   : > { %2303 = vmatpush2.msra.mxu0 %v2161_v24 }
 0x1f7   : > { %2304 = vmatprep.subr.mxu0 %v2158_v25  ;;  %v2068_v25 = vpop.permute.xlu0 %2067 }
 0x1f8   : > { %2305 = vmatpush2.msra.mxu0 %v2157_v26 }
 0x1f9   : > { %2306 = vmatprep.subr.mxu0 %v2154_v27 }
 0x1fa   : > { %2307 = vmatpush2.msra.mxu0 %v2153_v28 }
 0x1fb   : > { %2308 = vmatprep.subr.mxu0 %v2150_v30 }
 0x1fc   : > { %2309 = vmatpush2.msra.mxu0 %v2149_v32 }
 0x1fd   : > { %5074 = vmatprep.subr.msk.mxu0 %vm2233_vm11, %v2228_v38 }
 0x252   : > { %v691_v45 = vpop.f32.mrf.mxu1 }
 0x254   : > { %v693_v46 = vpop.f32.mrf.mxu1 }
 0x256   : > { %v762_v47 = vpop.f32.mrf.mxu1 }
 0x258   : > { %v5297_v48 = vpop.f32.mrf.mxu1 }
 0x25a   : > { %v841_v49 = vpop.f32.mrf.mxu1 }
 0x25b   : > { %v842_v57 = vadd.f32 %v841_v49, %v691_v45 }
 0x25c   : > { %v843_v50 = vpop.f32.mrf.mxu1 }
 0x25d   : > { %v844_v60 = vadd.f32 %v843_v50, %v693_v46 }
 0x25e   : > { %v912_v51 = vpop.f32.mrf.mxu1 }
 0x25f   : > { %v913_v13 = vadd.f32 %v912_v51, %v762_v47 }
 0x260   : > { %v5302_v52 = vpop.f32.mrf.mxu1 }
 0x262   : > { %v1002_v53 = vpop.f32.mrf.mxu1 }
 0x263   : > { %v1077_v61 = vadd.f32 %v1002_v53, %v842_v57 }
 0x264   : > { %v1004_v54 = vpop.f32.mrf.mxu1 }
 0x265   : > { %v1078_v0 = vadd.f32 %v1004_v54, %v844_v60 }
 0x266   : > { %v1073_v55 = vpop.f32.mrf.mxu1 }
 0x267   : > { %v1079_v17 = vadd.f32 %v1073_v55, %v913_v13  ;;  %v2227_v55 = vld [vmem:[%s7583_s7 + $0x470] sm:$0x3f] }
 0x268   : > { %v5307_v56 = vpop.f32.mrf.mxu1  ;;  %v2123_v13 = vld [vmem:[%s7583_s7 + $0x130] sm:$0xff] }
 0x269   : > { %v2224_v56 = vld [vmem:[%s7583_s7 + $0x458] sm:$0xff] }
 0x26a   : > { %v1166_v58 = vpop.f32.mrf.mxu1  ;;  %v1330_v59 = vpop.f32.mrf.mxu0 }
 0x26b   : > { %v1241_v1 = vadd.f32 %v1166_v58, %v1077_v61  ;;  %v2223_v58 = vld [vmem:[%s7583_s7 + $0x450] sm:$0xff] }
 0x26c   : > { %v1168_v62 = vpop.f32.mrf.mxu1  ;;  %v1332_v63 = vpop.f32.mrf.mxu0  ;;  %v2219_v61 = vld [vmem:[%s7583_s7 + $0x430] sm:$0xff] }
 0x26d   : > { %v1242_v4 = vadd.f32 %v1168_v62, %v1078_v0  ;;  %v1405_v7 = vadd.f32 %v1330_v59, %v1241_v1  ;;  %v2220_v59 = vld [vmem:[%s7583_s7 + $0x438] sm:$0xff] }
 0x26e   : > { %v1237_v2 = vpop.f32.mrf.mxu1  ;;  %v1494_v3 = vpop.f32.mrf.mxu0  ;;  %v2216_v0 = vld [vmem:[%s7583_s7 + $0x418] sm:$0xff] }
 0x26f   : > { %v1406_v10 = vadd.f32 %v1332_v63, %v1242_v4  ;;  %v1569_v14 = vadd.f32 %v1494_v3, %v1405_v7  ;;  %v1243_v22 = vadd.f32 %v1237_v2, %v1079_v17  ;;  %v2147_v63 = vld [vmem:[%s7583_s7 + $0x1f0] sm:$0xff]  ;;  %v2144_v1 = vld [vmem:[%s7583_s7 + $0x1d8] sm:$0xff] }
 0x270   : > { %v5312_v5 = vpop.f32.mrf.mxu1  ;;  %v1496_v6 = vpop.f32.mrf.mxu0  ;;  %v2215_v2 = vld [vmem:[%s7583_s7 + $0x410] sm:$0xff]  ;;  %v2140_v4 = vld [vmem:[%s7583_s7 + $0x1b8] sm:$0xff] }
 0x271   : > { %v1570_v18 = vadd.f32 %v1496_v6, %v1406_v10  ;;  %v2143_v3 = vld [vmem:[%s7583_s7 + $0x1d0] sm:$0xff]  ;;  %v2136_v6 = vld [vmem:[%s7583_s7 + $0x198] sm:$0xff] }
 0x272   : > { %v1401_v8 = vpop.f32.mrf.mxu1  ;;  %v1658_v9 = vpop.f32.mrf.mxu0  ;;  %v2139_v5 = vld [vmem:[%s7583_s7 + $0x1b0] sm:$0xff]  ;;  %v2128_v10 = vld [vmem:[%s7583_s7 + $0x158] sm:$0xff] }
 0x273   : > { %v1733_v19 = vadd.f32 %v1658_v9, %v1569_v14  ;;  %v1407_v28 = vadd.f32 %v1401_v8, %v1243_v22  ;;  %v2135_v7 = vld [vmem:[%s7583_s7 + $0x190] sm:$0xff]  ;;  %v2132_v8 = vld [vmem:[%s7583_s7 + $0x178] sm:$0xff] }
 0x274   : > { %v5317_v11 = vpop.f32.mrf.mxu1  ;;  %v1660_v12 = vpop.f32.mrf.mxu0  ;;  %v2131_v9 = vld [vmem:[%s7583_s7 + $0x170] sm:$0xff]  ;;  %v2120_v14 = vld [vmem:[%s7583_s7 + $0x118] sm:$0xff] }
 0x275   : > { %v1734_v23 = vadd.f32 %v1660_v12, %v1570_v18  ;;  %v2127_v11 = vld [vmem:[%s7583_s7 + $0x150] sm:$0xff]  ;;  %v2124_v12 = vld [vmem:[%s7583_s7 + $0x138] sm:$0xff] }
 0x276   : > { %v1565_v15 = vpop.f32.mrf.mxu1  ;;  %v1822_v16 = vpop.f32.mrf.mxu0  ;;  %v2115_v17 = vld [vmem:[%s7583_s7 + $0xf0] sm:$0xff]  ;;  %v2112_v18 = vld [vmem:[%s7583_s7 + $0xd8] sm:$0xff] }
 0x277   : > { %v1897_v24 = vadd.f32 %v1822_v16, %v1733_v19  ;;  %v1571_v33 = vadd.f32 %v1565_v15, %v1407_v28  ;;  %v2119_v15 = vld [vmem:[%s7583_s7 + $0x110] sm:$0xff]  ;;  %v2116_v16 = vld [vmem:[%s7583_s7 + $0xf8] sm:$0xff] }
 0x278   : > { %v5322_v20 = vpop.f32.mrf.mxu1  ;;  %v1824_v21 = vpop.f32.mrf.mxu0  ;;  %v2111_v19 = vld [vmem:[%s7583_s7 + $0xd0] sm:$0xff]  ;;  %v2104_v22 = vld [vmem:[%s7583_s7 + $0x98] sm:$0xff] }
 0x279   : > { %v1898_v29 = vadd.f32 %v1824_v21, %v1734_v23  ;;  %v2108_v20 = vld [vmem:[%s7583_s7 + $0xb8] sm:$0xff]  ;;  %v2107_v21 = vld [vmem:[%s7583_s7 + $0xb0] sm:$0xff] }
 0x27a   : > { %v1729_v26 = vpop.f32.mrf.mxu1  ;;  %v1986_v27 = vpop.f32.mrf.mxu0  ;;  %v2103_v23 = vld [vmem:[%s7583_s7 + $0x90] sm:$0xff]  ;;  %v2092_v28 = vld [vmem:[%s7583_s7 + $0x38] sm:$0xff] }
 0x27b   : > { %v2061_v30 = vadd.f32 %v1986_v27, %v1897_v24  ;;  %v1735_v41 = vadd.f32 %v1729_v26, %v1571_v33  ;;  %v2100_v24 = vld [vmem:[%s7583_s7 + $0x78] sm:$0xff]  ;;  %v2095_v27 = vld [vmem:[%s7583_s7 + $0x50] sm:$0xff] }
 0x27c   : > { %v5327_v31 = vpop.f32.mrf.mxu1  ;;  %v1988_v32 = vpop.f32.mrf.mxu0  ;;  %v2096_v26 = vld [vmem:[%s7583_s7 + $0x58] sm:$0xff]  ;;  %v2211_v33 = vld [vmem:[%s7583_s7 + $0x3f0] sm:$0xff] }
 0x27d   : > { %v2062_v35 = vadd.f32 %v1988_v32, %v1898_v29  ;;  %v2070_v38 = vadd.f32 %v2068_v25, %v2061_v30  ;;  %v2091_v29 = vld [vmem:[%s7583_s7 + $0x30] sm:$0xff]  ;;  %v2088_v30 = vld [vmem:[%s7583_s7 + $0x18] sm:$0xff] }
 0x27e   : > { %v1893_v40 = vpop.f32.mrf.mxu1  ;;  %v2087_v31 = vld [vmem:[%s7583_s7 + $0x10] sm:$0xff]  ;;  %v2212_v32 = vld [vmem:[%s7583_s7 + $0x3f8] sm:$0xff] }
 0x27f   : > { %v2071_v42 = vadd.f32 %v2068_v25, %v2062_v35  ;;  %v2076_v43 = vmul.f32 0.2, %v2070_v38  ;;  %vm2073_vm12 = vcmp.ge.f32.partialorder %v2070_v38, 0.0  ;;  %v1899_v45 = vadd.f32 %v1893_v40, %v1735_v41  ;;  %v2208_v35 = vld [vmem:[%s7583_s7 + $0x3d8] sm:$0xff]  ;;  %v2203_v41 = vld [vmem:[%s7583_s7 + $0x3b0] sm:$0xff] }
 0x280   : > { %v5332_v44 = vpop.f32.mrf.mxu1  ;;  %v2204_v40 = vld [vmem:[%s7583_s7 + $0x3b8] sm:$0xff] }
 0x281   : > { %vm2074_vm13 = vcmp.ge.f32.partialorder %v2071_v42, 0.0  ;;  %v2077_v46 = vmul.f32 0.2, %v2071_v42  ;;  %v2079_v48 = vsel %vm2073_vm12, %v2070_v38, %v2076_v43  ;;  %v2207_v38 = vld [vmem:[%s7583_s7 + $0x3d0] sm:$0xff]  ;;  %v2196_v44 = vld [vmem:[%s7583_s7 + $0x378] sm:$0xff]  ;;  %vm7608_vm12 = vcmask 1022976  }
 0x282   : > { %v2057_v47 = vpop.f32.mrf.mxu1  ;;  %v6397_v54 = vmul.f32 1.4142135, %v2079_v48  ;;  %v2199_v43 = vld [vmem:[%s7583_s7 + $0x390] sm:$0xff]  ;;  %v2188_v48 = vld [vmem:[%s7583_s7 + $0x338] sm:$0xff] }
 0x283   : > { %v2063_v49 = vadd.f32 %v2057_v47, %v1899_v45  ;;  %v2080_v50 = vsel %vm2074_vm13, %v2071_v42, %v2077_v46  ;;  %v2200_v42 = vld [vmem:[%s7583_s7 + $0x398] sm:$0xff]  ;;  %v2195_v45 = vld [vmem:[%s7583_s7 + $0x370] sm:$0xff]  ;;  %vm2743_vm13 = vcmask 547840  }
 0x284   : > { %v5337_v51 = vpop.f32.mrf.mxu1  ;;  %v2083_v52 = vmul.f32 1.4142135, %v2080_v50  ;;  %v2192_v46 = vld [vmem:[%s7583_s7 + $0x358] sm:$0xff]  ;;  %v2191_v47 = vld [vmem:[%s7583_s7 + $0x350] sm:$0xff] }
 0x285   : > { %v2072_v53 = vadd.f32 %v2068_v25, %v2063_v49  ;;  %v2099_v25 = vld [vmem:[%s7583_s7 + $0x70] sm:$0xff]  ;;  %v2184_v50 = vld [vmem:[%s7583_s7 + $0x318] sm:$0xff] }
 0x286   : > { %2310 = vmatprep.mubr.f32.mxu0 %v2083_v52  ;;  %v2187_v49 = vld [vmem:[%s7583_s7 + $0x330] sm:$0xff] }
 0x287   : > { %vm2075_vm14 = vcmp.ge.f32.partialorder %v2072_v53, 0.0  ;;  %v2078_v57 = vmul.f32 0.2, %v2072_v53  ;;  %2311 = vmatmul.mubr.f32.vlgmr.msra.gmra.mxu0 %v6397_v54  ;;  %v2183_v51 = vld [vmem:[%s7583_s7 + $0x310] sm:$0xff] }
 0x288   : > { %5075 = vmatpush1.msk.msra.mxu0 %vm2233_vm11, %v2227_v55  ;;  %2523 = vmatprep.mubr.f32.mxu0 %v5539_v34  ;;  %v2176_v55 = vld [vmem:[%s7583_s7 + $0x2d8] sm:$0xff]  ;;  %vm2723_vm11 = vcmask 556032  }
 0x289   : > { %v2081_v60 = vsel %vm2075_vm14, %v2072_v53, %v2078_v57  ;;  %2485 = vmatprep.subr.mxu0 %v2224_v56  ;;  %v2179_v53 = vld [vmem:[%s7583_s7 + $0x2f0] sm:$0xff]  ;;  %v2172_v57 = vld [vmem:[%s7583_s7 + $0x2b8] sm:$0xff]  ;;  %vm2761_vm14 = vcmask 539648  }
 0x28a   : > { %v2084_v62 = vmul.f32 1.4142135, %v2081_v60  ;;  %2486 = vmatpush1.msra.mxu0 %v2223_v58  ;;  %v2175_v56 = vld [vmem:[%s7583_s7 + $0x2d0] sm:$0xff] }
 0x28b   : > { %2487 = vmatprep.subr.mxu0 %v2220_v59  ;;  %v2171_v58 = vld [vmem:[%s7583_s7 + $0x2b0] sm:$0xff]  ;;  %v2168_v59 = vld [vmem:[%s7583_s7 + $0x298] sm:$0xff] }
 0x28c   : > { %2488 = vmatpush1.msra.mxu0 %v2219_v61  ;;  %5073 = vmatmul.mubr.msk.f32.vlgmr.msra.gmra.mxu1 %vm2229_vm15, %v2084_v62  ;;  %v2167_v60 = vld [vmem:[%s7583_s7 + $0x290] sm:$0xff]  ;;  %v2164_v61 = vld [vmem:[%s7583_s7 + $0x278] sm:$0xff] }
 0x28d   : > { %2389 = vmatpush1.msra.mxu1 %v2147_v63  ;;  %2489 = vmatprep.subr.mxu0 %v2216_v0  ;;  %v2160_v63 = vld [vmem:[%s7583_s7 + $0x258] sm:$0xff]  ;;  %v2159_v0 = vld [vmem:[%s7583_s7 + $0x250] sm:$0xff] }
 0x28e   : > { %2390 = vmatprep.subr.mxu1 %v2144_v1  ;;  %2452 = vmatprep.mubr.f32.mxu1 %v2083_v52  ;;  %v2180_v52 = vld [vmem:[%s7583_s7 + $0x2f8] sm:$0xff] }
 0x28f   : > { %2490 = vmatpush1.msra.mxu0 %v2215_v2  ;;  %2391 = vmatpush1.msra.mxu1 %v2143_v3  ;;  %v2156_v1 = vld [vmem:[%s7583_s7 + $0x238] sm:$0xff]  ;;  %v2155_v2 = vld [vmem:[%s7583_s7 + $0x230] sm:$0xff] }
 0x290   : > { %5076 = vmatmul.mubr.msk.f32.vlgmr.msra.gmra.mxu0 %vm2229_vm15, %v2084_v62  ;;  %2392 = vmatprep.subr.mxu1 %v2140_v4  ;;  %v2163_v62 = vld [vmem:[%s7583_s7 + $0x270] sm:$0xff]  ;;  %v2152_v3 = vld [vmem:[%s7583_s7 + $0x218] sm:$0xff]  ;;  %vm2779_vm15 = vcmask 531456  }
 0x291   : > { %2393 = vmatpush1.msra.mxu1 %v2139_v5  ;;  %2876 = vmatprep.mubr.f32.mxu0 %v5539_v34  ;;  %v2151_v4 = vld [vmem:[%s7583_s7 + $0x210] sm:$0xff] }
 0x292   : > { %2394 = vmatprep.subr.mxu1 %v2136_v6 }
 0x293   : > { %2395 = vmatpush1.msra.mxu1 %v2135_v7 }
 0x294   : > { %2396 = vmatprep.subr.mxu1 %v2132_v8 }
 0x295   : > { %2397 = vmatpush1.msra.mxu1 %v2131_v9 }
 0x296   : > { %2398 = vmatprep.subr.mxu1 %v2128_v10 }
 0x297   : > { %2399 = vmatpush1.msra.mxu1 %v2127_v11 }
 0x298   : > { %2400 = vmatprep.subr.mxu1 %v2124_v12 }
 0x299   : > { %2401 = vmatpush1.msra.mxu1 %v2123_v13 }
 0x29a   : > { %2402 = vmatprep.subr.mxu1 %v2120_v14 }
 0x29b   : > { %2403 = vmatpush1.msra.mxu1 %v2119_v15 }
 0x29c   : > { %2404 = vmatprep.subr.mxu1 %v2116_v16 }
 0x29d   : > { %2405 = vmatpush1.msra.mxu1 %v2115_v17 }
 0x29e   : > { %2406 = vmatprep.subr.mxu1 %v2112_v18 }
 0x29f   : > { %2407 = vmatpush1.msra.mxu1 %v2111_v19 }
 0x2a0   : > { %2408 = vmatprep.subr.mxu1 %v2108_v20 }
 0x2a1   : > { %2409 = vmatpush1.msra.mxu1 %v2107_v21 }
 0x2a2   : > { %2410 = vmatprep.subr.mxu1 %v2104_v22 }
 0x2a3   : > { %2411 = vmatpush1.msra.mxu1 %v2103_v23 }
 0x2a4   : > { %2412 = vmatprep.subr.mxu1 %v2100_v24 }
 0x2a5   : > { %2413 = vmatpush1.msra.mxu1 %v2099_v25 }
 0x2a6   : > { %2414 = vmatprep.subr.mxu1 %v2096_v26 }
 0x2a7   : > { %2415 = vmatpush1.msra.mxu1 %v2095_v27 }
 0x2a8   : > { %2416 = vmatprep.subr.mxu1 %v2092_v28 }
 0x2a9   : > { %2417 = vmatpush1.msra.mxu1 %v2091_v29 }
 0x2aa   : > { %2418 = vmatprep.subr.mxu1 %v2088_v30 }
 0x2ab   : > { %2419 = vmatpush1.msra.mxu1 %v2087_v31 }
 0x2ac   : > { %2420 = vmatprep.subr.mxu1 %v2212_v32 }
 0x2ad   : > { %2421 = vmatpush2.msra.mxu1 %v2211_v33 }
 0x2ae   : > { %2422 = vmatprep.subr.mxu1 %v2208_v35 }
 0x2af   : > { %2423 = vmatpush2.msra.mxu1 %v2207_v38 }
 0x2b0   : > { %2424 = vmatprep.subr.mxu1 %v2204_v40 }
 0x2b1   : > { %2425 = vmatpush2.msra.mxu1 %v2203_v41 }
 0x2b2   : > { %2426 = vmatprep.subr.mxu1 %v2200_v42 }
 0x2b3   : > { %2427 = vmatpush2.msra.mxu1 %v2199_v43 }
 0x2b4   : > { %2428 = vmatprep.subr.mxu1 %v2196_v44 }
 0x2b5   : > { %2429 = vmatpush2.msra.mxu1 %v2195_v45 }
 0x2b6   : > { %2430 = vmatprep.subr.mxu1 %v2192_v46 }
 0x2b7   : > { %2431 = vmatpush2.msra.mxu1 %v2191_v47 }
 0x2b8   : > { %2432 = vmatprep.subr.mxu1 %v2188_v48 }
 0x2b9   : > { %2433 = vmatpush2.msra.mxu1 %v2187_v49 }
 0x2ba   : > { %2434 = vmatprep.subr.mxu1 %v2184_v50 }
 0x2bb   : > { %2435 = vmatpush2.msra.mxu1 %v2183_v51 }
 0x2bc   : > { %2436 = vmatprep.subr.mxu1 %v2180_v52 }
 0x2bd   : > { %2437 = vmatpush2.msra.mxu1 %v2179_v53 }
 0x2be   : > { %2438 = vmatprep.subr.mxu1 %v2176_v55 }
 0x2bf   : > { %2439 = vmatpush2.msra.mxu1 %v2175_v56 }
 0x2c0   : > { %2440 = vmatprep.subr.mxu1 %v2172_v57 }
 0x2c1   : > { %2441 = vmatpush2.msra.mxu1 %v2171_v58 }
 0x2c2   : > { %2442 = vmatprep.subr.mxu1 %v2168_v59 }
 0x2c3   : > { %2443 = vmatpush2.msra.mxu1 %v2167_v60 }
 0x2c4   : > { %2444 = vmatprep.subr.mxu1 %v2164_v61 }
 0x2c5   : > { %2445 = vmatpush2.msra.mxu1 %v2163_v62 }
 0x2c6   : > { %2446 = vmatprep.subr.mxu1 %v2160_v63 }
 0x2c7   : > { %2447 = vmatpush2.msra.mxu1 %v2159_v0 }
 0x2c8   : > { %2448 = vmatprep.subr.mxu1 %v2156_v1 }
 0x2c9   : > { %2449 = vmatpush2.msra.mxu1 %v2155_v2 }
 0x2ca   : > { %2450 = vmatprep.subr.mxu1 %v2152_v3 }
 0x2cb   : > { %2451 = vmatpush2.msra.mxu1 %v2151_v4 }
 0x2cc   : > { %2453 = vmatmul.mubr.f32.vlgmr.msra.gmra.mxu1 %v6397_v54  ;;  %5338 = vmatprep.subr.mxu1 %v5539_v34 }
 0x2cd   : > { %5340 = vmatprep.mubr.msk.f32.mxu1 %vm5549_vm3, %v5539_v34 }
 0x347   : > { %v2312_v5 = vpop.f32.mrf.mxu0 }
 0x349   : > { %v2314_v8 = vpop.f32.mrf.mxu0 }
 0x34c   : > { %v2383_v6 = vpop.f32.mrf.mxu1 }
 0x34d   : > { %v2384_v7 = vadd.f32 %v2383_v6, %v2312_v5 }
 0x34e   : > { %v2385_v9 = vpop.f32.mrf.mxu1 }
 0x34f   : > { %v6619_v10 = vmul.f32 0.046875, %v2384_v7  ;;  %v2386_v11 = vadd.f32 %v2385_v9, %v2314_v8  ;;  %v6629_v54 = vmul.f32 0.015625, %v2384_v7  ;;  %v2602_v14 = vmul.f32 0.140625, %v2384_v7 }
 0x350   : > { %v2525_v16 = vpop.f32.mrf.mxu0 }
 0x351   : > { %v6621_v12 = vmul.f32 0.046875, %v2386_v11  ;;  %2542 = vrot.lane.b32.xlu0 %v6619_v10, %s5540_s22  ;;  %v6633_v13 = vmul.f32 0.015625, %v2386_v11  ;;  %v2603_v15 = vmul.f32 0.140625, %v2386_v11 }
 0x352   : > { %v2527_v23 = vpop.f32.mrf.mxu0 }
 0x353   : > { %2544 = vrot.lane.b32.xlu1 %v6621_v12, %s5540_s22 }
 0x355   : > { %2556 = vrot.lane.b32.xlu0 %v6619_v10, %s5541_s12 }
 0x357   : > { %2558 = vrot.lane.b32.xlu1 %v6621_v12, %s5541_s12 }
 0x359   : > { %2573 = vrot.lane.b32.xlu0 %v6629_v54, %s7599_s29 }
 0x35b   : > { %2575 = vrot.lane.b32.xlu1 %v6633_v13, %s7599_s29 }
 0x35d   : > { %2588 = vrot.lane.b32.xlu0 %v6619_v10, %s7612_s27 }
 0x35f   : > { %2590 = vrot.lane.b32.xlu1 %v6621_v12, %s7612_s27 }
 0x361   : > { %2608 = vrot.lane.b32.xlu0 %v2602_v14, %s5551_s20 }
 0x363   : > { %2610 = vrot.lane.b32.xlu1 %v2603_v15, %s5551_s20 }
 0x365   : > { %2623 = vrot.lane.b32.xlu0 %v2602_v14, %s7601_s21 }
 0x367   : > { %2625 = vrot.lane.b32.xlu1 %v2603_v15, %s7601_s21 }
 0x369   : > { %2638 = vrot.lane.b32.xlu0 %v6619_v10, %s5553_s11 }
 0x36b   : > { %2640 = vrot.lane.b32.xlu1 %v6621_v12, %s5553_s11 }
 0x36f   : > { %2655 = vrot.lane.b32.xlu1 %v6621_v12, %s5554_s25 }
 0x38c   : > { %v2454_v17 = vpop.f32.mrf.mxu1 }
 0x38d   : > { %v2526_v18 = vadd.f32 %v2525_v16, %v2454_v17 }
 0x38e   : > { %v2456_v22 = vpop.f32.mrf.mxu1 }
 0x38f   : > { %v6651_v19 = vmul.f32 0.015625, %v2526_v18  ;;  %v2538_v20 = vmul.f32 0.046875, %v2526_v18  ;;  %v2604_v21 = vmul.f32 0.140625, %v2526_v18  ;;  %v2528_v24 = vadd.f32 %v2527_v23, %v2456_v22 }
 0x391   : > { %2577 = vrot.lane.b32.xlu0 %v6651_v19, %s7599_s29  ;;  %2546 = vrot.lane.b32.xlu1 %v2538_v20, %s5540_s22  ;;  %s5560_s29 = smov 68   ;;  %v2713_v25 = vmul.f32 0.015625, %v2528_v24  ;;  %v2733_v26 = vmul.f32 0.046875, %v2528_v24 }
 0x395   : > { %2612 = vrot.lane.b32.xlu0 %v2604_v21, %s5551_s20  ;;  %2560 = vrot.lane.b32.xlu1 %v2538_v20, %s5541_s12 }
 0x399   : > { %2642 = vrot.lane.b32.xlu0 %v2538_v20, %s5553_s11  ;;  %2592 = vrot.lane.b32.xlu1 %v2538_v20, %s7612_s27  ;;  %s5559_s11 = smov 65  }
 0x39d   : > { %2672 = vrot.lane.b32.xlu0 %v2604_v21, %s5555_s26  ;;  %2627 = vrot.lane.b32.xlu1 %v2604_v21, %s7601_s21  ;;  %s5561_s21 = smov 67  }
 0x3a1   : > { %2702 = vrot.lane.b32.xlu0 %v2538_v20, %s5556_s28  ;;  %2657 = vrot.lane.b32.xlu1 %v2538_v20, %s5554_s25 }
 0x3a5   : > { %2757 = vrot.lane.b32.xlu0 %v2538_v20, %s5557_s18  ;;  %2687 = vrot.lane.b32.xlu1 %v2604_v21, %s5558_s30 }
 0x3a9   : > { %2775 = vrot.lane.b32.xlu0 %v6651_v19, %s5559_s11  ;;  %2719 = vrot.lane.b32.xlu1 %v6651_v19, %s5560_s29 }
 0x3ad   : > { %2721 = vrot.lane.b32.xlu0 %v2713_v25, %s5560_s29  ;;  %2739 = vrot.lane.b32.xlu1 %v2538_v20, %s5561_s21 }
 0x3b1   : > { %2741 = vrot.lane.b32.xlu0 %v2733_v26, %s5561_s21  ;;  %2759 = vrot.lane.b32.xlu1 %v2733_v26, %s5557_s18 }
 0x3b5   : > { %2653 = vrot.lane.b32.xlu0 %v6619_v10, %s5554_s25  ;;  %2777 = vrot.lane.b32.xlu1 %v2713_v25, %s5559_s11 }
 0x3b9   : > { %2668 = vrot.lane.b32.xlu0 %v2602_v14, %s5555_s26  ;;  %2670 = vrot.lane.b32.xlu1 %v2603_v15, %s5555_s26 }
 0x3bd   : > { %2683 = vrot.lane.b32.xlu0 %v2602_v14, %s5558_s30  ;;  %2685 = vrot.lane.b32.xlu1 %v2603_v15, %s5558_s30 }
 0x3c1   : > { %2698 = vrot.lane.b32.xlu0 %v6619_v10, %s5556_s28  ;;  %2700 = vrot.lane.b32.xlu1 %v6621_v12, %s5556_s28 }
 0x3c3   : > { %v2543_v28 = vpop.permute.xlu0 %2542 }
 0x3c5   : > { %2715 = vrot.lane.b32.xlu0 %v6629_v54, %s5560_s29  ;;  %2717 = vrot.lane.b32.xlu1 %v6633_v13, %s5560_s29  ;;  %v2545_v27 = vpop.permute.xlu1 %2544  ;;  %s7613_s29 = smov 106  }
 0x3c6   : > { %v2548_v23 = vsel %vm611_vm0, %v2543_v28, %v2545_v27 }
 0x3c7   : > { %v6683_v30 = vpop.permute.xlu0 %2556 }
 0x3c9   : > { %2735 = vrot.lane.b32.xlu0 %v6619_v10, %s5561_s21  ;;  %2737 = vrot.lane.b32.xlu1 %v6621_v12, %s5561_s21  ;;  %v6681_v29 = vpop.permute.xlu1 %2558  ;;  %s7614_s21 = smov 125  }
 0x3cb   : > { %v6687_v32 = vpop.permute.xlu0 %2573 }
 0x3cd   : > { %2753 = vrot.lane.b32.xlu0 %v6619_v10, %s5557_s18  ;;  %2755 = vrot.lane.b32.xlu1 %v6621_v12, %s5557_s18  ;;  %v6685_v31 = vpop.permute.xlu1 %2575  ;;  %s5564_s18 = smov 73  }
 0x3cf   : > { %v6691_v35 = vpop.permute.xlu0 %2588 }
 0x3d1   : > { %2771 = vrot.lane.b32.xlu0 %v6629_v54, %s5559_s11  ;;  %2773 = vrot.lane.b32.xlu1 %v6633_v13, %s5559_s11  ;;  %v6689_v33 = vpop.permute.xlu1 %2590 }
 0x3d3   : > { %v6695_v40 = vpop.permute.xlu0 %2608 }
 0x3d5   : > { %v6693_v38 = vpop.permute.xlu1 %2610 }
 0x3d7   : > { %v6699_v42 = vpop.permute.xlu0 %2623 }
 0x3d9   : > { %v6697_v41 = vpop.permute.xlu1 %2625 }
 0x3db   : > { %v6703_v44 = vpop.permute.xlu0 %2638 }
 0x3dd   : > { %v6701_v43 = vpop.permute.xlu1 %2640 }
 0x3e1   : > { %v6705_v45 = vpop.permute.xlu1 %2655 }
 0x403   : > { %v2578_v46 = vpop.permute.xlu0 %2577  ;;  %v2547_v47 = vpop.permute.xlu1 %2546 }
 0x404   : > { %v2555_v48 = vadd.f32 %v2547_v47, %v6651_v19  ;;  %v2549_v4 = vsel %vm611_vm0, %v2545_v27, %v2547_v47  ;;  %v2581_v16 = vsel %vm7608_vm12, %v6685_v31, %v2578_v46  ;;  %v2580_v27 = vsel %vm7608_vm12, %v6687_v32, %v6685_v31 }
 0x405   : > { %v2554_v8 = vadd.f32 %v2549_v4, %v6633_v13  ;;  %v2615_v32 = vsel %vm2614_vm10, %v6695_v40, %v6693_v38  ;;  %vm2704_vm12 = vcmask 695296  }
 0x407   : > { %v2613_v49 = vpop.permute.xlu0 %2612  ;;  %v2561_v50 = vpop.permute.xlu1 %2560 }
 0x408   : > { %v2569_v51 = vadd.f32 %v2561_v50, %v2555_v48  ;;  %v2563_v7 = vsel %vm924_vm4, %v6681_v29, %v2561_v50  ;;  %v2562_v48 = vsel %vm924_vm4, %v6683_v30, %v6681_v29  ;;  %v2616_v28 = vsel %vm2614_vm10, %v6693_v38, %v2613_v49 }
 0x409   : > { %v2568_v10 = vadd.f32 %v2563_v7, %v2554_v8  ;;  %v2594_v29 = vsel %vm1416_vm7, %v6691_v35, %v6689_v33  ;;  %v2645_v38 = vsel %vm2644_vm8, %v6703_v44, %v6701_v43 }
 0x40a   : > { %v2587_v52 = vadd.f32 %v2578_v46, %v2569_v51  ;;  %v2553_v51 = vadd.f32 %v2548_v23, %v6629_v54 }
 0x40b   : > { %v6708_v53 = vpop.permute.xlu0 %2642  ;;  %v2593_v55 = vpop.permute.xlu1 %2592  ;;  %v2586_v17 = vadd.f32 %v2581_v16, %v2568_v10 }
 0x40c   : > { %v2601_v56 = vadd.f32 %v2593_v55, %v2587_v52  ;;  %v2595_v20 = vsel %vm1416_vm7, %v6689_v33, %v2593_v55  ;;  %v2567_v55 = vadd.f32 %v2562_v48, %v2553_v51  ;;  %v2630_v33 = vsel %vm2629_vm9, %v6699_v42, %v6697_v41 }
 0x40d   : > { %v2600_v25 = vadd.f32 %v2595_v20, %v2586_v17  ;;  %v2646_v40 = vsel %vm2644_vm8, %v6701_v43, %v6708_v53  ;;  %vm2689_vm8 = vcmask 703488  }
 0x40e   : > { %v2622_v57 = vadd.f32 %v2613_v49, %v2601_v56  ;;  %v2585_v31 = vadd.f32 %v2580_v27, %v2567_v55 }
 0x40f   : > { %v6710_v58 = vpop.permute.xlu0 %2672  ;;  %v2628_v59 = vpop.permute.xlu1 %2627  ;;  %v2621_v56 = vadd.f32 %v2616_v28, %v2600_v25 }
 0x410   : > { %v2637_v60 = vadd.f32 %v2628_v59, %v2622_v57  ;;  %v2631_v30 = vsel %vm2629_vm9, %v6697_v41, %v2628_v59  ;;  %v2599_v49 = vadd.f32 %v2594_v29, %v2585_v31  ;;  %v6861_v29 = vmul.f32 0.046875, %v5977_v36 }
 0x411   : > { %v6875_v31 = vmul.f32 0.015625, %v5981_v37 }
 0x412   : > { %v2652_v61 = vadd.f32 %v6708_v53, %v2637_v60  ;;  %v2636_v60 = vadd.f32 %v2631_v30, %v2621_v56  ;;  %v2620_v35 = vadd.f32 %v2615_v32, %v2599_v49  ;;  %v6872_v30 = vmul.f32 0.015625, %v5985_v39 }
 0x413   : > { %v6713_v62 = vpop.permute.xlu0 %2702  ;;  %v6715_v63 = vpop.permute.xlu1 %2657  ;;  %v6882_v32 = vmul.f32 0.015625, %v5977_v36  ;;  %v4512_v49 = vmul.f32 0.140625, %v5985_v39 }
 0x414   : > { %v2667_v0 = vadd.f32 %v6715_v63, %v2652_v61  ;;  %v2635_v59 = vadd.f32 %v2630_v33, %v2620_v35  ;;  %v2661_v41 = vsel %vm2659_vm6, %v6705_v45, %v6715_v63  ;;  %v6946_v33 = vld [vmem:[%s7579_s3 + $0x10] sm:$0xff]  ;;  %v6962_v35 = vld [vmem:[%s7579_s3 + $0x18] sm:$0xff] }
 0x416   : > { %v2682_v3 = vadd.f32 %v6710_v58, %v2667_v0  ;;  %v2650_v44 = vadd.f32 %v2645_v38, %v2635_v59 }
 0x417   : > { %v6718_v1 = vpop.permute.xlu0 %2757  ;;  %v6720_v2 = vpop.permute.xlu1 %2687 }
 0x418   : > { %v2697_v9 = vadd.f32 %v6720_v2, %v2682_v3  ;;  %v2651_v3 = vadd.f32 %v2646_v40, %v2636_v60  ;;  %v4511_v60 = vmul.f32 0.140625, %v5981_v37  ;;  %v6978_v40 = vld [vmem:[%s7579_s3 + $0x20] sm:$0xff] }
 0x41a   : > { %v2712_v15 = vadd.f32 %v6713_v62, %v2697_v9  ;;  %v2666_v8 = vadd.f32 %v2661_v41, %v2651_v3  ;;  %v6994_v3 = vld [vmem:[%s7579_s3 + $0x28] sm:$0xff] }
 0x41b   : > { %v6724_v5 = vpop.permute.xlu0 %2775  ;;  %v6726_v6 = vpop.permute.xlu1 %2719 }
 0x41f   : > { %v2722_v11 = vpop.permute.xlu0 %2721  ;;  %v6732_v12 = vpop.permute.xlu1 %2739 }
 0x420   : > { %v2726_v14 = vsel %vm2723_vm11, %v6726_v6, %v2722_v11 }
 0x421   : > { %v2732_v18 = vadd.f32 %v2726_v14, %v2712_v15 }
 0x423   : > { %v2742_v13 = vpop.permute.xlu0 %2741  ;;  %v2760_v19 = vpop.permute.xlu1 %2759 }
 0x424   : > { %v2746_v21 = vsel %vm2743_vm13, %v6732_v12, %v2742_v13  ;;  %v2764_v24 = vsel %vm2761_vm14, %v6718_v1, %v2760_v19 }
 0x425   : > { %v2752_v22 = vadd.f32 %v2746_v21, %v2732_v18 }
 0x427   : > { %v2770_v26 = vadd.f32 %v2764_v24, %v2752_v22  ;;  %v2654_v46 = vpop.permute.xlu0 %2653  ;;  %v2778_v47 = vpop.permute.xlu1 %2777 }
 0x428   : > { %v2782_v50 = vsel %vm2779_vm15, %v6724_v5, %v2778_v47  ;;  %v2660_v42 = vsel %vm2659_vm6, %v2654_v46, %v6705_v45 }
 0x429   : > { %v6752_v52 = vadd.f32 %v2782_v50, %v2770_v26  ;;  %v2665_v9 = vadd.f32 %v2660_v42, %v2650_v44 }
 0x42b   : > { %v2669_v57 = vpop.permute.xlu0 %2668  ;;  %3109 = vrot.lane.b32.xlu0 %v6752_v52, %s5541_s12  ;;  %2799 = vrot.lane.b32.xlu1 %v6752_v52, %s5540_s22  ;;  %v2671_v54 = vpop.permute.xlu1 %2670 }
 0x42c   : > { %v2675_v43 = vsel %vm2674_vm5, %v2669_v57, %v2671_v54  ;;  %v2676_v53 = vsel %vm2674_vm5, %v2671_v54, %v6710_v58 }
 0x42d   : > { %v2680_v15 = vadd.f32 %v2675_v43, %v2665_v9  ;;  %v2681_v16 = vadd.f32 %v2676_v53, %v2666_v8  ;;  %v7030_v53 = vld [vmem:[%s7579_s3 + $0x38] sm:$0xff] }
 0x42f   : > { %v2684_v61 = vpop.permute.xlu0 %2683  ;;  %3435 = vrot.lane.b32.xlu0 %v6752_v52, %s5551_s20  ;;  %3272 = vrot.lane.b32.xlu1 %v6752_v52, %s7612_s27  ;;  %v2686_v0 = vpop.permute.xlu1 %2685 }
 0x430   : > { %v2690_v14 = vsel %vm2689_vm8, %v2684_v61, %v2686_v0  ;;  %v2691_v63 = vsel %vm2689_vm8, %v2686_v0, %v6720_v2  ;;  %v4510_v61 = vmul.f32 0.140625, %v5977_v36  ;;  %v6918_v36 = vld [vmem:[%s7579_s3 + $0x8] sm:$0xff] }
 0x431   : > { %v2695_v18 = vadd.f32 %v2690_v14, %v2680_v15  ;;  %v2696_v13 = vadd.f32 %v2691_v63, %v2681_v16  ;;  %v7054_v14 = vld [vmem:[%s7579_s3 + $0x40] sm:$0xff] }
 0x432   : > { %v4281_v63 = vld [vmem:[%s7580_s4] sm:$0xff] }
 0x433   : > { %v2699_v4 = vpop.permute.xlu0 %2698  ;;  %3761 = vrot.lane.b32.xlu0 %v6752_v52, %s5554_s25  ;;  %3598 = vrot.lane.b32.xlu1 %v6752_v52, %s7613_s29  ;;  %v2701_v7 = vpop.permute.xlu1 %2700 }
 0x434   : > { %v2705_v45 = vsel %vm2704_vm12, %v2699_v4, %v2701_v7  ;;  %v2706_v17 = vsel %vm2704_vm12, %v2701_v7, %v6713_v62  ;;  %v7010_v7 = vld [vmem:[%s7579_s3 + $0x30] sm:$0xff] }
 0x435   : > { %v2710_v22 = vadd.f32 %v2705_v45, %v2695_v18  ;;  %v2711_v23 = vadd.f32 %v2706_v17, %v2696_v13 }
 0x437   : > { %v2716_v10 = vpop.permute.xlu0 %2715  ;;  %v2718_v11 = vpop.permute.xlu1 %2717 }
 0x438   : > { %v2724_v58 = vsel %vm2723_vm11, %v2716_v10, %v2718_v11  ;;  %v2725_v21 = vsel %vm2723_vm11, %v2718_v11, %v6726_v6  ;;  %vm7622_vm11 = vcmask 891904  }
 0x439   : > { %v2730_v25 = vadd.f32 %v2724_v58, %v2710_v22  ;;  %v2731_v26 = vadd.f32 %v2725_v21, %v2711_v23 }
 0x43b   : > { %v2736_v19 = vpop.permute.xlu0 %2735  ;;  %v2738_v20 = vpop.permute.xlu1 %2737 }
 0x43c   : > { %v2744_v24 = vsel %vm2743_vm13, %v2736_v19, %v2738_v20  ;;  %v2745_v2 = vsel %vm2743_vm13, %v2738_v20, %v6732_v12  ;;  %vm7626_vm13 = vcmask 752640  }
 0x43d   : > { %v2750_v50 = vadd.f32 %v2744_v24, %v2730_v25  ;;  %v2751_v51 = vadd.f32 %v2745_v2, %v2731_v26 }
 0x43f   : > { %v2754_v46 = vpop.permute.xlu0 %2753  ;;  %v2756_v62 = vpop.permute.xlu1 %2755 }
 0x440   : > { %v2762_v47 = vsel %vm2761_vm14, %v2754_v46, %v2756_v62  ;;  %v2763_v48 = vsel %vm2761_vm14, %v2756_v62, %v6718_v1  ;;  %v6851_v1 = vmul.f32 0.046875, %v5985_v39  ;;  %v6929_v39 = vld [vmem:[%s7579_s3] sm:$0xff]  ;;  %vm4606_vm14 = vcmask 728064  }
 0x441   : > { %v2768_v27 = vadd.f32 %v2762_v47, %v2750_v50  ;;  %v2769_v6 = vadd.f32 %v2763_v48, %v2751_v51 }
 0x443   : > { %v2772_v28 = vpop.permute.xlu0 %2771  ;;  %v2774_v55 = vpop.permute.xlu1 %2773 }
 0x444   : > { %v2780_v56 = vsel %vm2779_vm15, %v2772_v28, %v2774_v55  ;;  %v2781_v12 = vsel %vm2779_vm15, %v2774_v55, %v6724_v5  ;;  %v6854_v5 = vmul.f32 0.046875, %v5981_v37  ;;  %vm7628_vm15 = vcmask 736256  }
 0x445   : > { %v6810_v57 = vadd.f32 %v2780_v56, %v2768_v27  ;;  %v6812_v54 = vadd.f32 %v2781_v12, %v2769_v6 }
 0x447   : > { %2797 = vrot.lane.b32.xlu1 %v6812_v54, %s5540_s22  ;;  %2795 = vrot.lane.b32.xlu0 %v6810_v57, %s5540_s22 }
 0x44b   : > { %3924 = vrot.lane.b32.xlu1 %v6752_v52, %s5555_s26  ;;  %4087 = vrot.lane.b32.xlu0 %v6752_v52, %s5558_s30 }
 0x44f   : > { %3107 = vrot.lane.b32.xlu1 %v6812_v54, %s5541_s12  ;;  %3105 = vrot.lane.b32.xlu0 %v6810_v57, %s5541_s12 }
 0x453   : > { %3270 = vrot.lane.b32.xlu1 %v6812_v54, %s7612_s27  ;;  %3268 = vrot.lane.b32.xlu0 %v6810_v57, %s7612_s27 }
 0x457   : > { %3433 = vrot.lane.b32.xlu1 %v6812_v54, %s5551_s20  ;;  %3431 = vrot.lane.b32.xlu0 %v6810_v57, %s5551_s20 }
 0x45b   : > { %3596 = vrot.lane.b32.xlu1 %v6812_v54, %s7613_s29  ;;  %3594 = vrot.lane.b32.xlu0 %v6810_v57, %s7613_s29  ;;  %s5565_s29 = smov 72  }
 0x45f   : > { %3759 = vrot.lane.b32.xlu1 %v6812_v54, %s5554_s25  ;;  %3757 = vrot.lane.b32.xlu0 %v6810_v57, %s5554_s25  ;;  %s7617_s25 = smov 92  }
 0x463   : > { %3922 = vrot.lane.b32.xlu1 %v6812_v54, %s5555_s26  ;;  %3920 = vrot.lane.b32.xlu0 %v6810_v57, %s5555_s26  ;;  %s7618_s26 = smov 91  }
 0x467   : > { %4085 = vrot.lane.b32.xlu1 %v6812_v54, %s5558_s30  ;;  %4083 = vrot.lane.b32.xlu0 %v6810_v57, %s5558_s30  ;;  %s5137_s30 = sshll.u32 %s5644_s17, 7 }
 0x46b   : > { %4455 = vrot.lane.b32.xlu0 %v6851_v1, %s5540_s22  ;;  %4453 = vrot.lane.b32.xlu1 %v6854_v5, %s5540_s22 }
 0x46f   : > { %4467 = vrot.lane.b32.xlu0 %v6854_v5, %s5541_s12  ;;  %4451 = vrot.lane.b32.xlu1 %v6861_v29, %s5540_s22  ;;  %s7615_s22 = smov 110  }
 0x473   : > { %4465 = vrot.lane.b32.xlu0 %v6861_v29, %s5541_s12  ;;  %4469 = vrot.lane.b32.xlu1 %v6851_v1, %s5541_s12  ;;  %s7616_s12 = smov 109  }
 0x477   : > { %4486 = vrot.lane.b32.xlu0 %v6872_v30, %s7614_s21  ;;  %4484 = vrot.lane.b32.xlu1 %v6875_v31, %s7614_s21 }
 0x47b   : > { %4498 = vrot.lane.b32.xlu0 %v6854_v5, %s7615_s22  ;;  %4482 = vrot.lane.b32.xlu1 %v6882_v32, %s7614_s21  ;;  %s5562_s21 = smov 89  }
 0x47f   : > { %4496 = vrot.lane.b32.xlu0 %v6861_v29, %s7615_s22  ;;  %4500 = vrot.lane.b32.xlu1 %v6851_v1, %s7615_s22 }
 0x483   : > { %4520 = vrot.lane.b32.xlu0 %v4512_v49, %s7616_s12  ;;  %4518 = vrot.lane.b32.xlu1 %v4511_v60, %s7616_s12 }
 0x487   : > { %4532 = vrot.lane.b32.xlu0 %v4511_v60, %s7612_s27  ;;  %4516 = vrot.lane.b32.xlu1 %v4510_v61, %s7616_s12  ;;  %s5566_s12 = smov 71  }
 0x48b   : > { %4530 = vrot.lane.b32.xlu0 %v4510_v61, %s7612_s27  ;;  %4534 = vrot.lane.b32.xlu1 %v4512_v49, %s7612_s27  ;;  %s5567_s27 = smov [#allocation2]  }
 0x48c   : > { %s5481_s17 = sshll.u32 %s5567_s27, 4  ;;  %s5482_s17 = int_to_ptr.vmem [resolvable:$false] %s5481_s17 }
 0x48d   : > { %s5483_s28 = scalar_lea.vmem %s5482_s17, 256 }
 0x48f   : > { %4548 = vrot.lane.b32.xlu0 %v6851_v1, %s5551_s20  ;;  %4546 = vrot.lane.b32.xlu1 %v6854_v5, %s5551_s20 }
 0x493   : > { %4560 = vrot.lane.b32.xlu0 %v6854_v5, %s7617_s25  ;;  %4544 = vrot.lane.b32.xlu1 %v6861_v29, %s5551_s20  ;;  %s7619_s20 = smov 90  }
 0x497   : > { %4558 = vrot.lane.b32.xlu0 %v6861_v29, %s7617_s25  ;;  %4562 = vrot.lane.b32.xlu1 %v6851_v1, %s7617_s25  ;;  %s5563_s25 = smov 74  }
 0x49b   : > { %4576 = vrot.lane.b32.xlu0 %v4512_v49, %s7618_s26  ;;  %4574 = vrot.lane.b32.xlu1 %v4511_v60, %s7618_s26 }
 0x49d   : > { %v2800_v37 = vpop.permute.xlu1 %2799  ;;  %v6936_v0 = vpop.permute.xlu0 %3109 }
 0x49e   : > { %5339 = vmatpush3.msk.msra.mxu1 %vm618_vm1, %v2800_v37 }
 0x49f   : > { %5341 = vmatmul.mubr.msk.f32.vlgmr.msra.gmra.mxu1 %vm614_vm2, %v6918_v36  ;;  %5343 = vmatprep.subr.mxu1 %v5539_v34 }
 0x4a0   : > { %4588 = vrot.lane.b32.xlu0 %v4511_v60, %s7619_s20  ;;  %4572 = vrot.lane.b32.xlu1 %v4510_v61, %s7618_s26 }
 0x4a1   : > { %5344 = vmatpush3.msk.msra.mxu1 %vm618_vm1, %v6752_v52  ;;  %5345 = vmatprep.mubr.msk.f32.mxu1 %vm5549_vm3, %v5539_v34  ;;  %v6952_v52 = vpop.permute.xlu1 %3272  ;;  %v6968_v38 = vpop.permute.xlu0 %3435 }
 0x4a2   : > { %5348 = vmatprep.subr.mxu1 %v5539_v34 }
 0x4a3   : > { %5346 = vmatmul.mubr.msk.f32.vlgmr.msra.gmra.mxu1 %vm614_vm2, %v6929_v39 }
 0x4a4   : > { %5349 = vmatpush3.msk.msra.mxu1 %vm618_vm1, %v6936_v0  ;;  %4586 = vrot.lane.b32.xlu0 %v4510_v61, %s7619_s20 }
 0x4a5   : > { %4590 = vrot.lane.b32.xlu1 %v4512_v49, %s7619_s20  ;;  %5350 = vmatprep.mubr.msk.f32.mxu1 %vm5549_vm3, %v5539_v34  ;;  %v6984_v59 = vpop.permute.xlu1 %3598  ;;  %v7000_v4 = vpop.permute.xlu0 %3761  ;;  %s350_s20 = sand.u32 1, %s5529_s14  }
 0x4a6   : > { %5353 = vmatprep.subr.mxu1 %v5539_v34 }
 0x4a7   : > { %5351 = vmatmul.mubr.msk.f32.vlgmr.msra.gmra.mxu1 %vm614_vm2, %v6946_v33 }
 0x4a8   : > { %5354 = vmatpush3.msk.msra.mxu1 %vm618_vm1, %v6952_v52  ;;  %4604 = vrot.lane.b32.xlu0 %v6851_v1, %s5562_s21 }
 0x4a9   : > { %4602 = vrot.lane.b32.xlu1 %v6854_v5, %s5562_s21  ;;  %5355 = vmatprep.mubr.msk.f32.mxu1 %vm5549_vm3, %v5539_v34 }
 0x4aa   : > { %5358 = vmatprep.subr.mxu1 %v5539_v34 }
 0x4ab   : > { %5356 = vmatmul.mubr.msk.f32.vlgmr.msra.gmra.mxu1 %vm614_vm2, %v6962_v35 }
 0x4ac   : > { %5359 = vmatpush3.msk.msra.mxu1 %vm618_vm1, %v6968_v38  ;;  %4617 = vrot.lane.b32.xlu0 %v6875_v31, %s5563_s25 }
 0x4ad   : > { %4600 = vrot.lane.b32.xlu1 %v6861_v29, %s5562_s21  ;;  %5360 = vmatprep.mubr.msk.f32.mxu1 %vm5549_vm3, %v5539_v34 }
 0x4ae   : > { %5363 = vmatprep.subr.mxu1 %v5539_v34 }
 0x4af   : > { %5361 = vmatmul.mubr.msk.f32.vlgmr.msra.gmra.mxu1 %vm614_vm2, %v6978_v40 }
 0x4b0   : > { %5364 = vmatpush3.msk.msra.mxu1 %vm618_vm1, %v6984_v59  ;;  %4615 = vrot.lane.b32.xlu0 %v6882_v32, %s5563_s25 }
 0x4b1   : > { %4619 = vrot.lane.b32.xlu1 %v6872_v30, %s5563_s25  ;;  %5365 = vmatprep.mubr.msk.f32.mxu1 %vm5549_vm3, %v5539_v34  ;;  %s4939_s25 = scalar_lea.sflag [#allocation3], %s350_s20 }
 0x4b2   : > { %5368 = vmatprep.subr.mxu1 %v5539_v34 }
 0x4b3   : > { %5366 = vmatmul.mubr.msk.f32.vlgmr.msra.gmra.mxu1 %vm614_vm2, %v6994_v3 }
 0x4b4   : > { %5369 = vmatpush3.msk.msra.mxu1 %vm618_vm1, %v7000_v4  ;;  %4634 = vrot.lane.b32.xlu0 %v6851_v1, %s5564_s18 }
 0x4b5   : > { %4632 = vrot.lane.b32.xlu1 %v6854_v5, %s5564_s18  ;;  %5370 = vmatprep.mubr.msk.f32.mxu1 %vm5549_vm3, %v5539_v34 }
 0x4b6   : > { %5373 = vmatprep.subr.mxu1 %v5539_v34 }
 0x4b7   : > { %5371 = vmatmul.mubr.msk.f32.vlgmr.msra.gmra.mxu1 %vm614_vm2, %v7010_v7 }
 0x4b8   : > { %4647 = vrot.lane.b32.xlu0 %v6854_v5, %s5565_s29  ;;  %5375 = vmatprep.mubr.msk.f32.mxu1 %vm5549_vm3, %v5539_v34 }
 0x4b9   : > { %4630 = vrot.lane.b32.xlu1 %v6861_v29, %s5564_s18  ;;  %v2796_v41 = vpop.permute.xlu0 %2795  ;;  %v2798_v42 = vpop.permute.xlu1 %2797  ;;  %s5015_s18 = sshll.u32 %s350_s20, 3 }
 0x4ba   : > { %v2801_v44 = vsel %vm611_vm0, %v2796_v41, %v2798_v42  ;;  %v2802_v43 = vsel %vm611_vm0, %v2798_v42, %v2800_v37  ;;  %s352_s11 = scalar_lea.vmem [#allocation2], %s5015_s18 }
 0x4bb   : > { %5078 = vmatprep.subr.msk.mxu0 %vm618_vm1, %v2802_v43 }
 0x4bc   : > { %4645 = vrot.lane.b32.xlu0 %v6861_v29, %s5565_s29  ;;  %5079 = vmatpush1.msk.msra.mxu0 %vm618_vm1, %v2801_v44 }
 0x4bd   : > { %4649 = vrot.lane.b32.xlu1 %v6851_v1, %s5565_s29  ;;  %v7033_v8 = vpop.permute.xlu0 %4087  ;;  %5080 = vmatmul.mubr.msk.f32.vlgmr.msra.gmra.mxu0 %vm614_vm2, %v6918_v36  ;;  %v7037_v9 = vpop.permute.xlu1 %3924  ;;  %s4952_s29 = sshll.u32 %s352_s11, 4  ;;  %s4953_s29 = int_to_ptr.vmem [resolvable:$true] %s4952_s29 }
 0x4be   : > { %5083 = vmatprep.subr.msk.mxu0 %vm618_vm1, %v6812_v54  ;;  %5374 = vmatpush3.msk.msra.mxu1 %vm618_vm1, %v7037_v9  ;;  %s5477_s26 = scalar_lea.vmem %s4953_s29, 128  ;;  %p5484_p0 = scmp.lt.s32.totalorder %s4953_s29, %s5482_s17 }
 0x4bf   : > { %5084 = vmatpush1.msk.msra.mxu0 %vm618_vm1, %v6810_v57  ;;  %5376 = vmatmul.mubr.msk.f32.vlgmr.msra.gmra.mxu1 %vm614_vm2, %v7030_v53  ;;  %p5478_p11 = scmp.ne.s32.totalorder %s4953_s29, %s5477_s26  ;;  %p5485_p1 = scmp.lt.s32.totalorder %s5483_s28, %s5477_s26 }
 0x4c0   : > { %5378 = vmatprep.subr.mxu1 %v5539_v34  ;;  %4664 = vrot.lane.b32.xlu0 %v6872_v30, %s5566_s12 }
 0x4c1   : > { %4662 = vrot.lane.b32.xlu1 %v6875_v31, %s5566_s12  ;;  %3026 = vmatprep.mubr.f32.mxu0 %v5539_v34  ;;  %v3106_v10 = vpop.permute.xlu0 %3105  ;;  %v3108_v11 = vpop.permute.xlu1 %3107  ;;  %p5479_p12 = pnand %p5478_p11, %p5661_p5  ;;  %p5486_p2 = por %p5485_p1, %p5484_p0 }
 0x4c2   : > { %5379 = vmatpush3.msk.msra.mxu1 %vm618_vm1, %v7033_v8  ;;  %5085 = vmatmul.mubr.msk.f32.vlgmr.msra.gmra.mxu0 %vm614_vm2, %v6929_v39  ;;  %v3111_v15 = vsel %vm924_vm4, %v3106_v10, %v3108_v11  ;;  %v3112_v16 = vsel %vm924_vm4, %v3108_v11, %v6936_v0 }
 0x4c3   : > { %5380 = vmatprep.mubr.msk.f32.mxu1 %vm5549_vm3, %v5539_v34  ;;  %5089 = vmatprep.subr.msk.mxu0 %vm618_vm1, %v3112_v16  ;;  %p5480_p13 = pneg %p5479_p12 }
 0x4c4   : > { %5381 = vmatmul.mubr.msk.f32.vlgmr.msra.gmra.mxu1 %vm614_vm2, %v7054_v14  ;;  %4284 = vperm.xlu0 %5475, %v4281_v63  }
 0x4c5   : > { %4660 = vrot.lane.b32.xlu1 %v6882_v32, %s5566_s12  ;;  %5090 = vmatpush1.msk.msra.mxu0 %vm618_vm1, %v3111_v15  ;;  %v3269_v45 = vpop.permute.xlu0 %3268  ;;  %v3271_v17 = vpop.permute.xlu1 %3270  ;;  %s4950_s12 = scalar_lea.hbm %s7586_s10, %s5137_s30  ;;  %p5487_p3 = pnand %p5486_p2, %p5480_p13 }
 0x4c6   : > { %3186 = vmatprep.mubr.f32.mxu0 %v5539_v34  ;;  %v3274_v18 = vsel %vm1416_vm7, %v3269_v45, %v3271_v17  ;;  %v3275_v13 = vsel %vm1416_vm7, %v3271_v17, %v6952_v52  ;;  %5383 = vmatprep.subr.mxu1 %v5539_v34  ;;  %v4278_v45 = vld [vmem:[%s7584_s8 + $0x110] sm:$0xff] }
 0x4c7   : > { %5091 = vmatmul.mubr.msk.f32.vlgmr.msra.gmra.mxu0 %vm614_vm2, %v6946_v33  ;;  %5095 = vmatprep.subr.msk.mxu0 %vm618_vm1, %v3275_v13  ;;  %v4277_v13 = vld [vmem:[%s7584_s8 + $0x108] sm:$0xff] }
 0x4c8   : > { %5096 = vmatpush1.msk.msra.mxu0 %vm618_vm1, %v3274_v18  ;;  %3349 = vmatprep.mubr.f32.mxu0 %v5539_v34 }
 0x4c9   : > { %v3432_v19 = vpop.permute.xlu0 %3431  ;;  %v3434_v20 = vpop.permute.xlu1 %3433  ;;  %5393 = vmatprep.mubr.msk.f32.mxu1 %vm5549_vm3, %v5539_v34 }
 0x4ca   : > { %v3437_v58 = vsel %vm2614_vm10, %v3432_v19, %v3434_v20  ;;  %v3438_v21 = vsel %vm2614_vm10, %v3434_v20, %v6968_v38  ;;  %v4275_v19 = vld [vmem:[%s7584_s8 + $0xf8] sm:$0xff] }
 0x4cb   : > { %5097 = vmatmul.mubr.msk.f32.vlgmr.msra.gmra.mxu0 %vm614_vm2, %v6962_v35  ;;  %5101 = vmatprep.subr.msk.mxu0 %vm618_vm1, %v3438_v21  ;;  %v4259_v20 = vld [vmem:[%s7584_s8 + $0x78] sm:$0xff]  ;;  %v4274_v21 = vld [vmem:[%s7584_s8 + $0xf0] sm:$0xff] }
 0x4cc   : > { %5102 = vmatpush1.msk.msra.mxu0 %vm618_vm1, %v3437_v58  ;;  %3512 = vmatprep.mubr.f32.mxu0 %v5539_v34  ;;  %v4276_v58 = vld [vmem:[%s7584_s8 + $0x100] sm:$0xff] }
 0x4cd   : > { %v3595_v22 = vpop.permute.xlu0 %3594  ;;  %v3597_v23 = vpop.permute.xlu1 %3596 }
 0x4ce   : > { %v3600_v24 = vsel %vm2629_vm9, %v3595_v22, %v3597_v23  ;;  %v3601_v2 = vsel %vm2629_vm9, %v3597_v23, %v6984_v59  ;;  %vm4291_vm9 = vcmask 1046528   ;;  %v4706_v22 = vld [vmem:[%s7585_s9 + $0xf8] sm:$0xff]  ;;  %v4258_v23 = vld [vmem:[%s7584_s8 + $0x70] sm:$0xff] }
 0x4cf   : > { %5103 = vmatmul.mubr.msk.f32.vlgmr.msra.gmra.mxu0 %vm614_vm2, %v6978_v40  ;;  %5107 = vmatprep.subr.msk.mxu0 %vm618_vm1, %v3601_v2  ;;  %v4257_v2 = vld [vmem:[%s7584_s8 + $0x68] sm:$0xff] }
 0x4d0   : > { %5108 = vmatpush1.msk.msra.mxu0 %vm618_vm1, %v3600_v24  ;;  %3675 = vmatprep.mubr.f32.mxu0 %v5539_v34  ;;  %v4273_v24 = vld [vmem:[%s7584_s8 + $0xe8] sm:$0xff] }
 0x4d1   : > { %v3758_v25 = vpop.permute.xlu0 %3757  ;;  %v3760_v26 = vpop.permute.xlu1 %3759 }
 0x4d2   : > { %v3763_v46 = vsel %vm2659_vm6, %v3758_v25, %v3760_v26  ;;  %v3764_v62 = vsel %vm2659_vm6, %v3760_v26, %v7000_v4  ;;  %vm7621_vm6 = vcmask 900096   ;;  %v4272_v25 = vld [vmem:[%s7584_s8 + $0xe0] sm:$0xff] }
 0x4d3   : > { %5109 = vmatmul.mubr.msk.f32.vlgmr.msra.gmra.mxu0 %vm614_vm2, %v6994_v3  ;;  %5113 = vmatprep.subr.msk.mxu0 %vm618_vm1, %v3764_v62  ;;  %v4256_v26 = vld [vmem:[%s7584_s8 + $0x60] sm:$0xff]  ;;  %v4255_v62 = vld [vmem:[%s7584_s8 + $0x58] sm:$0xff] }
 0x4d4   : > { %5114 = vmatpush1.msk.msra.mxu0 %vm618_vm1, %v3763_v46  ;;  %3838 = vmatprep.mubr.f32.mxu0 %v5539_v34  ;;  %v4271_v46 = vld [vmem:[%s7584_s8 + $0xd8] sm:$0xff] }
 0x4d5   : > { %v3921_v47 = vpop.permute.xlu0 %3920  ;;  %v3923_v48 = vpop.permute.xlu1 %3922 }
 0x4d6   : > { %v3926_v50 = vsel %vm2674_vm5, %v3921_v47, %v3923_v48  ;;  %v3927_v51 = vsel %vm2674_vm5, %v3923_v48, %v7037_v9  ;;  %vm7620_vm5 = vcmask 1022976   ;;  %v4270_v47 = vld [vmem:[%s7584_s8 + $0xd0] sm:$0xff] }
 0x4d7   : > { %5115 = vmatmul.mubr.msk.f32.vlgmr.msra.gmra.mxu0 %vm614_vm2, %v7010_v7  ;;  %5119 = vmatprep.subr.msk.mxu0 %vm618_vm1, %v3927_v51  ;;  %v4254_v48 = vld [vmem:[%s7584_s8 + $0x50] sm:$0xff]  ;;  %v4253_v51 = vld [vmem:[%s7584_s8 + $0x48] sm:$0xff]  ;;  %vm7623_vm12 = vmmov %vm7620_vm5 }
 0x4d8   : > { %5120 = vmatpush1.msk.msra.mxu0 %vm618_vm1, %v3926_v50  ;;  %4001 = vmatprep.mubr.f32.mxu0 %v5539_v34  ;;  %v4269_v50 = vld [vmem:[%s7584_s8 + $0xc8] sm:$0xff] }
 0x4d9   : > { %v4084_v27 = vpop.permute.xlu0 %4083  ;;  %v4086_v6 = vpop.permute.xlu1 %4085 }
 0x4da   : > { %v4089_v28 = vsel %vm2689_vm8, %v4084_v27, %v4086_v6  ;;  %v4090_v55 = vsel %vm2689_vm8, %v4086_v6, %v7033_v8  ;;  %v4268_v27 = vld [vmem:[%s7584_s8 + $0xc0] sm:$0xff]  ;;  %vm4621_vm8 = vcmask 605184  }
 0x4db   : > { %5121 = vmatmul.mubr.msk.f32.vlgmr.msra.gmra.mxu0 %vm614_vm2, %v7030_v53  ;;  %5125 = vmatprep.subr.msk.mxu0 %vm618_vm1, %v4090_v55  ;;  %v4280_v53 = vld [vmem:[%s7584_s8 + $0x120] sm:$0x7f]  ;;  %v4251_v55 = vld [vmem:[%s7584_s8 + $0x38] sm:$0xff] }
 0x4dc   : > { %5126 = vmatpush1.msk.msra.mxu0 %vm618_vm1, %v4089_v28  ;;  %4164 = vmatprep.mubr.f32.mxu0 %v5539_v34  ;;  %v4252_v6 = vld [vmem:[%s7584_s8 + $0x40] sm:$0xff]  ;;  %v4267_v28 = vld [vmem:[%s7584_s8 + $0xb8] sm:$0xff] }
 0x4dd   : > { %v7125_v56 = vpop.permute.xlu0 %4455  ;;  %v7127_v12 = vpop.permute.xlu1 %4453  ;;  %5384 = vmatpush3.msk.msra.mxu1 %vm4291_vm9, %v4280_v53  ;;  %5212 = vmatprep.subr.mxu0 %v4275_v19  ;;  %vm4666_vm9 = vcmask 580608  }
 0x4de   : > { %v4464_v5 = vadd.f32 %v7125_v56, %v6872_v30  ;;  %5385 = vmatprep.subr.mxu1 %v5539_v34 }
 0x4df   : > { %5127 = vmatmul.mubr.msk.f32.vlgmr.msra.gmra.mxu0 %vm614_vm2, %v7054_v14  ;;  %v4279_v14 = vld [vmem:[%s7584_s8 + $0x118] sm:$0xff] }
 0x4e0   : > { %5386 = vmatpush3.msra.mxu1 %v4279_v14  ;;  %5213 = vmatpush3.msra.mxu0 %v4259_v20 }
 0x4e1   : > { %v7131_v57 = vpop.permute.xlu0 %4467  ;;  %v4452_v54 = vpop.permute.xlu1 %4451  ;;  %5387 = vmatprep.subr.mxu1 %v5539_v34  ;;  %5214 = vmatprep.subr.mxu0 %v4274_v21 }
 0x4e2   : > { %v4457_v1 = vsel %vm611_vm0, %v4452_v54, %v7127_v12  ;;  %5388 = vmatpush3.msra.mxu1 %v4278_v45  ;;  %5215 = vmatpush3.msra.mxu0 %v4258_v23  ;;  %v4266_v54 = vld [vmem:[%s7584_s8 + $0xb0] sm:$0xff] }
 0x4e3   : > { %v4462_v29 = vadd.f32 %v4457_v1, %v6882_v32  ;;  %5389 = vmatprep.subr.mxu1 %v5539_v34  ;;  %5216 = vmatprep.subr.mxu0 %v4273_v24  ;;  %v4250_v1 = vld [vmem:[%s7584_s8 + $0x30] sm:$0xff]  ;;  %v4458_v24 = vsel %vm611_vm0, %v7127_v12, %v7125_v56  ;;  %vm7624_vm0 = vmmov %vm7621_vm6 }
 0x4e4   : > { %5390 = vmatpush3.msra.mxu1 %v4277_v13  ;;  %5217 = vmatpush3.msra.mxu0 %v4257_v2 }
 0x4e5   : > { %v4466_v49 = vpop.permute.xlu0 %4465  ;;  %v7138_v60 = vpop.permute.xlu1 %4469  ;;  %5391 = vmatprep.subr.mxu1 %v5539_v34  ;;  %5218 = vmatprep.subr.mxu0 %v4272_v25 }
 0x4e6   : > { %v4471_v61 = vsel %vm924_vm4, %v4466_v49, %v7131_v57  ;;  %v4478_v36 = vadd.f32 %v7138_v60, %v4464_v5  ;;  %5392 = vmatpush3.msra.mxu1 %v4276_v58  ;;  %5219 = vmatpush3.msra.mxu0 %v4256_v26  ;;  %v4265_v5 = vld [vmem:[%s7584_s8 + $0xa8] sm:$0xff]  ;;  %v4264_v49 = vld [vmem:[%s7584_s8 + $0xa0] sm:$0xff] }
 0x4e7   : > { %v4476_v37 = vadd.f32 %v4471_v61, %v4462_v29  ;;  %5253 = vmatprep.subr.mxu1 %v4706_v22  ;;  %5220 = vmatprep.subr.mxu0 %v4271_v46  ;;  %v4249_v29 = vld [vmem:[%s7584_s8 + $0x28] sm:$0xff]  ;;  %v4248_v61 = vld [vmem:[%s7584_s8 + $0x20] sm:$0xff]  ;;  %v4472_v46 = vsel %vm924_vm4, %v7131_v57, %v7138_v60  ;;  %vm7625_vm4 = vmmov %vm7622_vm11 }
 0x4e8   : > { %5221 = vmatpush3.msra.mxu0 %v4255_v62 }
 0x4e9   : > { %v7143_v39 = vpop.permute.xlu0 %4486  ;;  %v7145_v0 = vpop.permute.xlu1 %4484  ;;  %5222 = vmatprep.subr.mxu0 %v4270_v47  ;;  %v4463_v47 = vadd.f32 %v4458_v24, %v6875_v31 }
 0x4ea   : > { %v4495_v33 = vadd.f32 %v7143_v39, %v4478_v36  ;;  %5223 = vmatpush3.msra.mxu0 %v4254_v48  ;;  %v4263_v36 = vld [vmem:[%s7584_s8 + $0x98] sm:$0xff]  ;;  %v4489_v48 = vsel %vm7623_vm12, %v7145_v0, %v7143_v39  ;;  %vm7629_vm12 = vmmov %vm7626_vm13 }
 0x4eb   : > { %5224 = vmatprep.subr.mxu0 %v4269_v50 }
 0x4ec   : > { %5225 = vmatpush3.msra.mxu0 %v4253_v51  ;;  %v4477_v51 = vadd.f32 %v4472_v46, %v4463_v47 }
 0x4ed   : > { %v7148_v52 = vpop.permute.xlu0 %4498  ;;  %v4483_v30 = vpop.permute.xlu1 %4482  ;;  %5226 = vmatprep.subr.mxu0 %v4268_v27 }
 0x4ee   : > { %v4488_v32 = vsel %vm7620_vm5, %v4483_v30, %v7145_v0  ;;  %5227 = vmatpush3.msra.mxu0 %v4252_v6  ;;  %v4246_v30 = vld [vmem:[%s7584_s8 + $0x10] sm:$0xff]  ;;  %v4494_v27 = vadd.f32 %v4489_v48, %v4477_v51  ;;  %vm4636_vm5 = vcmask 596992  }
 0x4ef   : > { %v4493_v35 = vadd.f32 %v4488_v32, %v4476_v37  ;;  %5228 = vmatprep.subr.mxu0 %v4267_v28  ;;  %v4247_v37 = vld [vmem:[%s7584_s8 + $0x18] sm:$0xff]  ;;  %v4261_v32 = vld [vmem:[%s7584_s8 + $0x88] sm:$0xff] }
 0x4f0   : > { %5229 = vmatpush3.msra.mxu0 %v4251_v55 }
 0x4f1   : > { %v4497_v38 = vpop.permute.xlu0 %4496  ;;  %v7152_v40 = vpop.permute.xlu1 %4500  ;;  %5230 = vmatprep.subr.mxu0 %v4266_v54 }
 0x4f2   : > { %v4502_v59 = vsel %vm7621_vm6, %v4497_v38, %v7148_v52  ;;  %v4509_v3 = vadd.f32 %v7152_v40, %v4495_v33  ;;  %5231 = vmatpush3.msra.mxu0 %v4250_v1  ;;  %v4262_v33 = vld [vmem:[%s7584_s8 + $0x90] sm:$0xff]  ;;  %v4260_v38 = vld [vmem:[%s7584_s8 + $0x80] sm:$0xff]  ;;  %v4503_v56 = vsel %vm7624_vm0, %v7148_v52, %v7152_v40  ;;  %vm4651_vm6 = vcmask 588800   ;;  %vm7631_vm0 = vmmov %vm7628_vm15 }
 0x4f3   : > { %v4507_v4 = vadd.f32 %v4502_v59, %v4493_v35  ;;  %5232 = vmatprep.subr.mxu0 %v4265_v5  ;;  %v4245_v35 = vld [vmem:[%s7584_s8 + $0x8] sm:$0xff]  ;;  %v4244_v59 = vld [vmem:[%s7584_s8] sm:$0xff]  ;;  %v4508_v60 = vadd.f32 %v4503_v56, %v4494_v27 }
 0x4f4   : > { %5233 = vmatpush3.msra.mxu0 %v4249_v29 }
 0x4f5   : > { %v7157_v7 = vpop.permute.xlu0 %4520  ;;  %v7159_v41 = vpop.permute.xlu1 %4518  ;;  %5234 = vmatprep.subr.mxu0 %v4264_v49 }
 0x4f6   : > { %v4529_v42 = vadd.f32 %v7157_v7, %v4509_v3  ;;  %5235 = vmatpush3.msra.mxu0 %v4248_v61  ;;  %v4523_v31 = vsel %vm7625_vm4, %v7159_v41, %v7157_v7  ;;  %vm4713_vm4 = vcmask 1042432  }
 0x4f7   : > { %5236 = vmatprep.subr.mxu0 %v4263_v36  ;;  %v4528_v55 = vadd.f32 %v4523_v31, %v4508_v60 }
 0x4f8   : > { %5237 = vmatpush3.msra.mxu0 %v4247_v37 }
 0x4f9   : > { %v7162_v44 = vpop.permute.xlu0 %4532  ;;  %v4517_v43 = vpop.permute.xlu1 %4516  ;;  %5238 = vmatprep.subr.mxu0 %v4262_v33 }
 0x4fa   : > { %v4522_v8 = vsel %vm7622_vm11, %v4517_v43, %v7159_v41  ;;  %5239 = vmatpush3.msra.mxu0 %v4246_v30  ;;  %vm4287_vm11 = vcmask 318464  }
 0x4fb   : > { %v4527_v9 = vadd.f32 %v4522_v8, %v4507_v4  ;;  %5240 = vmatprep.subr.mxu0 %v4261_v32 }
 0x4fc   : > { %5241 = vmatpush3.msra.mxu0 %v4245_v35 }
 0x4fd   : > { %v4531_v10 = vpop.permute.xlu0 %4530  ;;  %v7170_v11 = vpop.permute.xlu1 %4534  ;;  %5242 = vmatprep.subr.mxu0 %v4260_v38 }
 0x4fe   : > { %v4536_v63 = vsel %vm1416_vm7, %v4531_v10, %v7162_v44  ;;  %v4543_v15 = vadd.f32 %v7170_v11, %v4529_v42  ;;  %5243 = vmatpush3.msra.mxu0 %v4244_v59  ;;  %v4537_v39 = vsel %vm1416_vm7, %v7162_v44, %v7170_v11  ;;  %vm7627_vm7 = vcmask 744448  }
 0x4ff   : > { %v7178_v16 = vadd.f32 %v4536_v63, %v4527_v9  ;;  %5396 = vmatprep.subr.mxu0 %v5539_v34  ;;  %v4542_v54 = vadd.f32 %v4537_v39, %v4528_v55 }
 0x501   : > { %v7184_v17 = vpop.permute.xlu0 %4548  ;;  %v7297_v3 = vpop.permute.xlu1 %4546 }
 0x502   : > { %v7187_v18 = vadd.f32 %v7184_v17, %v4543_v15  ;;  %v4551_v52 = vsel %vm2614_vm10, %v7297_v3, %v7184_v17 }
 0x503   : > { %v4556_v29 = vadd.f32 %v4551_v52, %v4542_v54 }
 0x505   : > { %v7299_v4 = vpop.permute.xlu0 %4560  ;;  %v7301_v42 = vpop.permute.xlu1 %4544 }
 0x509   : > { %v7303_v43 = vpop.permute.xlu0 %4558  ;;  %v7305_v53 = vpop.permute.xlu1 %4562 }
 0x50a   : > { %v4565_v7 = vsel %vm7626_vm13, %v7299_v4, %v7305_v53  ;;  %vm4709_vm13 = vcmask 89088  }
 0x50b   : > { %v4570_v61 = vadd.f32 %v4565_v7, %v4556_v29 }
 0x50d   : > { %v7307_v8 = vpop.permute.xlu0 %4576  ;;  %v7309_v9 = vpop.permute.xlu1 %4574 }
 0x50e   : > { %v4579_v44 = vsel %vm7627_vm7, %v7309_v9, %v7307_v8 }
 0x50f   : > { %v4584_v33 = vadd.f32 %v4579_v44, %v4570_v61  ;;  %v4689_v44 = vld [vmem:[%s7585_s9 + $0x70] sm:$0xff]  ;;  %v4688_v61 = vld [vmem:[%s7585_s9 + $0x68] sm:$0xff] }
 0x512   : > { %v7311_v10 = vpop.permute.xlu0 %4588  ;;  %v7313_v14 = vpop.permute.xlu1 %4572 }
 0x516   : > { %v7315_v63 = vpop.permute.xlu0 %4586 }
 0x517   : > { %v7317_v15 = vpop.permute.xlu1 %4590 }
 0x518   : > { %v4593_v17 = vsel %vm7628_vm15, %v7311_v10, %v7317_v15 }
 0x519   : > { %v4598_v59 = vadd.f32 %v4593_v17, %v4584_v33  ;;  %v4703_v17 = vld [vmem:[%s7585_s9 + $0xe0] sm:$0xff]  ;;  %v4702_v33 = vld [vmem:[%s7585_s9 + $0xd8] sm:$0xff] }
 0x51a   : > { %v7319_v45 = vpop.permute.xlu0 %4604 }
 0x51b   : > { %v7321_v13 = vpop.permute.xlu1 %4602 }
 0x51c   : > { %v4608_v35 = vsel %vm4606_vm14, %v7321_v13, %v7319_v45 }
 0x51e   : > { %v7323_v58 = vpop.permute.xlu0 %4617 }
 0x51f   : > { %v7325_v21 = vpop.permute.xlu1 %4600 }
 0x522   : > { %v7330_v25 = vpop.permute.xlu0 %4615 }
 0x523   : > { %v7332_v26 = vpop.permute.xlu1 %4619 }
 0x526   : > { %v7344_v6 = vpop.permute.xlu0 %4634 }
 0x527   : > { %v7346_v28 = vpop.permute.xlu1 %4632 }
 0x528   : > { %v4638_v24 = vsel %vm4636_vm5, %v7346_v28, %v7344_v6 }
 0x52a   : > { %v7357_v1 = vpop.permute.xlu0 %4647 }
 0x52b   : > { %v7359_v5 = vpop.permute.xlu1 %4630 }
 0x52e   : > { %v7370_v30 = vpop.permute.xlu0 %4645 }
 0x52f   : > { %v7372_v32 = vpop.permute.xlu1 %4649 }
 0x530   : > { %v4653_v51 = vsel %vm4651_vm6, %v7357_v1, %v7372_v32 }
 0x532   : > { %v7385_v48 = vpop.permute.xlu0 %4664 }
 0x55f   : > { %v2949_v19 = vpop.f32.mrf.mxu1 }
 0x561   : > { %v5342_v20 = vpop.f32.mrf.mxu1 }
 0x563   : > { %v3099_v22 = vpop.f32.mrf.mxu1 }
 0x564   : > { %v3100_v11 = vadd.f32 %v3099_v22, %v2949_v19  ;;  %v4623_v19 = vsel %vm4621_vm8, %v7323_v58, %v7332_v26 }
 0x565   : > { %v5347_v23 = vpop.f32.mrf.mxu1 }
 0x566   : > { %v4613_v23 = vadd.f32 %v4608_v35, %v4598_v59  ;;  %v4701_v59 = vld [vmem:[%s7585_s9 + $0xd0] sm:$0xff] }
 0x567   : > { %v3259_v2 = vpop.f32.mrf.mxu1 }
 0x568   : > { %v3265_v36 = vadd.f32 %v3259_v2, %v3100_v11  ;;  %v4628_v47 = vadd.f32 %v4623_v19, %v4613_v23  ;;  %v4704_v11 = vld [vmem:[%s7585_s9 + $0xe8] sm:$0xff] }
 0x569   : > { %v5352_v62 = vpop.f32.mrf.mxu1  ;;  %v4700_v23 = vld [vmem:[%s7585_s9 + $0xc8] sm:$0xff] }
 0x56a   : > { %v4643_v27 = vadd.f32 %v4638_v24, %v4628_v47  ;;  %v4699_v47 = vld [vmem:[%s7585_s9 + $0xc0] sm:$0xff] }
 0x56b   : > { %v3422_v50 = vpop.f32.mrf.mxu1 }
 0x56c   : > { %v3428_v38 = vadd.f32 %v3422_v50, %v3265_v36  ;;  %v7387_v50 = vpop.permute.xlu1 %4662  ;;  %v4658_v39 = vadd.f32 %v4653_v51, %v4643_v27 }
 0x56d   : > { %v5357_v12 = vpop.f32.mrf.mxu1 }
 0x56f   : > { %v3585_v57 = vpop.f32.mrf.mxu1 }
 0x570   : > { %v3591_v20 = vadd.f32 %v3585_v57, %v3428_v38  ;;  %v4668_v57 = vsel %vm4666_vm9, %v7387_v50, %v7385_v48  ;;  %v4686_v38 = vld [vmem:[%s7585_s9 + $0x58] sm:$0xff] }
 0x571   : > { %v5362_v0 = vpop.f32.mrf.mxu1  ;;  %v4673_v54 = vadd.f32 %v4668_v57, %v4658_v39  ;;  %v4682_v39 = vld [vmem:[%s7585_s9 + $0x38] sm:$0xff] }
 0x573   : > { %v3748_v40 = vpop.f32.mrf.mxu1 }
 0x574   : > { %v3754_v2 = vadd.f32 %v3748_v40, %v3591_v20  ;;  %v4690_v40 = vld [vmem:[%s7585_s9 + $0x78] sm:$0xff]  ;;  %v4685_v20 = vld [vmem:[%s7585_s9 + $0x50] sm:$0xff] }
 0x575   : > { %v5367_v41 = vpop.f32.mrf.mxu1 }
 0x576   : > { %v4705_v41 = vld [vmem:[%s7585_s9 + $0xf0] sm:$0xff] }
 0x577   : > { %v3911_v49 = vpop.f32.mrf.mxu1 }
 0x578   : > { %v3917_v56 = vadd.f32 %v3911_v49, %v3754_v2  ;;  %v4684_v2 = vld [vmem:[%s7585_s9 + $0x48] sm:$0xff] }
 0x579   : > { %v5372_v37 = vpop.f32.mrf.mxu1 }
 0x57a   : > { %v4687_v37 = vld [vmem:[%s7585_s9 + $0x60] sm:$0xff] }
 0x57d   : > { %v7380_v22 = vpop.f32.mrf.mxu0 }
 0x57f   : > { %v2880_v46 = vpop.f32.mrf.mxu0  ;;  %v4074_v62 = vpop.f32.mrf.mxu1 }
 0x580   : > { %v4080_v60 = vadd.f32 %v4074_v62, %v3917_v56  ;;  %v4550_v62 = vsel %vm2614_vm10, %v7301_v42, %v7297_v3  ;;  %v4683_v56 = vld [vmem:[%s7585_s9 + $0x40] sm:$0xff]  ;;  %v4698_v3 = vld [vmem:[%s7585_s9 + $0xb8] sm:$0xff]  ;;  %vm7630_vm10 = vmmov %vm7627_vm7  ;;  %vm4936_vm7 = vcmask 523264  }
 0x581   : > { %v5377_v12 = vpop.f32.mrf.mxu1  ;;  %v4555_v42 = vadd.f32 %v4550_v62, %v7178_v16 }
 0x582   : > { %v3028_v31 = vpop.f32.mrf.mxu0  ;;  %v4564_v12 = vsel %vm7629_vm12, %v7303_v43, %v7299_v4  ;;  %v4578_v4 = vsel %vm7630_vm10, %v7313_v14, %v7309_v9  ;;  %v4696_v9 = vld [vmem:[%s7585_s9 + $0xa8] sm:$0xff]  ;;  %v4571_v14 = vadd.f32 %v7305_v53, %v7187_v18 }
 0x583   : > { %v3029_v57 = vadd.f32 %v3028_v31, %v7380_v22  ;;  %v4681_v22 = vld [vmem:[%s7585_s9 + $0x30] sm:$0xff]  ;;  %v4592_v31 = vsel %vm7631_vm0, %v7315_v63, %v7311_v10  ;;  %v4607_v10 = vsel %vm4606_vm14, %v7325_v21, %v7321_v13  ;;  %v4622_v13 = vsel %vm4621_vm8, %v7330_v25, %v7323_v58 }
 0x584   : > { %v3030_v0 = vpop.f32.mrf.mxu0  ;;  %v4237_v55 = vpop.f32.mrf.mxu1  ;;  %v4585_v18 = vadd.f32 %v7307_v8, %v4571_v14  ;;  %v4637_v58 = vsel %vm4636_vm5, %v7359_v5, %v7346_v28  ;;  %v4652_v28 = vsel %vm4651_vm6, %v7370_v30, %v7357_v1  ;;  %v4691_v30 = vld [vmem:[%s7585_s9 + $0x80] sm:$0xff] }
 0x585   : > { %v4243_v52 = vadd.f32 %v4237_v55, %v4080_v60  ;;  %v3031_v27 = vadd.f32 %v3030_v0, %v2880_v46  ;;  %v4697_v46 = vld [vmem:[%s7585_s9 + $0xb0] sm:$0xff]  ;;  %v4569_v0 = vadd.f32 %v4564_v12, %v4555_v42  ;;  %v4708_v42 = vld [vmem:[%s7585_s9 + $0x108] sm:$0x7] }
 0x586   : > { %v5382_v7 = vpop.f32.mrf.mxu1  ;;  %v4599_v8 = vadd.f32 %v7317_v15, %v4585_v18 }
 0x587   : > { %v3188_v29 = vpop.f32.mrf.mxu0  ;;  %5394 = vmatmul.mubr.msk.f32.vlgmr.msra.gmra.mxu1 %vm4287_vm11, %v4243_v52 }
 0x588   : > { %5254 = vmatpush3.msra.mxu1 %v4690_v40  ;;  %4781 = vmatprep.mubr.f32.mxu1 %v4673_v54  ;;  %v3263_v16 = vadd.f32 %v3188_v29, %v3029_v57  ;;  %v4583_v40 = vadd.f32 %v4578_v4, %v4569_v0  ;;  %v4695_v29 = vld [vmem:[%s7585_s9 + $0xa0] sm:$0xff]  ;;  %v4614_v15 = vadd.f32 %v7319_v45, %v4599_v8 }
 0x589   : > { %v3190_v49 = vpop.f32.mrf.mxu0  ;;  %5255 = vmatprep.subr.mxu1 %v4705_v41  ;;  %v4680_v41 = vld [vmem:[%s7585_s9 + $0x28] sm:$0xff] }
 0x58a   : > { %5256 = vmatpush3.msra.mxu1 %v4689_v44  ;;  %v3264_v43 = vadd.f32 %v3190_v49, %v3031_v27  ;;  %v4597_v53 = vadd.f32 %v4592_v31, %v4583_v40  ;;  %v4679_v49 = vld [vmem:[%s7585_s9 + $0x20] sm:$0xff]  ;;  %v4629_v45 = vadd.f32 %v7332_v26, %v4614_v15 }
 0x58b   : > { %v3351_v36 = vpop.f32.mrf.mxu0  ;;  %5257 = vmatprep.subr.mxu1 %v4704_v11 }
 0x58c   : > { %5258 = vmatpush3.msra.mxu1 %v4688_v61  ;;  %v3426_v54 = vadd.f32 %v3351_v36, %v3263_v16  ;;  %v4694_v61 = vld [vmem:[%s7585_s9 + $0x98] sm:$0xff]  ;;  %v4644_v12 = vadd.f32 %v7344_v6, %v4629_v45  ;;  %v4707_v6 = vld [vmem:[%s7585_s9 + $0x100] sm:$0xff] }
 0x58d   : > { %v3353_v35 = vpop.f32.mrf.mxu0  ;;  %5259 = vmatprep.subr.mxu1 %v4703_v17  ;;  %v4612_v17 = vadd.f32 %v4607_v10, %v4597_v53 }
 0x58e   : > { %5260 = vmatpush3.msra.mxu1 %v4687_v37  ;;  %v3427_v52 = vadd.f32 %v3353_v35, %v3264_v43  ;;  %v4693_v35 = vld [vmem:[%s7585_s9 + $0x90] sm:$0xff] }
 0x58f   : > { %v3514_v19 = vpop.f32.mrf.mxu0  ;;  %5261 = vmatprep.subr.mxu1 %v4702_v33  ;;  %v4678_v33 = vld [vmem:[%s7585_s9 + $0x18] sm:$0xff] }
 0x590   : > { %5262 = vmatpush3.msra.mxu1 %v4686_v38  ;;  %v3589_v44 = vadd.f32 %v3514_v19, %v3426_v54  ;;  %v4627_v38 = vadd.f32 %v4622_v13, %v4612_v17 }
 0x591   : > { %v3516_v24 = vpop.f32.mrf.mxu0  ;;  %5263 = vmatprep.subr.mxu1 %v4701_v59  ;;  %v4661_v59 = vpop.permute.xlu1 %4660 }
 0x592   : > { %5264 = vmatpush3.msra.mxu1 %v4685_v20  ;;  %v3590_v63 = vadd.f32 %v3516_v24, %v3427_v52  ;;  %v4692_v24 = vld [vmem:[%s7585_s9 + $0x88] sm:$0xff] }
 0x593   : > { %v3677_v51 = vpop.f32.mrf.mxu0  ;;  %5265 = vmatprep.subr.mxu1 %v4700_v23  ;;  %v4677_v23 = vld [vmem:[%s7585_s9 + $0x10] sm:$0xff] }
 0x594   : > { %5266 = vmatpush3.msra.mxu1 %v4684_v2  ;;  %v3752_v36 = vadd.f32 %v3677_v51, %v3589_v44  ;;  %v4642_v2 = vadd.f32 %v4637_v58, %v4627_v38  ;;  %v4676_v51 = vld [vmem:[%s7585_s9 + $0x8] sm:$0xff] }
 0x595   : > { %v3679_v60 = vpop.f32.mrf.mxu0  ;;  %5267 = vmatprep.subr.mxu1 %v4699_v47 }
 0x596   : > { %5268 = vmatpush3.msra.mxu1 %v4683_v56  ;;  %v3753_v21 = vadd.f32 %v3679_v60, %v3590_v63  ;;  %v4667_v56 = vsel %vm4666_vm9, %v4661_v59, %v7387_v50  ;;  %v4657_v26 = vadd.f32 %v4652_v28, %v4642_v2  ;;  %v4659_v50 = vadd.f32 %v7372_v32, %v4644_v12 }
 0x597   : > { %v3840_v55 = vpop.f32.mrf.mxu0  ;;  %5269 = vmatprep.subr.mxu1 %v4698_v3  ;;  %v4675_v3 = vld [vmem:[%s7585_s9] sm:$0xff] }
 0x598   : > { %5270 = vmatpush3.msra.mxu1 %v4682_v39  ;;  %v3915_v19 = vadd.f32 %v3840_v55, %v3752_v36  ;;  %v4672_v57 = vadd.f32 %v4667_v56, %v4657_v26  ;;  %v4674_v60 = vadd.f32 %v7385_v48, %v4659_v50  ;;  %v4285_v48 = vpop.permute.xlu0 %4284 }
 0x599   : > { %v3842_v7 = vpop.f32.mrf.mxu0  ;;  %5271 = vmatprep.subr.mxu1 %v4697_v46 }
 0x59a   : > { %5272 = vmatpush3.msra.mxu1 %v4681_v22  ;;  %v3916_v25 = vadd.f32 %v3842_v7, %v3753_v21 }
 0x59b   : > { %v4003_v11 = vpop.f32.mrf.mxu0  ;;  %5273 = vmatprep.subr.mxu1 %v4696_v9 }
 0x59c   : > { %5274 = vmatpush3.msra.mxu1 %v4680_v41  ;;  %v4078_v62 = vadd.f32 %v4003_v11, %v3915_v19 }
 0x59d   : > { %v4005_v37 = vpop.f32.mrf.mxu0  ;;  %5275 = vmatprep.subr.mxu1 %v4695_v29 }
 0x59e   : > { %5276 = vmatpush3.msra.mxu1 %v4679_v49  ;;  %v4079_v5 = vadd.f32 %v4005_v37, %v3916_v25 }
 0x59f   : > { %v4166_v20 = vpop.f32.mrf.mxu0  ;;  %5277 = vmatprep.subr.mxu1 %v4694_v61 }
 0x5a0   : > { %5278 = vmatpush3.msra.mxu1 %v4678_v33  ;;  %v4241_v27 = vadd.f32 %v4166_v20, %v4078_v62 }
 0x5a1   : > { %v4168_v47 = vpop.f32.mrf.mxu0  ;;  %5279 = vmatprep.subr.mxu1 %v4693_v35 }
 0x5a2   : > { %v4242_v1 = vadd.f32 %v4168_v47, %v4079_v5  ;;  %5280 = vmatpush3.msra.mxu1 %v4677_v23 }
 0x5a3   : > { %5281 = vmatprep.subr.mxu1 %v4692_v24 }
 0x5a4   : > { %4359 = vmatprep.mubr.f32.mxu0 %v4242_v1  ;;  %5282 = vmatpush3.msra.mxu1 %v4676_v51 }
 0x5a5   : > { %4360 = vmatmul.mubr.f32.vlgmr.msra.gmra.mxu0 %v4241_v27  ;;  %5283 = vmatprep.subr.mxu1 %v4691_v30 }
 0x5a6   : > { %5284 = vmatpush3.msra.mxu1 %v4675_v3  ;;  %5397 = vmatpush3.msk.msra.mxu0 %vm4713_vm4, %v4708_v42 }
 0x5a7   : > { %4782 = vmatmul.mubr.f32.vlgmr.msra.gmra.mxu1 %v4672_v57  ;;  %5398 = vmatprep.subr.mxu0 %v5539_v34 }
 0x5a8   : > { %5399 = vmatpush3.msra.mxu0 %v4707_v6  ;;  %5400 = vmatprep.mubr.msk.f32.mxu0 %vm5549_vm3, %v5539_v34 }
 0x5a9   : > { %5401 = vmatmul.mubr.msk.f32.vlgmr.msra.gmra.mxu0 %vm4709_vm13, %v4674_v60  ;;  %5403 = vmatprep.subr.mxu0 %v5539_v34 }
 0x5aa   : > { %5405 = vmatprep.mubr.msk.f32.mxu0 %vm5549_vm3, %v5539_v34  ;;  %v4857_v34 = vld [vmem:[%s7581_s5] sm:$0xff] }
 0x647   : > { %v4431_v32 = vpop.f32.mrf.mxu1 }
 0x649   : > { %v5395_v39 = vpop.f32.mrf.mxu1 }
 0x665   : > { %v5244_v4 = vpop.f32.mrf.mxu0 }
 0x667   : > { %v5245_v43 = vpop.f32.mrf.mxu0  ;;  %v5285_v46 = vpop.f32.mrf.mxu1 }
 0x668   : > { %v5246_v0 = vadd.f32 %v5245_v43, %v5244_v4 }
 0x669   : > { %v5286_v16 = vpop.f32.mrf.mxu1  ;;  %v4853_v55 = vpop.f32.mrf.mxu0 }
 0x66a   : > { %v4362_v22 = vadd.f32 %v5246_v0, %v4285_v48  ;;  %v5287_v31 = vadd.f32 %v5286_v16, %v5285_v46 }
 0x66b   : > { %v5402_v52 = vpop.f32.mrf.mxu0 }
 0x66c   : > { %v4432_v9 = vadd.f32 %v4431_v32, %v4362_v22  ;;  %v4854_v14 = vadd.f32 %v5287_v31, %v4853_v55 }
 0x66e   : > { %5404 = vmatpush3.msk.msra.mxu0 %vm618_vm1, %v4854_v14  ;;  %v4436_v40 = vmul.f32 0.2, %v4432_v9  ;;  %vm4435_vm3 = vcmp.ge.f32.partialorder %v4432_v9, 0.0 }
 0x66f   : > { %5406 = vmatmul.mubr.msk.f32.vlgmr.msra.gmra.mxu0 %vm614_vm2, %v4857_v34 }
 0x670   : > { %v4437_v54 = vsel %vm4435_vm3, %v4432_v9, %v4436_v40 }
 0x671   : > { %v4438_v7 = vmul.f32 1.4142135, %v4437_v54 }
 0x72f   : > { %v4930_v41 = vpop.f32.mrf.mxu0 }
 0x730   : > { %v4934_v10 = vadd.f32 %v4930_v41, %v4438_v7 }
 0x731   : > { %v5407_v63 = vpop.f32.mrf.mxu0 }
 0x732   : > { %v4935_v29 = vmul.f32 0.70710677, %v4934_v10 }
 0x734   : > { %4937 = vst.msk [vmem:[%s352_s11] sm:$0xff] %vm4936_vm7, %v4935_v29 }
 0x735   : > { %5490 = shalt.err (!%p5487_p3)
}
 0x736   : > { %s5491_s18 = scalar_lea.hbm %s4950_s12, 128  ;;  %s5495_s11 = scalar_lea.hbm %s7586_s10, 256 }
 0x737   : > { %p5492_p4 = scmp.ne.s32.totalorder %s4950_s12, %s5491_s18  ;;  %p5496_p9 = scmp.lt.s32.totalorder %s4950_s12, %s7586_s10 }
 0x738   : > { %p5497_p10 = scmp.lt.s32.totalorder %s5495_s11, %s5491_s18 }
 0x739   : > { %p5493_p7 = pnand %p5492_p4, %p5661_p5 }
 0x73a   : > { %p5498_p11 = por %p5497_p10, %p5496_p9 }
 0x73b   : > { %p5494_p8 = pneg %p5493_p7 }
 0x73d   : > { %p5499_p12 = pnand %p5498_p11, %p5494_p8 }
 0x73f   : > { %5502 = shalt.err (!%p5499_p12)
}
 0x740   : > { %5408 = dma.vmem_to_hbm [thread:$0]  (%p5661_p5), %s4953_s29, 128, %s4950_s12, %s4939_s25  }
 0x741 PF: > { %p5414_p13 = scmp.ge.s32.totalorder %s5537_s16, 2  ;;  %s4964_s26 = sand.u32 1, %s5525_s13  }
 0x742   : > { %s4965_s27 = scalar_lea.sflag [#allocation3], %s4964_s26 }
 0x743   : > { %p5411_p0 = pnand %p5414_p13, %p5665_p6 }
 0x745   : > { %p5412_p1 = pneg %p5411_p0 }
 0x747   : > { %5520 = dma.done.wait (%p5412_p1), %s4965_s27, 128  }
 0x748   : > { %5522 = vsyncadd (%p5412_p1), %s4965_s27, 4294967168  ;;  %s7632_s17 = sld [smem:[#allocation5_spill]]  ;;  %p20_p2 = scmp.ge.s32.totalorder %s5648_s19, 4  }
 0x749   : > { %s7633_s13 = smov %s5529_s14  ;;  %s7634_s14 = smov %s5533_s15 }
 0x74a   : > { %s7636_s16 = smov %s5648_s19  ;;  %22 = sbr.rel (!%p20_p2) target bundleno = 3 (0x3), region = 111 }
 0x74e   : > { %s7635_s15 = smov %s7632_s17 }
 0x74f   :  { %4970 = vsyncpa [#allocation3], 1 }
 0x750   :  { %4972 = vsyncpa [#allocation3 + $0x1], 1 }

</bundles_post_ra>
